<compile_context>
chip_gen: v6e
topology: v6e:2x2x1
jax: 0.10.0
libtpu: 0.0.40
codegen_flags: <defaults>
</compile_context>

<pallas_src>
import math

import jax
import jax.numpy as jnp
from jax import lax
from jax.experimental import pallas as pl
from jax.experimental.pallas import tpu as pltpu

# ---------------- model hyper-parameters (small, deterministic) -------------
BATCH = 2
SEQ = 8
INPUT_SIZE = 8
HIDDEN = 32
NUM_LAYERS = 2
NUM_HEADS = 4
EMBED = 2 * HIDDEN            # bidirectional LSTM output size
OUTPUT_SIZE = 1


# ========================= fused forward kernel =============================
def _fused_forward_kernel(x_ref, lstm_w_ref, attn_w_ref, fc_w_ref, bias_ref,
                          out_ref):
    B, T, F = x_ref.shape
    H = HIDDEN
    E = 2 * H
    G = 4 * H                       # gate width per direction
    nh = NUM_HEADS
    hd = E // nh

    # ---- unpack packed weight slabs (static, sublane-aligned value slices) --
    lw = lstm_w_ref[...]                              # (136, 8H)
    wih1 = lw[0:F, :]                                 # (F,   8H) = [fwd|bwd]
    whh1 = lw[F:F + H, :]                             # (H,   8H)
    wih2 = lw[F + H:F + H + E, :]                     # (E,   8H)
    whh2 = lw[F + H + E:F + H + E + H, :]             # (H,   8H)

    aw = attn_w_ref[...]                              # (2E, 3E)
    wqkv = aw[0:E, :]                                 # (E, 3E), Q cols pre-scaled
    wo = aw[E:2 * E, 0:E]                             # (E, E)

    fw = fc_w_ref[...]                                # (256, 128)
    fw1 = fw[0:E, :]                                  # (E, 128)
    fw2 = fw[E:E + 128, 0:64]                         # (128, 64)
    fw3 = fw[E + 128:E + 192, 0:OUTPUT_SIZE]          # (64, 1)

    b = bias_ref[...]                                 # (8, 256)
    bl1 = b[0:1, :]                                   # LSTM layer-1 bias (fwd|bwd)
    bl2 = b[1:2, :]                                   # LSTM layer-2 bias
    bqkv = b[2:3, 0:3 * E]
    bo = b[3:4, 0:E]
    fb1 = b[4:5, 0:128]
    fb2 = b[5:6, 0:64]
    fb3 = b[6:7, 0:OUTPUT_SIZE]

    # Row mask: first B rows of the stacked state = forward direction,
    # last B rows = backward direction (both share one 256-lane MXU matmul).
    row = lax.broadcasted_iota(jnp.int32, (2 * B, 1), 0)
    fwd_rows = row < B

    x = x_ref[...]                                    # (B, T, F) resident in VMEM
    x_steps = [x[:, t, :] for t in range(T)]          # forward-time order

    def bidir_layer(steps, w_ih, w_hh, b_row):
        """One bidirectional LSTM layer; both directions packed along sublanes."""
        # Hoisted input projection: all T steps x both directions in ONE matmul.
        # Rows [t*2B : t*2B+B] = input at time t (fwd), next B rows = time T-1-t (bwd).
        stacked = jnp.concatenate(
            [jnp.concatenate([steps[t], steps[T - 1 - t]], axis=0)
             for t in range(T)], axis=0)                        # (T*2B, Fin)
        xw = jnp.dot(stacked, w_ih,
                     preferred_element_type=jnp.float32) + b_row  # (T*2B, 8H)

        h = jnp.zeros((2 * B, H), jnp.float32)
        c = jnp.zeros((2 * B, H), jnp.float32)
        hs = []
        for t in range(T):                            # T=8, fully unrolled
            # Serial chain per step: one 256-lane MXU push + add.
            gates_full = xw[t * 2 * B:(t + 1) * 2 * B, :] + jnp.dot(
                h, w_hh, preferred_element_type=jnp.float32)      # (2B, 8H)
            # pick the valid 4H half per direction (cross terms discarded)
            gates = jnp.where(fwd_rows,
                              gates_full[:, 0:G], gates_full[:, G:2 * G])
            # whole-vreg activations: 1 sigmoid + 1 tanh pass over (2B, 4H)
            sg = jax.nn.sigmoid(gates)
            th = jnp.tanh(gates)
            i = sg[:, 0 * H:1 * H]                    # PyTorch gate order i,f,g,o
            f = sg[:, 1 * H:2 * H]
            g = th[:, 2 * H:3 * H]
            o = sg[:, 3 * H:4 * H]
            c = f * c + i * g
            h = o * jnp.tanh(c)
            hs.append(h)
        # Layer output at forward time t: concat(h_fwd(t), h_bwd(t)); the bwd
        # state for original time t was produced at backward step T-1-t.
        return [jnp.concatenate([hs[t][:B], hs[T - 1 - t][B:]], axis=-1)
                for t in range(T)]                    # list of (B, 2H)

    # ---- 2-layer bidirectional LSTM (inter-layer dropout = identity in eval)
    outs1 = bidir_layer(x_steps, wih1, whh1, bl1)
    outs2 = bidir_layer(outs1, wih2, whh2, bl2)

    # ---- multi-head self-attention (batch_first) + mean over time ----------
    lstm_seq = jnp.stack(outs2, axis=1)               # (B, T, E)
    x2d = lstm_seq.reshape(B * T, E)
    qkv = jnp.dot(x2d, wqkv,
                  preferred_element_type=jnp.float32) + bqkv      # (B*T, 3E)
    q = qkv[:, 0 * E:1 * E].reshape(B, T, E)          # Q already scaled by 1/sqrt(hd)
    k = qkv[:, 1 * E:2 * E].reshape(B, T, E)
    v = qkv[:, 2 * E:3 * E].reshape(B, T, E)

    # Per-head scores stacked along the sublane axis -> ONE batched softmax.
    s_all = jnp.concatenate(
        [jnp.einsum("btd,bsd->bts",
                    q[:, :, h * hd:(h + 1) * hd],
                    k[:, :, h * hd:(h + 1) * hd],
                    preferred_element_type=jnp.float32)
         for h in range(nh)], axis=1)                 # (B, nh*T, T)
    p_all = jax.nn.softmax(s_all, axis=-1)

    # Head outputs lane-concatenated -> ONE output-projection matmul.
    heads = [jnp.einsum("bts,bsd->btd",
                        p_all[:, h * T:(h + 1) * T, :],
                        v[:, :, h * hd:(h + 1) * hd],
                        preferred_element_type=jnp.float32)
             for h in range(nh)]
    attn = jnp.concatenate(heads, axis=-1)            # (B, T, E)
    out2d = jnp.dot(attn.reshape(B * T, E), wo,
                    preferred_element_type=jnp.float32) + bo      # (B*T, E)
    context = jnp.mean(out2d.reshape(B, T, E), axis=1)            # (B, E)
    # dropout(context) == identity at inference

    # ---- FC head: 2H -> 128 -> 64 -> 1 --------------------------------------
    h1 = jnp.maximum(
        jnp.dot(context, fw1, preferred_element_type=jnp.float32) + fb1, 0.0)
    h2 = jnp.maximum(
        jnp.dot(h1, fw2, preferred_element_type=jnp.float32) + fb2, 0.0)
    out_ref[...] = (
        jnp.dot(h2, fw3, preferred_element_type=jnp.float32) + fb3)
    # TODO(synk): training-time dropout / masking for padded sequences is not
    # implemented (inference-only forward).


def forward(x, params):
    """Full LSTMRegressor forward in a single pallas_call (6 VMEM operands)."""
    B = x.shape[0]
    vmem = pl.BlockSpec(memory_space=pltpu.MemorySpace.VMEM)
    return pl.pallas_call(
        _fused_forward_kernel,
        out_shape=jax.ShapeDtypeStruct((B, OUTPUT_SIZE), jnp.float32),
        in_specs=[vmem] * 5,
        out_specs=vmem,
        compiler_params=pltpu.CompilerParams(
            vmem_limit_bytes=16 * 1024 * 1024),
    )(x, params["lstm_w"], params["attn_w"], params["fc_w"], params["bias"])


# =========================== parameter initialization ========================
def _xavier_uniform(key, out_dim, in_dim):
    a = math.sqrt(6.0 / (in_dim + out_dim))
    return jax.random.uniform(key, (out_dim, in_dim), jnp.float32, -a, a)


def _kaiming_normal(key, out_dim, in_dim):
    std = math.sqrt(2.0 / in_dim)
    return jax.random.normal(key, (out_dim, in_dim), jnp.float32) * std


def init_params(key):
    keys = iter(jax.random.split(key, 32))
    H = HIDDEN
    E = EMBED

    # ---- LSTM: xavier_uniform weights (torch layout (4H, in)), zero biases.
    # Per layer, both directions packed column-wise -> (Fin, 8H) / (H, 8H);
    # all four matrices stacked row-wise into one slab:
    #   rows [0:8]=W_ih L1, [8:40]=W_hh L1, [40:104]=W_ih L2, [104:136]=W_hh L2
    mats = []
    layer_in = INPUT_SIZE
    for _ in range(NUM_LAYERS):
        wih_dirs, whh_dirs = [], []
        for _d in range(2):                                    # fwd, bwd
            wih_dirs.append(_xavier_uniform(next(keys), 4 * H, layer_in).T)
            whh_dirs.append(_xavier_uniform(next(keys), 4 * H, H).T)
        mats.append(jnp.concatenate(wih_dirs, axis=1))         # (Fin, 8H)
        mats.append(jnp.concatenate(whh_dirs, axis=1))         # (H,   8H)
        layer_in = E
    lstm_w = jnp.concatenate(mats, axis=0)                     # (136, 256)

    # ---- MultiheadAttention: default xavier in_proj, kaiming out_proj, zero
    # biases.  1/sqrt(head_dim) folded into the Q columns of the in-proj.
    scale = 1.0 / math.sqrt(E // NUM_HEADS)
    wqkv = _xavier_uniform(next(keys), 3 * E, E).T             # (E, 3E)
    wqkv = wqkv.at[:, 0:E].multiply(scale)
    wo = _kaiming_normal(next(keys), E, E).T                   # (E, E)
    attn_w = jnp.concatenate(
        [wqkv,
         jnp.concatenate([wo, jnp.zeros((E, 2 * E), jnp.float32)], axis=1)],
        axis=0)                                                # (128, 192)

    # ---- FC head: kaiming_normal weights, zero biases; one padded slab.
    #   rows [0:64]=W1 (64,128), [64:192]=W2 (128,64)+pad, [192:256]=W3 (64,1)+pad
    w1 = _kaiming_normal(next(keys), 128, E).T                 # (64, 128)
    w2 = _kaiming_normal(next(keys), 64, 128).T                # (128, 64)
    w3 = _kaiming_normal(next(keys), OUTPUT_SIZE, 64).T        # (64, 1)
    fc_w = jnp.concatenate([
        w1,
        jnp.concatenate([w2, jnp.zeros((128, 64), jnp.float32)], axis=1),
        jnp.concatenate([w3, jnp.zeros((64, 128 - OUTPUT_SIZE), jnp.float32)],
                        axis=1),
    ], axis=0)                                                 # (256, 128)

    # ---- bias slab (all zeros per initialize_weights / torch defaults).
    # Row map: 0 LSTM L1 (b_ih+b_hh, fwd|bwd), 1 LSTM L2, 2 attn in_proj
    # (Q part must be pre-scaled if ever nonzero), 3 attn out_proj,
    # 4 fc1, 5 fc2, 6 fc3.
    bias = jnp.zeros((8, 8 * H), jnp.float32)

    return {"lstm_w": lstm_w, "attn_w": attn_w, "fc_w": fc_w, "bias": bias}


# =================================== main ====================================
if __name__ == "__main__":
    key = jax.random.PRNGKey(0)
    k_x, k_p = jax.random.split(key)

    x = jax.random.normal(k_x, (BATCH, SEQ, INPUT_SIZE), jnp.float32)
    params = init_params(k_p)

    out = jax.jit(forward)(x, params)
    jax.block_until_ready(out)

    assert out.shape == (BATCH, OUTPUT_SIZE)
    assert out.dtype == jnp.float32
    assert bool(jnp.all(jnp.isfinite(out)))
    print("KERNEL_OK")
</pallas_src>

<mosaic_0001>
module attributes {stable_mosaic.version = 11 : i64} {
  func.func @_fused_forward_kernel(%arg0: memref<2x8x8xf32, #tpu.memory_space<vmem>>, %arg1: memref<136x256xf32, #tpu.memory_space<vmem>>, %arg2: memref<128x192xf32, #tpu.memory_space<vmem>>, %arg3: memref<256x128xf32, #tpu.memory_space<vmem>>, %arg4: memref<8x256xf32, #tpu.memory_space<vmem>>, %arg5: memref<2x1xf32, #tpu.memory_space<vmem>>) attributes {dimension_semantics = [], scalar_prefetch = 0 : i64, scratch_operands = 0 : i64, tpu.core_type = #tpu.core_type<tc>} {
    %c0 = arith.constant 0 : index
    %c0_0 = arith.constant 0 : index
    %0 = vector.load %arg1[%c0, %c0_0] : memref<136x256xf32, #tpu.memory_space<vmem>>, vector<136x256xf32>
    %1 = vector.extract_strided_slice %0 {offsets = [0, 0], sizes = [8, 256], strides = [1, 1]} : vector<136x256xf32> to vector<8x256xf32>
    %2 = vector.extract_strided_slice %0 {offsets = [8, 0], sizes = [32, 256], strides = [1, 1]} : vector<136x256xf32> to vector<32x256xf32>
    %3 = vector.extract_strided_slice %0 {offsets = [40, 0], sizes = [64, 256], strides = [1, 1]} : vector<136x256xf32> to vector<64x256xf32>
    %4 = vector.extract_strided_slice %0 {offsets = [104, 0], sizes = [32, 256], strides = [1, 1]} : vector<136x256xf32> to vector<32x256xf32>
    %c0_1 = arith.constant 0 : index
    %c0_2 = arith.constant 0 : index
    %5 = vector.load %arg2[%c0_1, %c0_2] : memref<128x192xf32, #tpu.memory_space<vmem>>, vector<128x192xf32>
    %6 = vector.extract_strided_slice %5 {offsets = [0, 0], sizes = [64, 192], strides = [1, 1]} : vector<128x192xf32> to vector<64x192xf32>
    %7 = vector.extract_strided_slice %5 {offsets = [64, 0], sizes = [64, 64], strides = [1, 1]} : vector<128x192xf32> to vector<64x64xf32>
    %c0_3 = arith.constant 0 : index
    %c0_4 = arith.constant 0 : index
    %8 = vector.load %arg3[%c0_3, %c0_4] : memref<256x128xf32, #tpu.memory_space<vmem>>, vector<256x128xf32>
    %9 = vector.extract_strided_slice %8 {offsets = [0, 0], sizes = [64, 128], strides = [1, 1]} : vector<256x128xf32> to vector<64x128xf32>
    %10 = vector.extract_strided_slice %8 {offsets = [64, 0], sizes = [128, 64], strides = [1, 1]} : vector<256x128xf32> to vector<128x64xf32>
    %11 = vector.extract_strided_slice %8 {offsets = [192, 0], sizes = [64, 1], strides = [1, 1]} : vector<256x128xf32> to vector<64x1xf32>
    %c0_5 = arith.constant 0 : index
    %c0_6 = arith.constant 0 : index
    %12 = vector.load %arg4[%c0_5, %c0_6] : memref<8x256xf32, #tpu.memory_space<vmem>>, vector<8x256xf32>
    %13 = vector.extract_strided_slice %12 {offsets = [0, 0], sizes = [1, 256], strides = [1, 1]} : vector<8x256xf32> to vector<1x256xf32>
    %14 = vector.extract_strided_slice %12 {offsets = [1, 0], sizes = [1, 256], strides = [1, 1]} : vector<8x256xf32> to vector<1x256xf32>
    %15 = vector.extract_strided_slice %12 {offsets = [2, 0], sizes = [1, 192], strides = [1, 1]} : vector<8x256xf32> to vector<1x192xf32>
    %16 = vector.extract_strided_slice %12 {offsets = [3, 0], sizes = [1, 64], strides = [1, 1]} : vector<8x256xf32> to vector<1x64xf32>
    %17 = vector.extract_strided_slice %12 {offsets = [4, 0], sizes = [1, 128], strides = [1, 1]} : vector<8x256xf32> to vector<1x128xf32>
    %18 = vector.extract_strided_slice %12 {offsets = [5, 0], sizes = [1, 64], strides = [1, 1]} : vector<8x256xf32> to vector<1x64xf32>
    %19 = vector.extract_strided_slice %12 {offsets = [6, 0], sizes = [1, 1], strides = [1, 1]} : vector<8x256xf32> to vector<1x1xf32>
    %20 = tpu.iota {dimensions = array<i32: 0>} : vector<4x1xi32>
    %c2_i32 = arith.constant 2 : i32
    %21 = vector.broadcast %c2_i32 : i32 to vector<4x1xi32>
    %22 = arith.cmpi slt, %20, %21 : vector<4x1xi32>
    %c0_7 = arith.constant 0 : index
    %c0_8 = arith.constant 0 : index
    %c0_9 = arith.constant 0 : index
    %23 = vector.load %arg0[%c0_7, %c0_8, %c0_9] : memref<2x8x8xf32, #tpu.memory_space<vmem>>, vector<2x8x8xf32>
    %24 = vector.extract_strided_slice %23 {offsets = [0, 0, 0], sizes = [2, 1, 8], strides = [1, 1, 1]} : vector<2x8x8xf32> to vector<2x1x8xf32>
    %25 = vector.shape_cast %24 : vector<2x1x8xf32> to vector<2x8xf32>
    %26 = vector.extract_strided_slice %23 {offsets = [0, 1, 0], sizes = [2, 1, 8], strides = [1, 1, 1]} : vector<2x8x8xf32> to vector<2x1x8xf32>
    %27 = vector.shape_cast %26 : vector<2x1x8xf32> to vector<2x8xf32>
    %28 = vector.extract_strided_slice %23 {offsets = [0, 2, 0], sizes = [2, 1, 8], strides = [1, 1, 1]} : vector<2x8x8xf32> to vector<2x1x8xf32>
    %29 = vector.shape_cast %28 : vector<2x1x8xf32> to vector<2x8xf32>
    %30 = vector.extract_strided_slice %23 {offsets = [0, 3, 0], sizes = [2, 1, 8], strides = [1, 1, 1]} : vector<2x8x8xf32> to vector<2x1x8xf32>
    %31 = vector.shape_cast %30 : vector<2x1x8xf32> to vector<2x8xf32>
    %32 = vector.extract_strided_slice %23 {offsets = [0, 4, 0], sizes = [2, 1, 8], strides = [1, 1, 1]} : vector<2x8x8xf32> to vector<2x1x8xf32>
    %33 = vector.shape_cast %32 : vector<2x1x8xf32> to vector<2x8xf32>
    %34 = vector.extract_strided_slice %23 {offsets = [0, 5, 0], sizes = [2, 1, 8], strides = [1, 1, 1]} : vector<2x8x8xf32> to vector<2x1x8xf32>
    %35 = vector.shape_cast %34 : vector<2x1x8xf32> to vector<2x8xf32>
    %36 = vector.extract_strided_slice %23 {offsets = [0, 6, 0], sizes = [2, 1, 8], strides = [1, 1, 1]} : vector<2x8x8xf32> to vector<2x1x8xf32>
    %37 = vector.shape_cast %36 : vector<2x1x8xf32> to vector<2x8xf32>
    %38 = vector.extract_strided_slice %23 {offsets = [0, 7, 0], sizes = [2, 1, 8], strides = [1, 1, 1]} : vector<2x8x8xf32> to vector<2x1x8xf32>
    %39 = vector.shape_cast %38 : vector<2x1x8xf32> to vector<2x8xf32>
    %40 = tpu.concatenate %25, %39 in 0 : vector<2x8xf32>, vector<2x8xf32> -> vector<4x8xf32>
    %41 = tpu.concatenate %27, %37 in 0 : vector<2x8xf32>, vector<2x8xf32> -> vector<4x8xf32>
    %42 = tpu.concatenate %29, %35 in 0 : vector<2x8xf32>, vector<2x8xf32> -> vector<4x8xf32>
    %43 = tpu.concatenate %31, %33 in 0 : vector<2x8xf32>, vector<2x8xf32> -> vector<4x8xf32>
    %44 = tpu.concatenate %33, %31 in 0 : vector<2x8xf32>, vector<2x8xf32> -> vector<4x8xf32>
    %45 = tpu.concatenate %35, %29 in 0 : vector<2x8xf32>, vector<2x8xf32> -> vector<4x8xf32>
    %46 = tpu.concatenate %37, %27 in 0 : vector<2x8xf32>, vector<2x8xf32> -> vector<4x8xf32>
    %47 = tpu.concatenate %39, %25 in 0 : vector<2x8xf32>, vector<2x8xf32> -> vector<4x8xf32>
    %48 = tpu.concatenate %40, %41, %42, %43, %44, %45, %46, %47 in 0 : vector<4x8xf32>, vector<4x8xf32>, vector<4x8xf32>, vector<4x8xf32>, vector<4x8xf32>, vector<4x8xf32>, vector<4x8xf32>, vector<4x8xf32> -> vector<32x8xf32>
    %cst = arith.constant dense<0.000000e+00> : vector<32x256xf32>
    %49 = tpu.matmul %48, %1, %cst {dimension_numbers = #tpu.dot_dimension_numbers<[1], [0], [0], [1], [0, 0, 1, 1], [], []>} : vector<32x8xf32>, vector<8x256xf32>, vector<32x256xf32> -> vector<32x256xf32>
    %50 = vector.broadcast %13 : vector<1x256xf32> to vector<32x256xf32>
    %51 = arith.addf %49, %50 : vector<32x256xf32>
    %cst_10 = arith.constant 0.000000e+00 : f32
    %52 = vector.broadcast %cst_10 : f32 to vector<4x32xf32>
    %cst_11 = arith.constant 0.000000e+00 : f32
    %53 = vector.broadcast %cst_11 : f32 to vector<4x32xf32>
    %54 = vector.extract_strided_slice %51 {offsets = [0, 0], sizes = [4, 256], strides = [1, 1]} : vector<32x256xf32> to vector<4x256xf32>
    %cst_12 = arith.constant dense<0.000000e+00> : vector<4x256xf32>
    %55 = tpu.matmul %52, %2, %cst_12 {dimension_numbers = #tpu.dot_dimension_numbers<[1], [0], [0], [1], [0, 0, 1, 1], [], []>} : vector<4x32xf32>, vector<32x256xf32>, vector<4x256xf32> -> vector<4x256xf32>
    %56 = arith.addf %54, %55 : vector<4x256xf32>
    %57 = vector.extract_strided_slice %56 {offsets = [0, 0], sizes = [4, 128], strides = [1, 1]} : vector<4x256xf32> to vector<4x128xf32>
    %58 = vector.extract_strided_slice %56 {offsets = [0, 128], sizes = [4, 128], strides = [1, 1]} : vector<4x256xf32> to vector<4x128xf32>
    %59 = vector.shape_cast %22 : vector<4x1xi1> to vector<4x1xi1>
    %60 = vector.broadcast %59 : vector<4x1xi1> to vector<4x128xi1>
    %61 = arith.select %60, %57, %58 : vector<4x128xi1>, vector<4x128xf32>
    %62 = arith.negf %61 : vector<4x128xf32>
    %63 = math.exp %62 : vector<4x128xf32>
    %cst_13 = arith.constant 1.000000e+00 : f32
    %64 = vector.broadcast %cst_13 : f32 to vector<4x128xf32>
    %65 = arith.addf %64, %63 : vector<4x128xf32>
    %66 = arith.divf %64, %65 : vector<4x128xf32>
    %67 = math.tanh %61 : vector<4x128xf32>
    %68 = vector.extract_strided_slice %66 {offsets = [0, 0], sizes = [4, 32], strides = [1, 1]} : vector<4x128xf32> to vector<4x32xf32>
    %69 = vector.extract_strided_slice %66 {offsets = [0, 32], sizes = [4, 32], strides = [1, 1]} : vector<4x128xf32> to vector<4x32xf32>
    %70 = vector.extract_strided_slice %67 {offsets = [0, 64], sizes = [4, 32], strides = [1, 1]} : vector<4x128xf32> to vector<4x32xf32>
    %71 = vector.extract_strided_slice %66 {offsets = [0, 96], sizes = [4, 32], strides = [1, 1]} : vector<4x128xf32> to vector<4x32xf32>
    %72 = arith.mulf %69, %53 : vector<4x32xf32>
    %73 = arith.mulf %68, %70 : vector<4x32xf32>
    %74 = arith.addf %72, %73 : vector<4x32xf32>
    %75 = math.tanh %74 : vector<4x32xf32>
    %76 = arith.mulf %71, %75 : vector<4x32xf32>
    %77 = vector.extract_strided_slice %51 {offsets = [4, 0], sizes = [4, 256], strides = [1, 1]} : vector<32x256xf32> to vector<4x256xf32>
    %cst_14 = arith.constant dense<0.000000e+00> : vector<4x256xf32>
    %78 = tpu.matmul %76, %2, %cst_14 {dimension_numbers = #tpu.dot_dimension_numbers<[1], [0], [0], [1], [0, 0, 1, 1], [], []>} : vector<4x32xf32>, vector<32x256xf32>, vector<4x256xf32> -> vector<4x256xf32>
    %79 = arith.addf %77, %78 : vector<4x256xf32>
    %80 = vector.extract_strided_slice %79 {offsets = [0, 0], sizes = [4, 128], strides = [1, 1]} : vector<4x256xf32> to vector<4x128xf32>
    %81 = vector.extract_strided_slice %79 {offsets = [0, 128], sizes = [4, 128], strides = [1, 1]} : vector<4x256xf32> to vector<4x128xf32>
    %82 = vector.shape_cast %22 : vector<4x1xi1> to vector<4x1xi1>
    %83 = vector.broadcast %82 : vector<4x1xi1> to vector<4x128xi1>
    %84 = arith.select %83, %80, %81 : vector<4x128xi1>, vector<4x128xf32>
    %85 = arith.negf %84 : vector<4x128xf32>
    %86 = math.exp %85 : vector<4x128xf32>
    %cst_15 = arith.constant 1.000000e+00 : f32
    %87 = vector.broadcast %cst_15 : f32 to vector<4x128xf32>
    %88 = arith.addf %87, %86 : vector<4x128xf32>
    %89 = arith.divf %87, %88 : vector<4x128xf32>
    %90 = math.tanh %84 : vector<4x128xf32>
    %91 = vector.extract_strided_slice %89 {offsets = [0, 0], sizes = [4, 32], strides = [1, 1]} : vector<4x128xf32> to vector<4x32xf32>
    %92 = vector.extract_strided_slice %89 {offsets = [0, 32], sizes = [4, 32], strides = [1, 1]} : vector<4x128xf32> to vector<4x32xf32>
    %93 = vector.extract_strided_slice %90 {offsets = [0, 64], sizes = [4, 32], strides = [1, 1]} : vector<4x128xf32> to vector<4x32xf32>
    %94 = vector.extract_strided_slice %89 {offsets = [0, 96], sizes = [4, 32], strides = [1, 1]} : vector<4x128xf32> to vector<4x32xf32>
    %95 = arith.mulf %92, %74 : vector<4x32xf32>
    %96 = arith.mulf %91, %93 : vector<4x32xf32>
    %97 = arith.addf %95, %96 : vector<4x32xf32>
    %98 = math.tanh %97 : vector<4x32xf32>
    %99 = arith.mulf %94, %98 : vector<4x32xf32>
    %100 = vector.extract_strided_slice %51 {offsets = [8, 0], sizes = [4, 256], strides = [1, 1]} : vector<32x256xf32> to vector<4x256xf32>
    %cst_16 = arith.constant dense<0.000000e+00> : vector<4x256xf32>
    %101 = tpu.matmul %99, %2, %cst_16 {dimension_numbers = #tpu.dot_dimension_numbers<[1], [0], [0], [1], [0, 0, 1, 1], [], []>} : vector<4x32xf32>, vector<32x256xf32>, vector<4x256xf32> -> vector<4x256xf32>
    %102 = arith.addf %100, %101 : vector<4x256xf32>
    %103 = vector.extract_strided_slice %102 {offsets = [0, 0], sizes = [4, 128], strides = [1, 1]} : vector<4x256xf32> to vector<4x128xf32>
    %104 = vector.extract_strided_slice %102 {offsets = [0, 128], sizes = [4, 128], strides = [1, 1]} : vector<4x256xf32> to vector<4x128xf32>
    %105 = vector.shape_cast %22 : vector<4x1xi1> to vector<4x1xi1>
    %106 = vector.broadcast %105 : vector<4x1xi1> to vector<4x128xi1>
    %107 = arith.select %106, %103, %104 : vector<4x128xi1>, vector<4x128xf32>
    %108 = arith.negf %107 : vector<4x128xf32>
    %109 = math.exp %108 : vector<4x128xf32>
    %cst_17 = arith.constant 1.000000e+00 : f32
    %110 = vector.broadcast %cst_17 : f32 to vector<4x128xf32>
    %111 = arith.addf %110, %109 : vector<4x128xf32>
    %112 = arith.divf %110, %111 : vector<4x128xf32>
    %113 = math.tanh %107 : vector<4x128xf32>
    %114 = vector.extract_strided_slice %112 {offsets = [0, 0], sizes = [4, 32], strides = [1, 1]} : vector<4x128xf32> to vector<4x32xf32>
    %115 = vector.extract_strided_slice %112 {offsets = [0, 32], sizes = [4, 32], strides = [1, 1]} : vector<4x128xf32> to vector<4x32xf32>
    %116 = vector.extract_strided_slice %113 {offsets = [0, 64], sizes = [4, 32], strides = [1, 1]} : vector<4x128xf32> to vector<4x32xf32>
    %117 = vector.extract_strided_slice %112 {offsets = [0, 96], sizes = [4, 32], strides = [1, 1]} : vector<4x128xf32> to vector<4x32xf32>
    %118 = arith.mulf %115, %97 : vector<4x32xf32>
    %119 = arith.mulf %114, %116 : vector<4x32xf32>
    %120 = arith.addf %118, %119 : vector<4x32xf32>
    %121 = math.tanh %120 : vector<4x32xf32>
    %122 = arith.mulf %117, %121 : vector<4x32xf32>
    %123 = vector.extract_strided_slice %51 {offsets = [12, 0], sizes = [4, 256], strides = [1, 1]} : vector<32x256xf32> to vector<4x256xf32>
    %cst_18 = arith.constant dense<0.000000e+00> : vector<4x256xf32>
    %124 = tpu.matmul %122, %2, %cst_18 {dimension_numbers = #tpu.dot_dimension_numbers<[1], [0], [0], [1], [0, 0, 1, 1], [], []>} : vector<4x32xf32>, vector<32x256xf32>, vector<4x256xf32> -> vector<4x256xf32>
    %125 = arith.addf %123, %124 : vector<4x256xf32>
    %126 = vector.extract_strided_slice %125 {offsets = [0, 0], sizes = [4, 128], strides = [1, 1]} : vector<4x256xf32> to vector<4x128xf32>
    %127 = vector.extract_strided_slice %125 {offsets = [0, 128], sizes = [4, 128], strides = [1, 1]} : vector<4x256xf32> to vector<4x128xf32>
    %128 = vector.shape_cast %22 : vector<4x1xi1> to vector<4x1xi1>
    %129 = vector.broadcast %128 : vector<4x1xi1> to vector<4x128xi1>
    %130 = arith.select %129, %126, %127 : vector<4x128xi1>, vector<4x128xf32>
    %131 = arith.negf %130 : vector<4x128xf32>
    %132 = math.exp %131 : vector<4x128xf32>
    %cst_19 = arith.constant 1.000000e+00 : f32
    %133 = vector.broadcast %cst_19 : f32 to vector<4x128xf32>
    %134 = arith.addf %133, %132 : vector<4x128xf32>
    %135 = arith.divf %133, %134 : vector<4x128xf32>
    %136 = math.tanh %130 : vector<4x128xf32>
    %137 = vector.extract_strided_slice %135 {offsets = [0, 0], sizes = [4, 32], strides = [1, 1]} : vector<4x128xf32> to vector<4x32xf32>
    %138 = vector.extract_strided_slice %135 {offsets = [0, 32], sizes = [4, 32], strides = [1, 1]} : vector<4x128xf32> to vector<4x32xf32>
    %139 = vector.extract_strided_slice %136 {offsets = [0, 64], sizes = [4, 32], strides = [1, 1]} : vector<4x128xf32> to vector<4x32xf32>
    %140 = vector.extract_strided_slice %135 {offsets = [0, 96], sizes = [4, 32], strides = [1, 1]} : vector<4x128xf32> to vector<4x32xf32>
    %141 = arith.mulf %138, %120 : vector<4x32xf32>
    %142 = arith.mulf %137, %139 : vector<4x32xf32>
    %143 = arith.addf %141, %142 : vector<4x32xf32>
    %144 = math.tanh %143 : vector<4x32xf32>
    %145 = arith.mulf %140, %144 : vector<4x32xf32>
    %146 = vector.extract_strided_slice %51 {offsets = [16, 0], sizes = [4, 256], strides = [1, 1]} : vector<32x256xf32> to vector<4x256xf32>
    %cst_20 = arith.constant dense<0.000000e+00> : vector<4x256xf32>
    %147 = tpu.matmul %145, %2, %cst_20 {dimension_numbers = #tpu.dot_dimension_numbers<[1], [0], [0], [1], [0, 0, 1, 1], [], []>} : vector<4x32xf32>, vector<32x256xf32>, vector<4x256xf32> -> vector<4x256xf32>
    %148 = arith.addf %146, %147 : vector<4x256xf32>
    %149 = vector.extract_strided_slice %148 {offsets = [0, 0], sizes = [4, 128], strides = [1, 1]} : vector<4x256xf32> to vector<4x128xf32>
    %150 = vector.extract_strided_slice %148 {offsets = [0, 128], sizes = [4, 128], strides = [1, 1]} : vector<4x256xf32> to vector<4x128xf32>
    %151 = vector.shape_cast %22 : vector<4x1xi1> to vector<4x1xi1>
    %152 = vector.broadcast %151 : vector<4x1xi1> to vector<4x128xi1>
    %153 = arith.select %152, %149, %150 : vector<4x128xi1>, vector<4x128xf32>
    %154 = arith.negf %153 : vector<4x128xf32>
    %155 = math.exp %154 : vector<4x128xf32>
    %cst_21 = arith.constant 1.000000e+00 : f32
    %156 = vector.broadcast %cst_21 : f32 to vector<4x128xf32>
    %157 = arith.addf %156, %155 : vector<4x128xf32>
    %158 = arith.divf %156, %157 : vector<4x128xf32>
    %159 = math.tanh %153 : vector<4x128xf32>
    %160 = vector.extract_strided_slice %158 {offsets = [0, 0], sizes = [4, 32], strides = [1, 1]} : vector<4x128xf32> to vector<4x32xf32>
    %161 = vector.extract_strided_slice %158 {offsets = [0, 32], sizes = [4, 32], strides = [1, 1]} : vector<4x128xf32> to vector<4x32xf32>
    %162 = vector.extract_strided_slice %159 {offsets = [0, 64], sizes = [4, 32], strides = [1, 1]} : vector<4x128xf32> to vector<4x32xf32>
    %163 = vector.extract_strided_slice %158 {offsets = [0, 96], sizes = [4, 32], strides = [1, 1]} : vector<4x128xf32> to vector<4x32xf32>
    %164 = arith.mulf %161, %143 : vector<4x32xf32>
    %165 = arith.mulf %160, %162 : vector<4x32xf32>
    %166 = arith.addf %164, %165 : vector<4x32xf32>
    %167 = math.tanh %166 : vector<4x32xf32>
    %168 = arith.mulf %163, %167 : vector<4x32xf32>
    %169 = vector.extract_strided_slice %51 {offsets = [20, 0], sizes = [4, 256], strides = [1, 1]} : vector<32x256xf32> to vector<4x256xf32>
    %cst_22 = arith.constant dense<0.000000e+00> : vector<4x256xf32>
    %170 = tpu.matmul %168, %2, %cst_22 {dimension_numbers = #tpu.dot_dimension_numbers<[1], [0], [0], [1], [0, 0, 1, 1], [], []>} : vector<4x32xf32>, vector<32x256xf32>, vector<4x256xf32> -> vector<4x256xf32>
    %171 = arith.addf %169, %170 : vector<4x256xf32>
    %172 = vector.extract_strided_slice %171 {offsets = [0, 0], sizes = [4, 128], strides = [1, 1]} : vector<4x256xf32> to vector<4x128xf32>
    %173 = vector.extract_strided_slice %171 {offsets = [0, 128], sizes = [4, 128], strides = [1, 1]} : vector<4x256xf32> to vector<4x128xf32>
    %174 = vector.shape_cast %22 : vector<4x1xi1> to vector<4x1xi1>
    %175 = vector.broadcast %174 : vector<4x1xi1> to vector<4x128xi1>
    %176 = arith.select %175, %172, %173 : vector<4x128xi1>, vector<4x128xf32>
    %177 = arith.negf %176 : vector<4x128xf32>
    %178 = math.exp %177 : vector<4x128xf32>
    %cst_23 = arith.constant 1.000000e+00 : f32
    %179 = vector.broadcast %cst_23 : f32 to vector<4x128xf32>
    %180 = arith.addf %179, %178 : vector<4x128xf32>
    %181 = arith.divf %179, %180 : vector<4x128xf32>
    %182 = math.tanh %176 : vector<4x128xf32>
    %183 = vector.extract_strided_slice %181 {offsets = [0, 0], sizes = [4, 32], strides = [1, 1]} : vector<4x128xf32> to vector<4x32xf32>
    %184 = vector.extract_strided_slice %181 {offsets = [0, 32], sizes = [4, 32], strides = [1, 1]} : vector<4x128xf32> to vector<4x32xf32>
    %185 = vector.extract_strided_slice %182 {offsets = [0, 64], sizes = [4, 32], strides = [1, 1]} : vector<4x128xf32> to vector<4x32xf32>
    %186 = vector.extract_strided_slice %181 {offsets = [0, 96], sizes = [4, 32], strides = [1, 1]} : vector<4x128xf32> to vector<4x32xf32>
    %187 = arith.mulf %184, %166 : vector<4x32xf32>
    %188 = arith.mulf %183, %185 : vector<4x32xf32>
    %189 = arith.addf %187, %188 : vector<4x32xf32>
    %190 = math.tanh %189 : vector<4x32xf32>
    %191 = arith.mulf %186, %190 : vector<4x32xf32>
    %192 = vector.extract_strided_slice %51 {offsets = [24, 0], sizes = [4, 256], strides = [1, 1]} : vector<32x256xf32> to vector<4x256xf32>
    %cst_24 = arith.constant dense<0.000000e+00> : vector<4x256xf32>
    %193 = tpu.matmul %191, %2, %cst_24 {dimension_numbers = #tpu.dot_dimension_numbers<[1], [0], [0], [1], [0, 0, 1, 1], [], []>} : vector<4x32xf32>, vector<32x256xf32>, vector<4x256xf32> -> vector<4x256xf32>
    %194 = arith.addf %192, %193 : vector<4x256xf32>
    %195 = vector.extract_strided_slice %194 {offsets = [0, 0], sizes = [4, 128], strides = [1, 1]} : vector<4x256xf32> to vector<4x128xf32>
    %196 = vector.extract_strided_slice %194 {offsets = [0, 128], sizes = [4, 128], strides = [1, 1]} : vector<4x256xf32> to vector<4x128xf32>
    %197 = vector.shape_cast %22 : vector<4x1xi1> to vector<4x1xi1>
    %198 = vector.broadcast %197 : vector<4x1xi1> to vector<4x128xi1>
    %199 = arith.select %198, %195, %196 : vector<4x128xi1>, vector<4x128xf32>
    %200 = arith.negf %199 : vector<4x128xf32>
    %201 = math.exp %200 : vector<4x128xf32>
    %cst_25 = arith.constant 1.000000e+00 : f32
    %202 = vector.broadcast %cst_25 : f32 to vector<4x128xf32>
    %203 = arith.addf %202, %201 : vector<4x128xf32>
    %204 = arith.divf %202, %203 : vector<4x128xf32>
    %205 = math.tanh %199 : vector<4x128xf32>
    %206 = vector.extract_strided_slice %204 {offsets = [0, 0], sizes = [4, 32], strides = [1, 1]} : vector<4x128xf32> to vector<4x32xf32>
    %207 = vector.extract_strided_slice %204 {offsets = [0, 32], sizes = [4, 32], strides = [1, 1]} : vector<4x128xf32> to vector<4x32xf32>
    %208 = vector.extract_strided_slice %205 {offsets = [0, 64], sizes = [4, 32], strides = [1, 1]} : vector<4x128xf32> to vector<4x32xf32>
    %209 = vector.extract_strided_slice %204 {offsets = [0, 96], sizes = [4, 32], strides = [1, 1]} : vector<4x128xf32> to vector<4x32xf32>
    %210 = arith.mulf %207, %189 : vector<4x32xf32>
    %211 = arith.mulf %206, %208 : vector<4x32xf32>
    %212 = arith.addf %210, %211 : vector<4x32xf32>
    %213 = math.tanh %212 : vector<4x32xf32>
    %214 = arith.mulf %209, %213 : vector<4x32xf32>
    %215 = vector.extract_strided_slice %51 {offsets = [28, 0], sizes = [4, 256], strides = [1, 1]} : vector<32x256xf32> to vector<4x256xf32>
    %cst_26 = arith.constant dense<0.000000e+00> : vector<4x256xf32>
    %216 = tpu.matmul %214, %2, %cst_26 {dimension_numbers = #tpu.dot_dimension_numbers<[1], [0], [0], [1], [0, 0, 1, 1], [], []>} : vector<4x32xf32>, vector<32x256xf32>, vector<4x256xf32> -> vector<4x256xf32>
    %217 = arith.addf %215, %216 : vector<4x256xf32>
    %218 = vector.extract_strided_slice %217 {offsets = [0, 0], sizes = [4, 128], strides = [1, 1]} : vector<4x256xf32> to vector<4x128xf32>
    %219 = vector.extract_strided_slice %217 {offsets = [0, 128], sizes = [4, 128], strides = [1, 1]} : vector<4x256xf32> to vector<4x128xf32>
    %220 = vector.shape_cast %22 : vector<4x1xi1> to vector<4x1xi1>
    %221 = vector.broadcast %220 : vector<4x1xi1> to vector<4x128xi1>
    %222 = arith.select %221, %218, %219 : vector<4x128xi1>, vector<4x128xf32>
    %223 = arith.negf %222 : vector<4x128xf32>
    %224 = math.exp %223 : vector<4x128xf32>
    %cst_27 = arith.constant 1.000000e+00 : f32
    %225 = vector.broadcast %cst_27 : f32 to vector<4x128xf32>
    %226 = arith.addf %225, %224 : vector<4x128xf32>
    %227 = arith.divf %225, %226 : vector<4x128xf32>
    %228 = math.tanh %222 : vector<4x128xf32>
    %229 = vector.extract_strided_slice %227 {offsets = [0, 0], sizes = [4, 32], strides = [1, 1]} : vector<4x128xf32> to vector<4x32xf32>
    %230 = vector.extract_strided_slice %227 {offsets = [0, 32], sizes = [4, 32], strides = [1, 1]} : vector<4x128xf32> to vector<4x32xf32>
    %231 = vector.extract_strided_slice %228 {offsets = [0, 64], sizes = [4, 32], strides = [1, 1]} : vector<4x128xf32> to vector<4x32xf32>
    %232 = vector.extract_strided_slice %227 {offsets = [0, 96], sizes = [4, 32], strides = [1, 1]} : vector<4x128xf32> to vector<4x32xf32>
    %233 = arith.mulf %230, %212 : vector<4x32xf32>
    %234 = arith.mulf %229, %231 : vector<4x32xf32>
    %235 = arith.addf %233, %234 : vector<4x32xf32>
    %236 = math.tanh %235 : vector<4x32xf32>
    %237 = arith.mulf %232, %236 : vector<4x32xf32>
    %238 = vector.extract_strided_slice %76 {offsets = [0, 0], sizes = [2, 32], strides = [1, 1]} : vector<4x32xf32> to vector<2x32xf32>
    %239 = vector.extract_strided_slice %237 {offsets = [2, 0], sizes = [2, 32], strides = [1, 1]} : vector<4x32xf32> to vector<2x32xf32>
    %240 = tpu.concatenate %238, %239 in 1 : vector<2x32xf32>, vector<2x32xf32> -> vector<2x64xf32>
    %241 = vector.extract_strided_slice %99 {offsets = [0, 0], sizes = [2, 32], strides = [1, 1]} : vector<4x32xf32> to vector<2x32xf32>
    %242 = vector.extract_strided_slice %214 {offsets = [2, 0], sizes = [2, 32], strides = [1, 1]} : vector<4x32xf32> to vector<2x32xf32>
    %243 = tpu.concatenate %241, %242 in 1 : vector<2x32xf32>, vector<2x32xf32> -> vector<2x64xf32>
    %244 = vector.extract_strided_slice %122 {offsets = [0, 0], sizes = [2, 32], strides = [1, 1]} : vector<4x32xf32> to vector<2x32xf32>
    %245 = vector.extract_strided_slice %191 {offsets = [2, 0], sizes = [2, 32], strides = [1, 1]} : vector<4x32xf32> to vector<2x32xf32>
    %246 = tpu.concatenate %244, %245 in 1 : vector<2x32xf32>, vector<2x32xf32> -> vector<2x64xf32>
    %247 = vector.extract_strided_slice %145 {offsets = [0, 0], sizes = [2, 32], strides = [1, 1]} : vector<4x32xf32> to vector<2x32xf32>
    %248 = vector.extract_strided_slice %168 {offsets = [2, 0], sizes = [2, 32], strides = [1, 1]} : vector<4x32xf32> to vector<2x32xf32>
    %249 = tpu.concatenate %247, %248 in 1 : vector<2x32xf32>, vector<2x32xf32> -> vector<2x64xf32>
    %250 = vector.extract_strided_slice %168 {offsets = [0, 0], sizes = [2, 32], strides = [1, 1]} : vector<4x32xf32> to vector<2x32xf32>
    %251 = vector.extract_strided_slice %145 {offsets = [2, 0], sizes = [2, 32], strides = [1, 1]} : vector<4x32xf32> to vector<2x32xf32>
    %252 = tpu.concatenate %250, %251 in 1 : vector<2x32xf32>, vector<2x32xf32> -> vector<2x64xf32>
    %253 = vector.extract_strided_slice %191 {offsets = [0, 0], sizes = [2, 32], strides = [1, 1]} : vector<4x32xf32> to vector<2x32xf32>
    %254 = vector.extract_strided_slice %122 {offsets = [2, 0], sizes = [2, 32], strides = [1, 1]} : vector<4x32xf32> to vector<2x32xf32>
    %255 = tpu.concatenate %253, %254 in 1 : vector<2x32xf32>, vector<2x32xf32> -> vector<2x64xf32>
    %256 = vector.extract_strided_slice %214 {offsets = [0, 0], sizes = [2, 32], strides = [1, 1]} : vector<4x32xf32> to vector<2x32xf32>
    %257 = vector.extract_strided_slice %99 {offsets = [2, 0], sizes = [2, 32], strides = [1, 1]} : vector<4x32xf32> to vector<2x32xf32>
    %258 = tpu.concatenate %256, %257 in 1 : vector<2x32xf32>, vector<2x32xf32> -> vector<2x64xf32>
    %259 = vector.extract_strided_slice %237 {offsets = [0, 0], sizes = [2, 32], strides = [1, 1]} : vector<4x32xf32> to vector<2x32xf32>
    %260 = vector.extract_strided_slice %76 {offsets = [2, 0], sizes = [2, 32], strides = [1, 1]} : vector<4x32xf32> to vector<2x32xf32>
    %261 = tpu.concatenate %259, %260 in 1 : vector<2x32xf32>, vector<2x32xf32> -> vector<2x64xf32>
    %262 = tpu.concatenate %240, %261 in 0 : vector<2x64xf32>, vector<2x64xf32> -> vector<4x64xf32>
    %263 = tpu.concatenate %243, %258 in 0 : vector<2x64xf32>, vector<2x64xf32> -> vector<4x64xf32>
    %264 = tpu.concatenate %246, %255 in 0 : vector<2x64xf32>, vector<2x64xf32> -> vector<4x64xf32>
    %265 = tpu.concatenate %249, %252 in 0 : vector<2x64xf32>, vector<2x64xf32> -> vector<4x64xf32>
    %266 = tpu.concatenate %252, %249 in 0 : vector<2x64xf32>, vector<2x64xf32> -> vector<4x64xf32>
    %267 = tpu.concatenate %255, %246 in 0 : vector<2x64xf32>, vector<2x64xf32> -> vector<4x64xf32>
    %268 = tpu.concatenate %258, %243 in 0 : vector<2x64xf32>, vector<2x64xf32> -> vector<4x64xf32>
    %269 = tpu.concatenate %261, %240 in 0 : vector<2x64xf32>, vector<2x64xf32> -> vector<4x64xf32>
    %270 = tpu.concatenate %262, %263, %264, %265, %266, %267, %268, %269 in 0 : vector<4x64xf32>, vector<4x64xf32>, vector<4x64xf32>, vector<4x64xf32>, vector<4x64xf32>, vector<4x64xf32>, vector<4x64xf32>, vector<4x64xf32> -> vector<32x64xf32>
    %cst_28 = arith.constant dense<0.000000e+00> : vector<32x256xf32>
    %271 = tpu.matmul %270, %3, %cst_28 {dimension_numbers = #tpu.dot_dimension_numbers<[1], [0], [0], [1], [0, 0, 1, 1], [], []>} : vector<32x64xf32>, vector<64x256xf32>, vector<32x256xf32> -> vector<32x256xf32>
    %272 = vector.broadcast %14 : vector<1x256xf32> to vector<32x256xf32>
    %273 = arith.addf %271, %272 : vector<32x256xf32>
    %cst_29 = arith.constant 0.000000e+00 : f32
    %274 = vector.broadcast %cst_29 : f32 to vector<4x32xf32>
    %cst_30 = arith.constant 0.000000e+00 : f32
    %275 = vector.broadcast %cst_30 : f32 to vector<4x32xf32>
    %276 = vector.extract_strided_slice %273 {offsets = [0, 0], sizes = [4, 256], strides = [1, 1]} : vector<32x256xf32> to vector<4x256xf32>
    %cst_31 = arith.constant dense<0.000000e+00> : vector<4x256xf32>
    %277 = tpu.matmul %274, %4, %cst_31 {dimension_numbers = #tpu.dot_dimension_numbers<[1], [0], [0], [1], [0, 0, 1, 1], [], []>} : vector<4x32xf32>, vector<32x256xf32>, vector<4x256xf32> -> vector<4x256xf32>
    %278 = arith.addf %276, %277 : vector<4x256xf32>
    %279 = vector.extract_strided_slice %278 {offsets = [0, 0], sizes = [4, 128], strides = [1, 1]} : vector<4x256xf32> to vector<4x128xf32>
    %280 = vector.extract_strided_slice %278 {offsets = [0, 128], sizes = [4, 128], strides = [1, 1]} : vector<4x256xf32> to vector<4x128xf32>
    %281 = vector.shape_cast %22 : vector<4x1xi1> to vector<4x1xi1>
    %282 = vector.broadcast %281 : vector<4x1xi1> to vector<4x128xi1>
    %283 = arith.select %282, %279, %280 : vector<4x128xi1>, vector<4x128xf32>
    %284 = arith.negf %283 : vector<4x128xf32>
    %285 = math.exp %284 : vector<4x128xf32>
    %cst_32 = arith.constant 1.000000e+00 : f32
    %286 = vector.broadcast %cst_32 : f32 to vector<4x128xf32>
    %287 = arith.addf %286, %285 : vector<4x128xf32>
    %288 = arith.divf %286, %287 : vector<4x128xf32>
    %289 = math.tanh %283 : vector<4x128xf32>
    %290 = vector.extract_strided_slice %288 {offsets = [0, 0], sizes = [4, 32], strides = [1, 1]} : vector<4x128xf32> to vector<4x32xf32>
    %291 = vector.extract_strided_slice %288 {offsets = [0, 32], sizes = [4, 32], strides = [1, 1]} : vector<4x128xf32> to vector<4x32xf32>
    %292 = vector.extract_strided_slice %289 {offsets = [0, 64], sizes = [4, 32], strides = [1, 1]} : vector<4x128xf32> to vector<4x32xf32>
    %293 = vector.extract_strided_slice %288 {offsets = [0, 96], sizes = [4, 32], strides = [1, 1]} : vector<4x128xf32> to vector<4x32xf32>
    %294 = arith.mulf %291, %275 : vector<4x32xf32>
    %295 = arith.mulf %290, %292 : vector<4x32xf32>
    %296 = arith.addf %294, %295 : vector<4x32xf32>
    %297 = math.tanh %296 : vector<4x32xf32>
    %298 = arith.mulf %293, %297 : vector<4x32xf32>
    %299 = vector.extract_strided_slice %273 {offsets = [4, 0], sizes = [4, 256], strides = [1, 1]} : vector<32x256xf32> to vector<4x256xf32>
    %cst_33 = arith.constant dense<0.000000e+00> : vector<4x256xf32>
    %300 = tpu.matmul %298, %4, %cst_33 {dimension_numbers = #tpu.dot_dimension_numbers<[1], [0], [0], [1], [0, 0, 1, 1], [], []>} : vector<4x32xf32>, vector<32x256xf32>, vector<4x256xf32> -> vector<4x256xf32>
    %301 = arith.addf %299, %300 : vector<4x256xf32>
    %302 = vector.extract_strided_slice %301 {offsets = [0, 0], sizes = [4, 128], strides = [1, 1]} : vector<4x256xf32> to vector<4x128xf32>
    %303 = vector.extract_strided_slice %301 {offsets = [0, 128], sizes = [4, 128], strides = [1, 1]} : vector<4x256xf32> to vector<4x128xf32>
    %304 = vector.shape_cast %22 : vector<4x1xi1> to vector<4x1xi1>
    %305 = vector.broadcast %304 : vector<4x1xi1> to vector<4x128xi1>
    %306 = arith.select %305, %302, %303 : vector<4x128xi1>, vector<4x128xf32>
    %307 = arith.negf %306 : vector<4x128xf32>
    %308 = math.exp %307 : vector<4x128xf32>
    %cst_34 = arith.constant 1.000000e+00 : f32
    %309 = vector.broadcast %cst_34 : f32 to vector<4x128xf32>
    %310 = arith.addf %309, %308 : vector<4x128xf32>
    %311 = arith.divf %309, %310 : vector<4x128xf32>
    %312 = math.tanh %306 : vector<4x128xf32>
    %313 = vector.extract_strided_slice %311 {offsets = [0, 0], sizes = [4, 32], strides = [1, 1]} : vector<4x128xf32> to vector<4x32xf32>
    %314 = vector.extract_strided_slice %311 {offsets = [0, 32], sizes = [4, 32], strides = [1, 1]} : vector<4x128xf32> to vector<4x32xf32>
    %315 = vector.extract_strided_slice %312 {offsets = [0, 64], sizes = [4, 32], strides = [1, 1]} : vector<4x128xf32> to vector<4x32xf32>
    %316 = vector.extract_strided_slice %311 {offsets = [0, 96], sizes = [4, 32], strides = [1, 1]} : vector<4x128xf32> to vector<4x32xf32>
    %317 = arith.mulf %314, %296 : vector<4x32xf32>
    %318 = arith.mulf %313, %315 : vector<4x32xf32>
    %319 = arith.addf %317, %318 : vector<4x32xf32>
    %320 = math.tanh %319 : vector<4x32xf32>
    %321 = arith.mulf %316, %320 : vector<4x32xf32>
    %322 = vector.extract_strided_slice %273 {offsets = [8, 0], sizes = [4, 256], strides = [1, 1]} : vector<32x256xf32> to vector<4x256xf32>
    %cst_35 = arith.constant dense<0.000000e+00> : vector<4x256xf32>
    %323 = tpu.matmul %321, %4, %cst_35 {dimension_numbers = #tpu.dot_dimension_numbers<[1], [0], [0], [1], [0, 0, 1, 1], [], []>} : vector<4x32xf32>, vector<32x256xf32>, vector<4x256xf32> -> vector<4x256xf32>
    %324 = arith.addf %322, %323 : vector<4x256xf32>
    %325 = vector.extract_strided_slice %324 {offsets = [0, 0], sizes = [4, 128], strides = [1, 1]} : vector<4x256xf32> to vector<4x128xf32>
    %326 = vector.extract_strided_slice %324 {offsets = [0, 128], sizes = [4, 128], strides = [1, 1]} : vector<4x256xf32> to vector<4x128xf32>
    %327 = vector.shape_cast %22 : vector<4x1xi1> to vector<4x1xi1>
    %328 = vector.broadcast %327 : vector<4x1xi1> to vector<4x128xi1>
    %329 = arith.select %328, %325, %326 : vector<4x128xi1>, vector<4x128xf32>
    %330 = arith.negf %329 : vector<4x128xf32>
    %331 = math.exp %330 : vector<4x128xf32>
    %cst_36 = arith.constant 1.000000e+00 : f32
    %332 = vector.broadcast %cst_36 : f32 to vector<4x128xf32>
    %333 = arith.addf %332, %331 : vector<4x128xf32>
    %334 = arith.divf %332, %333 : vector<4x128xf32>
    %335 = math.tanh %329 : vector<4x128xf32>
    %336 = vector.extract_strided_slice %334 {offsets = [0, 0], sizes = [4, 32], strides = [1, 1]} : vector<4x128xf32> to vector<4x32xf32>
    %337 = vector.extract_strided_slice %334 {offsets = [0, 32], sizes = [4, 32], strides = [1, 1]} : vector<4x128xf32> to vector<4x32xf32>
    %338 = vector.extract_strided_slice %335 {offsets = [0, 64], sizes = [4, 32], strides = [1, 1]} : vector<4x128xf32> to vector<4x32xf32>
    %339 = vector.extract_strided_slice %334 {offsets = [0, 96], sizes = [4, 32], strides = [1, 1]} : vector<4x128xf32> to vector<4x32xf32>
    %340 = arith.mulf %337, %319 : vector<4x32xf32>
    %341 = arith.mulf %336, %338 : vector<4x32xf32>
    %342 = arith.addf %340, %341 : vector<4x32xf32>
    %343 = math.tanh %342 : vector<4x32xf32>
    %344 = arith.mulf %339, %343 : vector<4x32xf32>
    %345 = vector.extract_strided_slice %273 {offsets = [12, 0], sizes = [4, 256], strides = [1, 1]} : vector<32x256xf32> to vector<4x256xf32>
    %cst_37 = arith.constant dense<0.000000e+00> : vector<4x256xf32>
    %346 = tpu.matmul %344, %4, %cst_37 {dimension_numbers = #tpu.dot_dimension_numbers<[1], [0], [0], [1], [0, 0, 1, 1], [], []>} : vector<4x32xf32>, vector<32x256xf32>, vector<4x256xf32> -> vector<4x256xf32>
    %347 = arith.addf %345, %346 : vector<4x256xf32>
    %348 = vector.extract_strided_slice %347 {offsets = [0, 0], sizes = [4, 128], strides = [1, 1]} : vector<4x256xf32> to vector<4x128xf32>
    %349 = vector.extract_strided_slice %347 {offsets = [0, 128], sizes = [4, 128], strides = [1, 1]} : vector<4x256xf32> to vector<4x128xf32>
    %350 = vector.shape_cast %22 : vector<4x1xi1> to vector<4x1xi1>
    %351 = vector.broadcast %350 : vector<4x1xi1> to vector<4x128xi1>
    %352 = arith.select %351, %348, %349 : vector<4x128xi1>, vector<4x128xf32>
    %353 = arith.negf %352 : vector<4x128xf32>
    %354 = math.exp %353 : vector<4x128xf32>
    %cst_38 = arith.constant 1.000000e+00 : f32
    %355 = vector.broadcast %cst_38 : f32 to vector<4x128xf32>
    %356 = arith.addf %355, %354 : vector<4x128xf32>
    %357 = arith.divf %355, %356 : vector<4x128xf32>
    %358 = math.tanh %352 : vector<4x128xf32>
    %359 = vector.extract_strided_slice %357 {offsets = [0, 0], sizes = [4, 32], strides = [1, 1]} : vector<4x128xf32> to vector<4x32xf32>
    %360 = vector.extract_strided_slice %357 {offsets = [0, 32], sizes = [4, 32], strides = [1, 1]} : vector<4x128xf32> to vector<4x32xf32>
    %361 = vector.extract_strided_slice %358 {offsets = [0, 64], sizes = [4, 32], strides = [1, 1]} : vector<4x128xf32> to vector<4x32xf32>
    %362 = vector.extract_strided_slice %357 {offsets = [0, 96], sizes = [4, 32], strides = [1, 1]} : vector<4x128xf32> to vector<4x32xf32>
    %363 = arith.mulf %360, %342 : vector<4x32xf32>
    %364 = arith.mulf %359, %361 : vector<4x32xf32>
    %365 = arith.addf %363, %364 : vector<4x32xf32>
    %366 = math.tanh %365 : vector<4x32xf32>
    %367 = arith.mulf %362, %366 : vector<4x32xf32>
    %368 = vector.extract_strided_slice %273 {offsets = [16, 0], sizes = [4, 256], strides = [1, 1]} : vector<32x256xf32> to vector<4x256xf32>
    %cst_39 = arith.constant dense<0.000000e+00> : vector<4x256xf32>
    %369 = tpu.matmul %367, %4, %cst_39 {dimension_numbers = #tpu.dot_dimension_numbers<[1], [0], [0], [1], [0, 0, 1, 1], [], []>} : vector<4x32xf32>, vector<32x256xf32>, vector<4x256xf32> -> vector<4x256xf32>
    %370 = arith.addf %368, %369 : vector<4x256xf32>
    %371 = vector.extract_strided_slice %370 {offsets = [0, 0], sizes = [4, 128], strides = [1, 1]} : vector<4x256xf32> to vector<4x128xf32>
    %372 = vector.extract_strided_slice %370 {offsets = [0, 128], sizes = [4, 128], strides = [1, 1]} : vector<4x256xf32> to vector<4x128xf32>
    %373 = vector.shape_cast %22 : vector<4x1xi1> to vector<4x1xi1>
    %374 = vector.broadcast %373 : vector<4x1xi1> to vector<4x128xi1>
    %375 = arith.select %374, %371, %372 : vector<4x128xi1>, vector<4x128xf32>
    %376 = arith.negf %375 : vector<4x128xf32>
    %377 = math.exp %376 : vector<4x128xf32>
    %cst_40 = arith.constant 1.000000e+00 : f32
    %378 = vector.broadcast %cst_40 : f32 to vector<4x128xf32>
    %379 = arith.addf %378, %377 : vector<4x128xf32>
    %380 = arith.divf %378, %379 : vector<4x128xf32>
    %381 = math.tanh %375 : vector<4x128xf32>
    %382 = vector.extract_strided_slice %380 {offsets = [0, 0], sizes = [4, 32], strides = [1, 1]} : vector<4x128xf32> to vector<4x32xf32>
    %383 = vector.extract_strided_slice %380 {offsets = [0, 32], sizes = [4, 32], strides = [1, 1]} : vector<4x128xf32> to vector<4x32xf32>
    %384 = vector.extract_strided_slice %381 {offsets = [0, 64], sizes = [4, 32], strides = [1, 1]} : vector<4x128xf32> to vector<4x32xf32>
    %385 = vector.extract_strided_slice %380 {offsets = [0, 96], sizes = [4, 32], strides = [1, 1]} : vector<4x128xf32> to vector<4x32xf32>
    %386 = arith.mulf %383, %365 : vector<4x32xf32>
    %387 = arith.mulf %382, %384 : vector<4x32xf32>
    %388 = arith.addf %386, %387 : vector<4x32xf32>
    %389 = math.tanh %388 : vector<4x32xf32>
    %390 = arith.mulf %385, %389 : vector<4x32xf32>
    %391 = vector.extract_strided_slice %273 {offsets = [20, 0], sizes = [4, 256], strides = [1, 1]} : vector<32x256xf32> to vector<4x256xf32>
    %cst_41 = arith.constant dense<0.000000e+00> : vector<4x256xf32>
    %392 = tpu.matmul %390, %4, %cst_41 {dimension_numbers = #tpu.dot_dimension_numbers<[1], [0], [0], [1], [0, 0, 1, 1], [], []>} : vector<4x32xf32>, vector<32x256xf32>, vector<4x256xf32> -> vector<4x256xf32>
    %393 = arith.addf %391, %392 : vector<4x256xf32>
    %394 = vector.extract_strided_slice %393 {offsets = [0, 0], sizes = [4, 128], strides = [1, 1]} : vector<4x256xf32> to vector<4x128xf32>
    %395 = vector.extract_strided_slice %393 {offsets = [0, 128], sizes = [4, 128], strides = [1, 1]} : vector<4x256xf32> to vector<4x128xf32>
    %396 = vector.shape_cast %22 : vector<4x1xi1> to vector<4x1xi1>
    %397 = vector.broadcast %396 : vector<4x1xi1> to vector<4x128xi1>
    %398 = arith.select %397, %394, %395 : vector<4x128xi1>, vector<4x128xf32>
    %399 = arith.negf %398 : vector<4x128xf32>
    %400 = math.exp %399 : vector<4x128xf32>
    %cst_42 = arith.constant 1.000000e+00 : f32
    %401 = vector.broadcast %cst_42 : f32 to vector<4x128xf32>
    %402 = arith.addf %401, %400 : vector<4x128xf32>
    %403 = arith.divf %401, %402 : vector<4x128xf32>
    %404 = math.tanh %398 : vector<4x128xf32>
    %405 = vector.extract_strided_slice %403 {offsets = [0, 0], sizes = [4, 32], strides = [1, 1]} : vector<4x128xf32> to vector<4x32xf32>
    %406 = vector.extract_strided_slice %403 {offsets = [0, 32], sizes = [4, 32], strides = [1, 1]} : vector<4x128xf32> to vector<4x32xf32>
    %407 = vector.extract_strided_slice %404 {offsets = [0, 64], sizes = [4, 32], strides = [1, 1]} : vector<4x128xf32> to vector<4x32xf32>
    %408 = vector.extract_strided_slice %403 {offsets = [0, 96], sizes = [4, 32], strides = [1, 1]} : vector<4x128xf32> to vector<4x32xf32>
    %409 = arith.mulf %406, %388 : vector<4x32xf32>
    %410 = arith.mulf %405, %407 : vector<4x32xf32>
    %411 = arith.addf %409, %410 : vector<4x32xf32>
    %412 = math.tanh %411 : vector<4x32xf32>
    %413 = arith.mulf %408, %412 : vector<4x32xf32>
    %414 = vector.extract_strided_slice %273 {offsets = [24, 0], sizes = [4, 256], strides = [1, 1]} : vector<32x256xf32> to vector<4x256xf32>
    %cst_43 = arith.constant dense<0.000000e+00> : vector<4x256xf32>
    %415 = tpu.matmul %413, %4, %cst_43 {dimension_numbers = #tpu.dot_dimension_numbers<[1], [0], [0], [1], [0, 0, 1, 1], [], []>} : vector<4x32xf32>, vector<32x256xf32>, vector<4x256xf32> -> vector<4x256xf32>
    %416 = arith.addf %414, %415 : vector<4x256xf32>
    %417 = vector.extract_strided_slice %416 {offsets = [0, 0], sizes = [4, 128], strides = [1, 1]} : vector<4x256xf32> to vector<4x128xf32>
    %418 = vector.extract_strided_slice %416 {offsets = [0, 128], sizes = [4, 128], strides = [1, 1]} : vector<4x256xf32> to vector<4x128xf32>
    %419 = vector.shape_cast %22 : vector<4x1xi1> to vector<4x1xi1>
    %420 = vector.broadcast %419 : vector<4x1xi1> to vector<4x128xi1>
    %421 = arith.select %420, %417, %418 : vector<4x128xi1>, vector<4x128xf32>
    %422 = arith.negf %421 : vector<4x128xf32>
    %423 = math.exp %422 : vector<4x128xf32>
    %cst_44 = arith.constant 1.000000e+00 : f32
    %424 = vector.broadcast %cst_44 : f32 to vector<4x128xf32>
    %425 = arith.addf %424, %423 : vector<4x128xf32>
    %426 = arith.divf %424, %425 : vector<4x128xf32>
    %427 = math.tanh %421 : vector<4x128xf32>
    %428 = vector.extract_strided_slice %426 {offsets = [0, 0], sizes = [4, 32], strides = [1, 1]} : vector<4x128xf32> to vector<4x32xf32>
    %429 = vector.extract_strided_slice %426 {offsets = [0, 32], sizes = [4, 32], strides = [1, 1]} : vector<4x128xf32> to vector<4x32xf32>
    %430 = vector.extract_strided_slice %427 {offsets = [0, 64], sizes = [4, 32], strides = [1, 1]} : vector<4x128xf32> to vector<4x32xf32>
    %431 = vector.extract_strided_slice %426 {offsets = [0, 96], sizes = [4, 32], strides = [1, 1]} : vector<4x128xf32> to vector<4x32xf32>
    %432 = arith.mulf %429, %411 : vector<4x32xf32>
    %433 = arith.mulf %428, %430 : vector<4x32xf32>
    %434 = arith.addf %432, %433 : vector<4x32xf32>
    %435 = math.tanh %434 : vector<4x32xf32>
    %436 = arith.mulf %431, %435 : vector<4x32xf32>
    %437 = vector.extract_strided_slice %273 {offsets = [28, 0], sizes = [4, 256], strides = [1, 1]} : vector<32x256xf32> to vector<4x256xf32>
    %cst_45 = arith.constant dense<0.000000e+00> : vector<4x256xf32>
    %438 = tpu.matmul %436, %4, %cst_45 {dimension_numbers = #tpu.dot_dimension_numbers<[1], [0], [0], [1], [0, 0, 1, 1], [], []>} : vector<4x32xf32>, vector<32x256xf32>, vector<4x256xf32> -> vector<4x256xf32>
    %439 = arith.addf %437, %438 : vector<4x256xf32>
    %440 = vector.extract_strided_slice %439 {offsets = [0, 0], sizes = [4, 128], strides = [1, 1]} : vector<4x256xf32> to vector<4x128xf32>
    %441 = vector.extract_strided_slice %439 {offsets = [0, 128], sizes = [4, 128], strides = [1, 1]} : vector<4x256xf32> to vector<4x128xf32>
    %442 = vector.shape_cast %22 : vector<4x1xi1> to vector<4x1xi1>
    %443 = vector.broadcast %442 : vector<4x1xi1> to vector<4x128xi1>
    %444 = arith.select %443, %440, %441 : vector<4x128xi1>, vector<4x128xf32>
    %445 = arith.negf %444 : vector<4x128xf32>
    %446 = math.exp %445 : vector<4x128xf32>
    %cst_46 = arith.constant 1.000000e+00 : f32
    %447 = vector.broadcast %cst_46 : f32 to vector<4x128xf32>
    %448 = arith.addf %447, %446 : vector<4x128xf32>
    %449 = arith.divf %447, %448 : vector<4x128xf32>
    %450 = math.tanh %444 : vector<4x128xf32>
    %451 = vector.extract_strided_slice %449 {offsets = [0, 0], sizes = [4, 32], strides = [1, 1]} : vector<4x128xf32> to vector<4x32xf32>
    %452 = vector.extract_strided_slice %449 {offsets = [0, 32], sizes = [4, 32], strides = [1, 1]} : vector<4x128xf32> to vector<4x32xf32>
    %453 = vector.extract_strided_slice %450 {offsets = [0, 64], sizes = [4, 32], strides = [1, 1]} : vector<4x128xf32> to vector<4x32xf32>
    %454 = vector.extract_strided_slice %449 {offsets = [0, 96], sizes = [4, 32], strides = [1, 1]} : vector<4x128xf32> to vector<4x32xf32>
    %455 = arith.mulf %452, %434 : vector<4x32xf32>
    %456 = arith.mulf %451, %453 : vector<4x32xf32>
    %457 = arith.addf %455, %456 : vector<4x32xf32>
    %458 = math.tanh %457 : vector<4x32xf32>
    %459 = arith.mulf %454, %458 : vector<4x32xf32>
    %460 = vector.extract_strided_slice %298 {offsets = [0, 0], sizes = [2, 32], strides = [1, 1]} : vector<4x32xf32> to vector<2x32xf32>
    %461 = vector.extract_strided_slice %459 {offsets = [2, 0], sizes = [2, 32], strides = [1, 1]} : vector<4x32xf32> to vector<2x32xf32>
    %462 = tpu.concatenate %460, %461 in 1 : vector<2x32xf32>, vector<2x32xf32> -> vector<2x64xf32>
    %463 = vector.extract_strided_slice %321 {offsets = [0, 0], sizes = [2, 32], strides = [1, 1]} : vector<4x32xf32> to vector<2x32xf32>
    %464 = vector.extract_strided_slice %436 {offsets = [2, 0], sizes = [2, 32], strides = [1, 1]} : vector<4x32xf32> to vector<2x32xf32>
    %465 = tpu.concatenate %463, %464 in 1 : vector<2x32xf32>, vector<2x32xf32> -> vector<2x64xf32>
    %466 = vector.extract_strided_slice %344 {offsets = [0, 0], sizes = [2, 32], strides = [1, 1]} : vector<4x32xf32> to vector<2x32xf32>
    %467 = vector.extract_strided_slice %413 {offsets = [2, 0], sizes = [2, 32], strides = [1, 1]} : vector<4x32xf32> to vector<2x32xf32>
    %468 = tpu.concatenate %466, %467 in 1 : vector<2x32xf32>, vector<2x32xf32> -> vector<2x64xf32>
    %469 = vector.extract_strided_slice %367 {offsets = [0, 0], sizes = [2, 32], strides = [1, 1]} : vector<4x32xf32> to vector<2x32xf32>
    %470 = vector.extract_strided_slice %390 {offsets = [2, 0], sizes = [2, 32], strides = [1, 1]} : vector<4x32xf32> to vector<2x32xf32>
    %471 = tpu.concatenate %469, %470 in 1 : vector<2x32xf32>, vector<2x32xf32> -> vector<2x64xf32>
    %472 = vector.extract_strided_slice %390 {offsets = [0, 0], sizes = [2, 32], strides = [1, 1]} : vector<4x32xf32> to vector<2x32xf32>
    %473 = vector.extract_strided_slice %367 {offsets = [2, 0], sizes = [2, 32], strides = [1, 1]} : vector<4x32xf32> to vector<2x32xf32>
    %474 = tpu.concatenate %472, %473 in 1 : vector<2x32xf32>, vector<2x32xf32> -> vector<2x64xf32>
    %475 = vector.extract_strided_slice %413 {offsets = [0, 0], sizes = [2, 32], strides = [1, 1]} : vector<4x32xf32> to vector<2x32xf32>
    %476 = vector.extract_strided_slice %344 {offsets = [2, 0], sizes = [2, 32], strides = [1, 1]} : vector<4x32xf32> to vector<2x32xf32>
    %477 = tpu.concatenate %475, %476 in 1 : vector<2x32xf32>, vector<2x32xf32> -> vector<2x64xf32>
    %478 = vector.extract_strided_slice %436 {offsets = [0, 0], sizes = [2, 32], strides = [1, 1]} : vector<4x32xf32> to vector<2x32xf32>
    %479 = vector.extract_strided_slice %321 {offsets = [2, 0], sizes = [2, 32], strides = [1, 1]} : vector<4x32xf32> to vector<2x32xf32>
    %480 = tpu.concatenate %478, %479 in 1 : vector<2x32xf32>, vector<2x32xf32> -> vector<2x64xf32>
    %481 = vector.extract_strided_slice %459 {offsets = [0, 0], sizes = [2, 32], strides = [1, 1]} : vector<4x32xf32> to vector<2x32xf32>
    %482 = vector.extract_strided_slice %298 {offsets = [2, 0], sizes = [2, 32], strides = [1, 1]} : vector<4x32xf32> to vector<2x32xf32>
    %483 = tpu.concatenate %481, %482 in 1 : vector<2x32xf32>, vector<2x32xf32> -> vector<2x64xf32>
    %484 = vector.shape_cast %462 : vector<2x64xf32> to vector<2x1x64xf32>
    %485 = vector.shape_cast %465 : vector<2x64xf32> to vector<2x1x64xf32>
    %486 = vector.shape_cast %468 : vector<2x64xf32> to vector<2x1x64xf32>
    %487 = vector.shape_cast %471 : vector<2x64xf32> to vector<2x1x64xf32>
    %488 = vector.shape_cast %474 : vector<2x64xf32> to vector<2x1x64xf32>
    %489 = vector.shape_cast %477 : vector<2x64xf32> to vector<2x1x64xf32>
    %490 = vector.shape_cast %480 : vector<2x64xf32> to vector<2x1x64xf32>
    %491 = vector.shape_cast %483 : vector<2x64xf32> to vector<2x1x64xf32>
    %492 = tpu.concatenate %484, %485, %486, %487, %488, %489, %490, %491 in 1 : vector<2x1x64xf32>, vector<2x1x64xf32>, vector<2x1x64xf32>, vector<2x1x64xf32>, vector<2x1x64xf32>, vector<2x1x64xf32>, vector<2x1x64xf32>, vector<2x1x64xf32> -> vector<2x8x64xf32>
    %493 = vector.shape_cast %492 : vector<2x8x64xf32> to vector<16x64xf32>
    %cst_47 = arith.constant dense<0.000000e+00> : vector<16x192xf32>
    %494 = tpu.matmul %493, %6, %cst_47 {dimension_numbers = #tpu.dot_dimension_numbers<[1], [0], [0], [1], [0, 0, 1, 1], [], []>} : vector<16x64xf32>, vector<64x192xf32>, vector<16x192xf32> -> vector<16x192xf32>
    %495 = vector.broadcast %15 : vector<1x192xf32> to vector<16x192xf32>
    %496 = arith.addf %494, %495 : vector<16x192xf32>
    %497 = vector.extract_strided_slice %496 {offsets = [0, 0], sizes = [16, 64], strides = [1, 1]} : vector<16x192xf32> to vector<16x64xf32>
    %498 = vector.shape_cast %497 : vector<16x64xf32> to vector<2x8x64xf32>
    %499 = vector.extract_strided_slice %496 {offsets = [0, 64], sizes = [16, 64], strides = [1, 1]} : vector<16x192xf32> to vector<16x64xf32>
    %500 = vector.shape_cast %499 : vector<16x64xf32> to vector<2x8x64xf32>
    %501 = vector.extract_strided_slice %496 {offsets = [0, 128], sizes = [16, 64], strides = [1, 1]} : vector<16x192xf32> to vector<16x64xf32>
    %502 = vector.shape_cast %501 : vector<16x64xf32> to vector<2x8x64xf32>
    %503 = vector.extract_strided_slice %498 {offsets = [0, 0, 0], sizes = [2, 8, 16], strides = [1, 1, 1]} : vector<2x8x64xf32> to vector<2x8x16xf32>
    %504 = vector.extract_strided_slice %500 {offsets = [0, 0, 0], sizes = [2, 8, 16], strides = [1, 1, 1]} : vector<2x8x64xf32> to vector<2x8x16xf32>
    "tpu.trace_start"() <{level = 10 : i32, message = "btd,bsd->bts"}> : () -> ()
    %cst_48 = arith.constant dense<0.000000e+00> : vector<2x8x8xf32>
    %505 = tpu.matmul %503, %504, %cst_48 {dimension_numbers = #tpu.dot_dimension_numbers<[2], [2], [1], [1], [0, 0, 0, 1, 1, 1], [0], [0]>} : vector<2x8x16xf32>, vector<2x8x16xf32>, vector<2x8x8xf32> -> vector<2x8x8xf32>
    "tpu.trace_stop"() : () -> ()
    %506 = vector.extract_strided_slice %498 {offsets = [0, 0, 16], sizes = [2, 8, 16], strides = [1, 1, 1]} : vector<2x8x64xf32> to vector<2x8x16xf32>
    %507 = vector.extract_strided_slice %500 {offsets = [0, 0, 16], sizes = [2, 8, 16], strides = [1, 1, 1]} : vector<2x8x64xf32> to vector<2x8x16xf32>
    "tpu.trace_start"() <{level = 10 : i32, message = "btd,bsd->bts"}> : () -> ()
    %cst_49 = arith.constant dense<0.000000e+00> : vector<2x8x8xf32>
    %508 = tpu.matmul %506, %507, %cst_49 {dimension_numbers = #tpu.dot_dimension_numbers<[2], [2], [1], [1], [0, 0, 0, 1, 1, 1], [0], [0]>} : vector<2x8x16xf32>, vector<2x8x16xf32>, vector<2x8x8xf32> -> vector<2x8x8xf32>
    "tpu.trace_stop"() : () -> ()
    %509 = vector.extract_strided_slice %498 {offsets = [0, 0, 32], sizes = [2, 8, 16], strides = [1, 1, 1]} : vector<2x8x64xf32> to vector<2x8x16xf32>
    %510 = vector.extract_strided_slice %500 {offsets = [0, 0, 32], sizes = [2, 8, 16], strides = [1, 1, 1]} : vector<2x8x64xf32> to vector<2x8x16xf32>
    "tpu.trace_start"() <{level = 10 : i32, message = "btd,bsd->bts"}> : () -> ()
    %cst_50 = arith.constant dense<0.000000e+00> : vector<2x8x8xf32>
    %511 = tpu.matmul %509, %510, %cst_50 {dimension_numbers = #tpu.dot_dimension_numbers<[2], [2], [1], [1], [0, 0, 0, 1, 1, 1], [0], [0]>} : vector<2x8x16xf32>, vector<2x8x16xf32>, vector<2x8x8xf32> -> vector<2x8x8xf32>
    "tpu.trace_stop"() : () -> ()
    %512 = vector.extract_strided_slice %498 {offsets = [0, 0, 48], sizes = [2, 8, 16], strides = [1, 1, 1]} : vector<2x8x64xf32> to vector<2x8x16xf32>
    %513 = vector.extract_strided_slice %500 {offsets = [0, 0, 48], sizes = [2, 8, 16], strides = [1, 1, 1]} : vector<2x8x64xf32> to vector<2x8x16xf32>
    "tpu.trace_start"() <{level = 10 : i32, message = "btd,bsd->bts"}> : () -> ()
    %cst_51 = arith.constant dense<0.000000e+00> : vector<2x8x8xf32>
    %514 = tpu.matmul %512, %513, %cst_51 {dimension_numbers = #tpu.dot_dimension_numbers<[2], [2], [1], [1], [0, 0, 0, 1, 1, 1], [0], [0]>} : vector<2x8x16xf32>, vector<2x8x16xf32>, vector<2x8x8xf32> -> vector<2x8x8xf32>
    "tpu.trace_stop"() : () -> ()
    %515 = tpu.concatenate %505, %508, %511, %514 in 1 : vector<2x8x8xf32>, vector<2x8x8xf32>, vector<2x8x8xf32>, vector<2x8x8xf32> -> vector<2x32x8xf32>
    %cst_52 = arith.constant dense<0xFF800000> : vector<2x32xf32>
    %516 = vector.multi_reduction <maximumf>, %515, %cst_52 [2] : vector<2x32x8xf32> to vector<2x32xf32>
    %cst_53 = arith.constant 0xFF800000 : f32
    %517 = vector.broadcast %cst_53 : f32 to vector<2x32xf32>
    %518 = arith.maximumf %517, %516 : vector<2x32xf32>
    %519 = vector.shape_cast %518 : vector<2x32xf32> to vector<2x32x1xf32>
    %520 = vector.broadcast %519 : vector<2x32x1xf32> to vector<2x32x8xf32>
    %521 = arith.subf %515, %520 : vector<2x32x8xf32>
    %522 = math.exp %521 : vector<2x32x8xf32>
    %cst_54 = arith.constant dense<0.000000e+00> : vector<2x32xf32>
    %523 = vector.multi_reduction <add>, %522, %cst_54 [2] : vector<2x32x8xf32> to vector<2x32xf32>
    %524 = vector.shape_cast %523 : vector<2x32xf32> to vector<2x32x1xf32>
    %525 = vector.broadcast %524 : vector<2x32x1xf32> to vector<2x32x8xf32>
    %526 = arith.divf %522, %525 : vector<2x32x8xf32>
    %527 = vector.extract_strided_slice %526 {offsets = [0, 0, 0], sizes = [2, 8, 8], strides = [1, 1, 1]} : vector<2x32x8xf32> to vector<2x8x8xf32>
    %528 = vector.extract_strided_slice %502 {offsets = [0, 0, 0], sizes = [2, 8, 16], strides = [1, 1, 1]} : vector<2x8x64xf32> to vector<2x8x16xf32>
    "tpu.trace_start"() <{level = 10 : i32, message = "bts,bsd->btd"}> : () -> ()
    %cst_55 = arith.constant dense<0.000000e+00> : vector<2x8x16xf32>
    %529 = tpu.matmul %527, %528, %cst_55 {dimension_numbers = #tpu.dot_dimension_numbers<[2], [1], [1], [2], [0, 0, 0, 1, 1, 2], [0], [0]>} : vector<2x8x8xf32>, vector<2x8x16xf32>, vector<2x8x16xf32> -> vector<2x8x16xf32>
    "tpu.trace_stop"() : () -> ()
    %530 = vector.extract_strided_slice %526 {offsets = [0, 8, 0], sizes = [2, 8, 8], strides = [1, 1, 1]} : vector<2x32x8xf32> to vector<2x8x8xf32>
    %531 = vector.extract_strided_slice %502 {offsets = [0, 0, 16], sizes = [2, 8, 16], strides = [1, 1, 1]} : vector<2x8x64xf32> to vector<2x8x16xf32>
    "tpu.trace_start"() <{level = 10 : i32, message = "bts,bsd->btd"}> : () -> ()
    %cst_56 = arith.constant dense<0.000000e+00> : vector<2x8x16xf32>
    %532 = tpu.matmul %530, %531, %cst_56 {dimension_numbers = #tpu.dot_dimension_numbers<[2], [1], [1], [2], [0, 0, 0, 1, 1, 2], [0], [0]>} : vector<2x8x8xf32>, vector<2x8x16xf32>, vector<2x8x16xf32> -> vector<2x8x16xf32>
    "tpu.trace_stop"() : () -> ()
    %533 = vector.extract_strided_slice %526 {offsets = [0, 16, 0], sizes = [2, 8, 8], strides = [1, 1, 1]} : vector<2x32x8xf32> to vector<2x8x8xf32>
    %534 = vector.extract_strided_slice %502 {offsets = [0, 0, 32], sizes = [2, 8, 16], strides = [1, 1, 1]} : vector<2x8x64xf32> to vector<2x8x16xf32>
    "tpu.trace_start"() <{level = 10 : i32, message = "bts,bsd->btd"}> : () -> ()
    %cst_57 = arith.constant dense<0.000000e+00> : vector<2x8x16xf32>
    %535 = tpu.matmul %533, %534, %cst_57 {dimension_numbers = #tpu.dot_dimension_numbers<[2], [1], [1], [2], [0, 0, 0, 1, 1, 2], [0], [0]>} : vector<2x8x8xf32>, vector<2x8x16xf32>, vector<2x8x16xf32> -> vector<2x8x16xf32>
    "tpu.trace_stop"() : () -> ()
    %536 = vector.extract_strided_slice %526 {offsets = [0, 24, 0], sizes = [2, 8, 8], strides = [1, 1, 1]} : vector<2x32x8xf32> to vector<2x8x8xf32>
    %537 = vector.extract_strided_slice %502 {offsets = [0, 0, 48], sizes = [2, 8, 16], strides = [1, 1, 1]} : vector<2x8x64xf32> to vector<2x8x16xf32>
    "tpu.trace_start"() <{level = 10 : i32, message = "bts,bsd->btd"}> : () -> ()
    %cst_58 = arith.constant dense<0.000000e+00> : vector<2x8x16xf32>
    %538 = tpu.matmul %536, %537, %cst_58 {dimension_numbers = #tpu.dot_dimension_numbers<[2], [1], [1], [2], [0, 0, 0, 1, 1, 2], [0], [0]>} : vector<2x8x8xf32>, vector<2x8x16xf32>, vector<2x8x16xf32> -> vector<2x8x16xf32>
    "tpu.trace_stop"() : () -> ()
    %539 = tpu.concatenate %529, %532, %535, %538 in 2 : vector<2x8x16xf32>, vector<2x8x16xf32>, vector<2x8x16xf32>, vector<2x8x16xf32> -> vector<2x8x64xf32>
    %540 = vector.shape_cast %539 : vector<2x8x64xf32> to vector<16x64xf32>
    %cst_59 = arith.constant dense<0.000000e+00> : vector<16x64xf32>
    %541 = tpu.matmul %540, %7, %cst_59 {dimension_numbers = #tpu.dot_dimension_numbers<[1], [0], [0], [1], [0, 0, 1, 1], [], []>} : vector<16x64xf32>, vector<64x64xf32>, vector<16x64xf32> -> vector<16x64xf32>
    %542 = vector.broadcast %16 : vector<1x64xf32> to vector<16x64xf32>
    %543 = arith.addf %541, %542 : vector<16x64xf32>
    %544 = vector.shape_cast %543 : vector<16x64xf32> to vector<2x8x64xf32>
    %cst_60 = arith.constant dense<0.000000e+00> : vector<2x64xf32>
    %545 = vector.multi_reduction <add>, %544, %cst_60 [1] : vector<2x8x64xf32> to vector<2x64xf32>
    %cst_61 = arith.constant 8.000000e+00 : f32
    %546 = vector.broadcast %cst_61 : f32 to vector<2x64xf32>
    %547 = arith.divf %545, %546 : vector<2x64xf32>
    %cst_62 = arith.constant dense<0.000000e+00> : vector<2x128xf32>
    %548 = tpu.matmul %547, %9, %cst_62 {dimension_numbers = #tpu.dot_dimension_numbers<[1], [0], [0], [1], [0, 0, 1, 1], [], []>} : vector<2x64xf32>, vector<64x128xf32>, vector<2x128xf32> -> vector<2x128xf32>
    %549 = vector.broadcast %17 : vector<1x128xf32> to vector<2x128xf32>
    %550 = arith.addf %548, %549 : vector<2x128xf32>
    %cst_63 = arith.constant 0.000000e+00 : f32
    %551 = vector.broadcast %cst_63 : f32 to vector<2x128xf32>
    %552 = arith.maximumf %550, %551 : vector<2x128xf32>
    %cst_64 = arith.constant dense<0.000000e+00> : vector<2x64xf32>
    %553 = tpu.matmul %552, %10, %cst_64 {dimension_numbers = #tpu.dot_dimension_numbers<[1], [0], [0], [1], [0, 0, 1, 1], [], []>} : vector<2x128xf32>, vector<128x64xf32>, vector<2x64xf32> -> vector<2x64xf32>
    %554 = vector.broadcast %18 : vector<1x64xf32> to vector<2x64xf32>
    %555 = arith.addf %553, %554 : vector<2x64xf32>
    %cst_65 = arith.constant 0.000000e+00 : f32
    %556 = vector.broadcast %cst_65 : f32 to vector<2x64xf32>
    %557 = arith.maximumf %555, %556 : vector<2x64xf32>
    %cst_66 = arith.constant dense<0.000000e+00> : vector<2x1xf32>
    %558 = tpu.matmul %557, %11, %cst_66 {dimension_numbers = #tpu.dot_dimension_numbers<[1], [0], [0], [1], [0, 0, 1, 1], [], []>} : vector<2x64xf32>, vector<64x1xf32>, vector<2x1xf32> -> vector<2x1xf32>
    %559 = vector.broadcast %19 : vector<1x1xf32> to vector<2x1xf32>
    %560 = arith.addf %558, %559 : vector<2x1xf32>
    %c0_67 = arith.constant 0 : index
    %c0_68 = arith.constant 0 : index
    %561 = vector.load %arg5[%c0_67, %c0_68] : memref<2x1xf32, #tpu.memory_space<vmem>>, vector<2x1xf32>
    tpu.vector_store %arg5[%c0_67, %c0_68], %560 {strides = array<i32>} : memref<2x1xf32, #tpu.memory_space<vmem>>, vector<2x1xf32>,
    return
  }
}

</mosaic_0001>

<bundles_post_ra>
// kernel: forward.1
= control target key start
LH: loop header
LB: loop body
LE: loop exit
PB: predicated region body
PF: predicated region fallthrough
CT: control target
= control target key end

     0   :  { %10 = vsyncpa [#allocation3], 0  ;;  %s4886_s18 = smov [#allocation2]   ;;  %s5963_s0 = inlined_call_operand.vmem [shape: f32[2,8,8], index: 0, kind: input, shape index: {}]   ;;  %s5964_s1 = inlined_call_operand.vmem [shape: f32[136,256], index: 1, kind: input, shape index: {}]   ;;  %s5965_s2 = inlined_call_operand.vmem [shape: f32[128,192], index: 2, kind: input, shape index: {}]   ;;  %s5966_s3 = inlined_call_operand.hbm [shape: f32[256,128], index: 3, kind: input, shape index: {}]   ;;  %s5967_s4 = inlined_call_operand.vmem [shape: f32[8,256], index: 4, kind: input, shape index: {}]   ;;  %s5968_s5 = inlined_call_operand.vmem [shape: f32[2,1], index: 5, kind: output, shape index: {}]  }
   0x1   :  { %s22_s19 = sshll.u32 %s4886_s18, 4  ;;  %s23_s19 = int_to_ptr.vmem [resolvable:$true] %s22_s19 }
   0x2   :  { %s4872_s20 = scalar_lea.vmem %s23_s19, 4096  ;;  %p4877_p1 = scmp.lt.s32.totalorder %s23_s19, %s23_s19 }
   0x3   :  { %p4873_p0 = scmp.ne.s32.totalorder %s23_s19, %s4872_s20  ;;  %p4878_p2 = scmp.lt.s32.totalorder %s4872_s20, %s4872_s20 }
   0x5   :  { %p4879_p3 = por %p4878_p2, %p4877_p1 }
   0x7   :  { %p4880_p4 = pnand %p4879_p3, %p4873_p0 }
   0x9   :  { %4883 = shalt.err (!%p4880_p4)
}
   0xa   :  { %s4887_s21 = smov 128   ;;  %s4888_s22 = smov 8  }
   0xb   :  { %28 = dma.hbm_to_vmem [thread:$0]  %s5966_s3, 4096, %s23_s19, [#allocation3], %s4887_s21, %s4887_s21, %s4888_s22  }
   0xc   :  { %4884 = dma.done.wait [#allocation3], 4096  }
   0xd   :  { %4885 = vsyncadd [#allocation3], 4294963200  ;;  %v4889_v0 = vmov 0.0   ;;  %v35_v1 = vld [vmem:[%s5964_s1 + $0x8] sm:$0xff]  ;;  %v34_v2 = vld [vmem:[%s5964_s1] sm:$0xff]  ;;  %vm134_vm0 = vcmask 1041409   ;;  %v126_v47 = vlaneseq }
   0xe   :  { %304 = vmatprep.mubr.f32.mxu1 %v4889_v0  ;;  %292 = vmatprep.mubr.f32.mxu0 %v4889_v0  ;;  %v4943_v3 = vld [vmem:[%s5963_s0] sm:$0xff]  ;;  %vm139_vm1 = vcmask 1043459   ;;  %vm142_vm2 = vcmask 1041408   ;;  %v4948_v4 = vld [vmem:[%s5963_s0 + $0x8] sm:$0xff]  ;;  %vm202_vm3 = vcmask 1043456   ;;  %vm215_vm4 = vcmask 64512  }
   0xf   :  { %4687 = vmatprep.subr.mxu1 %v35_v1  ;;  %v137_v5 = vrot.slane %v4943_v3, 5  ;;  %v144_v6 = vrot.slane %v4943_v3, 1  ;;  %v147_v7 = vrot.slane %v4943_v3, 4  ;;  %v4956_v8 = vld [vmem:[%s5964_s1 + $0x48] sm:$0xff]  ;;  %258 = vmatprep.subr.mxu0 %v35_v1  ;;  %v133_v9 = vrot.slane %v4948_v4, 7  ;;  %v4985_v28 = vld [vmem:[%s5964_s1 + $0x40] sm:$0xff] }
  0x10   :  { %4688 = vmatpush1.msra.mxu1 %v34_v2  ;;  %v138_v10 = vrot.slane %v4948_v4, 4  ;;  %v148_v11 = vrot.slane %v4948_v4, 3  ;;  %259 = vmatpush1.msra.mxu0 %v34_v2  ;;  %v176_v12 = vrot.slane %v4943_v3, 6  ;;  %v177_v15 = vrot.slane %v4948_v4, 5  ;;  %v4994_v34 = vld [vmem:[%s5964_s1 + $0x38] sm:$0xff]  ;;  %v5000_v35 = vld [vmem:[%s5964_s1 + $0x30] sm:$0xff] }
  0x11   :  { %v168_v13 = vsel %vm139_vm1, %v4948_v4, %v144_v6  ;;  %345 = vmatprep.subr.mxu1 %v4956_v8  ;;  %v145_v14 = vsel %vm134_vm0, %v4948_v4, %v144_v6  ;;  %v180_v16 = vrot.slane %v4943_v3, 7  ;;  %565 = vmatprep.subr.mxu0 %v4956_v8  ;;  %v173_v19 = vsel %vm139_vm1, %v133_v9, %v4943_v3  ;;  %v5012_v41 = vld [vmem:[%s5964_s1 + $0x28] sm:$0xff]  ;;  %v5020_v43 = vld [vmem:[%s5964_s1 + $0x20] sm:$0xff]  ;;  %v5028_v45 = vld [vmem:[%s5964_s1 + $0x18] sm:$0xff]  ;;  %s4890_s26 = smov 64   ;;  %s4891_s27 = smov 32  }
  0x12   :  { %v166_v17 = vsel %vm134_vm0, %v148_v11, %v147_v7  ;;  %v171_v18 = vsel %vm134_vm0, %v138_v10, %v137_v5  ;;  %v135_v20 = vsel %vm134_vm0, %v133_v9, %v4943_v3  ;;  %v140_v23 = vsel %vm139_vm1, %v138_v10, %v137_v5  ;;  %v5035_v46 = vld [vmem:[%s5964_s1 + $0x10] sm:$0xff]  ;;  %v5071_v52 = vld [vmem:[%s5967_s4] sm:$0xff]  ;;  %v5076_v54 = vld [vmem:[%s5967_s4 + $0x8] sm:$0xff]  ;;  %s4894_s7 = smov 112   ;;  %s4895_s8 = smov 48  }
  0x13   :  { %v170_v21 = vsel %vm142_vm2, %v166_v17, %v168_v13  ;;  %v175_v22 = vsel %vm142_vm2, %v171_v18, %v173_v19  ;;  %v149_v24 = vsel %vm139_vm1, %v148_v11, %v147_v7  ;;  %v143_v26 = vsel %vm142_vm2, %v135_v20, %v140_v23  ;;  %s4896_s0 = smov 96   ;;  %s4897_s9 = smov 16  }
  0x14   :  { %v197_v25 = vrot.slane %v175_v22, 4  ;;  %v151_v27 = vsel %vm142_vm2, %v145_v14, %v149_v24  ;;  %v178_v30 = vsel %vm134_vm0, %v177_v15, %v176_v12  ;;  %v181_v31 = vrot.slane %v4948_v4, 6  ;;  %s4898_s10 = smov 80  }
  0x15   :  { %v191_v29 = vrot.slane %v151_v27, 4  ;;  %v187_v32 = vsel %vm139_vm1, %v177_v15, %v176_v12  ;;  %v5059_v48 = vshrl.u32 %v126_v47, 7  ;;  %vm317_vm6 = vcmask 261120  }
  0x16   :  { %v205_v33 = vsel %vm202_vm3, %v170_v21, %v197_v25  ;;  %v182_v37 = vsel %vm139_vm1, %v181_v31, %v180_v16  ;;  %v185_v38 = vsel %vm134_vm0, %v181_v31, %v180_v16  ;;  %v152_v47 = vrot.slane %v4943_v3, 2 }
  0x17   :  { %4372 = vmatmul.mubr.msk.f32.vlgmr.msra.gmra.mxu1 %vm215_vm4, %v205_v33  ;;  %v203_v36 = vsel %vm202_vm3, %v143_v26, %v191_v29  ;;  %v184_v39 = vsel %vm142_vm2, %v178_v30, %v182_v37  ;;  %v189_v40 = vsel %vm142_vm2, %v185_v38, %v187_v32  ;;  %v5064_v50 = vsub.s32 0, %v5059_v48 }
  0x18   :  { %346 = vmatpush1.msra.mxu1 %v4985_v28  ;;  %310 = vmatprep.mubr.f32.mxu1 %v4889_v0  ;;  %v200_v42 = vrot.slane %v189_v40, 4  ;;  %vm128_vm5 = vcmp.lt.s32.totalorder %v5059_v48, 2  ;;  %vm1297_vm7 = vcmask 523264   ;;  %vm2573_vm8 = vcmask 1040384  }
  0x19   :  { %347 = vmatprep.subr.mxu1 %v4994_v34  ;;  %4370 = vmatmul.mubr.msk.f32.vlgmr.msra.gmra.mxu0 %vm215_vm4, %v203_v36  ;;  %v5082_v56 = vrot.slane %v5071_v52, %v5064_v50  ;;  %v5088_v59 = vrot.slane %v5076_v54, %v5064_v50  ;;  %vm2578_vm9 = vcmask 1042432   ;;  %vm2583_vm10 = vcmask 1044480  }
  0x1a   :  { %348 = vmatpush1.msra.mxu1 %v5000_v35  ;;  %298 = vmatprep.mubr.f32.mxu0 %v4889_v0  ;;  %v206_v44 = vsel %vm202_vm3, %v184_v39, %v200_v42  ;;  %vm2586_vm11 = vcmask 1045504   ;;  %vm2589_vm12 = vcmask 1046528   ;;  %vm4893_vm13 = vmmov 0  }
  0x1b   :  { %349 = vmatprep.subr.mxu1 %v5012_v41  ;;  %566 = vmatpush1.msra.mxu0 %v4985_v28  ;;  %vm2686_vm14 = vcmask 130048   ;;  %vm4026_vm15 = vcmask 392192  }
  0x1c   :  { %4373 = vmatmul.mubr.msk.f32.gmra.mxu1 %vm215_vm4, %v206_v44  ;;  %567 = vmatprep.subr.mxu0 %v4994_v34 }
  0x1d   :  { %350 = vmatpush1.msra.mxu1 %v5020_v43  ;;  %385 = vmatprep.mubr.f32.mxu1 %v4889_v0 }
  0x1e   :  { %351 = vmatprep.subr.mxu1 %v5028_v45  ;;  %568 = vmatpush1.msra.mxu0 %v5000_v35 }
  0x1f   :  { %352 = vmatpush1.msra.mxu1 %v5035_v46  ;;  %569 = vmatprep.subr.mxu0 %v5012_v41 }
  0x20   :  { %386 = vmatmul.mubr.f32.vlgmr.msra.gmra.mxu1 %v4889_v0  ;;  %450 = vmatprep.subr.mxu1 %v4956_v8 }
  0x21   :  { %451 = vmatpush1.msra.mxu1 %v4985_v28  ;;  %490 = vmatprep.mubr.f32.mxu1 %v4889_v0 }
  0x22   :  { %452 = vmatprep.subr.mxu1 %v4994_v34  ;;  %570 = vmatpush1.msra.mxu0 %v5020_v43 }
  0x23   :  { %453 = vmatpush1.msra.mxu1 %v5000_v35  ;;  %571 = vmatprep.subr.mxu0 %v5028_v45 }
  0x24   :  { %454 = vmatprep.subr.mxu1 %v5012_v41  ;;  %572 = vmatpush1.msra.mxu0 %v5035_v46 }
  0x25   :  { %455 = vmatpush1.msra.mxu1 %v5020_v43  ;;  %783 = vmatprep.subr.mxu0 %v4956_v8 }
  0x26   :  { %456 = vmatprep.subr.mxu1 %v5028_v45 }
  0x27   :  { %457 = vmatpush1.msra.mxu1 %v5035_v46 }
  0x28   :  { %668 = vmatprep.subr.mxu1 %v4956_v8 }
  0xd7   :  { %v5061_v49 = vpop.f32.mrf.mxu1 }
  0xd9   :  { %v5066_v51 = vpop.f32.mrf.mxu1  ;;  %v294_v53 = vpop.f32.mrf.mxu0 }
  0xda   :  { %v295_v60 = vadd.f32 %v294_v53, %v5082_v56  ;;  %v153_v53 = vrot.slane %v4948_v4, 1 }
  0xdb   :  { %v296_v57 = vpop.f32.mrf.mxu0 }
  0xdc   :  { %v5078_v55 = vpop.f32.mrf.mxu1  ;;  %v297_v62 = vadd.f32 %v296_v57, %v5088_v59  ;;  %v156_v57 = vrot.slane %v4943_v3, 3 }
  0xde   :  { %v5084_v58 = vpop.f32.mrf.mxu1 }
  0xe0   :  { %v387_v61 = vpop.f32.mrf.mxu1 }
  0xe1   :  { %v392_v1 = vadd.f32 %v387_v61, %v295_v60  ;;  %v154_v61 = vsel %vm134_vm0, %v153_v53, %v152_v47 }
  0xe2   :  { %v389_v63 = vpop.f32.mrf.mxu1 }
  0xe3   :  { %v393_v2 = vadd.f32 %v389_v63, %v297_v62 }
  0xe5   :  { %v396_v5 = vsel %vm128_vm5, %v392_v1, %v393_v2  ;;  %v163_v1 = vsel %vm139_vm1, %v153_v53, %v152_v47 }
  0xe6   :  { %4702 = vtanh.f32 %v396_v5  ;;  %v4374_v7 = vmul.f32 -1.442695, %v396_v5 }
  0xe8   :  { %4704 = vpow2.f32 %v4374_v7 }
  0xf3   :  { %v4703_v6 = vpop.eup %4702 }
  0xf4   :  { %406 = vrot.lane.b32.xlu0 %v4703_v6, %s4890_s26 }
  0xf5   :  { %v4705_v9 = vpop.eup %4704 }
  0xf6   :  { %v400_v10 = vadd.f32 1.0, %v4705_v9 }
  0xf8   :  { %4706 = vrcp.f32 %v400_v10 }
 0x105   :  { %v4707_v11 = vpop.eup %4706 }
 0x106   :  { %v404_v14 = vmul.f32 0.0, %v4707_v11 }
 0x166   :  { %v407_v12 = vpop.permute.xlu0 %406 }
 0x167   :  { %v409_v13 = vmul.f32 %v4707_v11, %v407_v12 }
 0x169   :  { %411 = vrot.lane.b32.xlu0 %v409_v13, %s4891_s27 }
 0x1db   :  { %v412_v15 = vpop.permute.xlu0 %411 }
 0x1dc   :  { %v414_v16 = vadd.f32 %v412_v15, %v404_v14 }
 0x1de   :  { %4708 = vtanh.f32 %v414_v16 }
 0x1eb   :  { %v4709_v17 = vpop.eup %4708 }
 0x1ec   :  { %417 = vrot.lane.b32.xlu1 %v4709_v17, %s4890_s26 }
 0x25e   :  { %v418_v18 = vpop.permute.xlu1 %417 }
 0x25f   :  { %v5098_v19 = vmul.f32 %v4707_v11, %v418_v18 }
 0x261   :  { %422 = vrot.lane.b32.xlu1 %v5098_v19, %s4891_s27 }
 0x2d3   :  { %v5102_v20 = vpop.permute.xlu1 %422 }
 0x2d4   :  { %4375 = vmatmul.mubr.msk.f32.vlgmr.msra.gmra.mxu1 %vm317_vm6, %v5102_v20 }
 0x2d5   :  { %669 = vmatpush1.msra.mxu1 %v4985_v28  ;;  %708 = vmatprep.mubr.f32.mxu1 %v4889_v0 }
 0x2d6   :  { %670 = vmatprep.subr.mxu1 %v4994_v34 }
 0x2d7   :  { %671 = vmatpush1.msra.mxu1 %v5000_v35 }
 0x2d8   :  { %672 = vmatprep.subr.mxu1 %v5012_v41 }
 0x2d9   :  { %673 = vmatpush1.msra.mxu1 %v5020_v43 }
 0x2da   :  { %674 = vmatprep.subr.mxu1 %v5028_v45 }
 0x2db   :  { %675 = vmatpush1.msra.mxu1 %v5035_v46 }
 0x2dc   :  { %886 = vmatprep.subr.mxu1 %v4956_v8 }
 0x394   :  { %v492_v21 = vpop.f32.mrf.mxu1 }
 0x395   :  { %v499_v22 = vrot.slane %v492_v21, 4 }
 0x396   :  { %v494_v23 = vpop.f32.mrf.mxu1 }
 0x397   :  { %v503_v24 = vadd.f32 %v499_v22, %v295_v60  ;;  %v500_v25 = vrot.slane %v494_v23, 4  ;;  %v157_v60 = vrot.slane %v4948_v4, 2 }
 0x399   :  { %v504_v26 = vadd.f32 %v500_v25, %v297_v62  ;;  %v506_v27 = vrot.slane %v503_v24, 4  ;;  %v158_v62 = vsel %vm139_vm1, %v157_v60, %v156_v57  ;;  %v161_v63 = vsel %vm134_vm0, %v157_v60, %v156_v57 }
 0x39a   :  { %v160_v2 = vsel %vm142_vm2, %v154_v61, %v158_v62  ;;  %v165_v5 = vsel %vm142_vm2, %v161_v63, %v163_v1 }
 0x39b   :  { %v509_v29 = vrot.slane %v504_v26, 4  ;;  %v194_v6 = vrot.slane %v165_v5, 4 }
 0x39d   :  { %v511_v30 = vsel %vm128_vm5, %v506_v27, %v509_v29  ;;  %v204_v7 = vsel %vm202_vm3, %v160_v2, %v194_v6 }
 0x39e   :  { %4710 = vtanh.f32 %v511_v30  ;;  %v4376_v32 = vmul.f32 -1.442695, %v511_v30  ;;  %4371 = vmatmul.mubr.msk.f32.gmra.mxu0 %vm215_vm4, %v204_v7 }
 0x39f   :  { %605 = vmatprep.mubr.f32.mxu0 %v4889_v0 }
 0x3a0   :  { %4712 = vpow2.f32 %v4376_v32 }
 0x3ab   :  { %v4711_v31 = vpop.eup %4710 }
 0x3ac   :  { %521 = vrot.lane.b32.xlu0 %v4711_v31, %s4890_s26 }
 0x3ad   :  { %v4713_v33 = vpop.eup %4712 }
 0x3ae   :  { %v515_v36 = vadd.f32 1.0, %v4713_v33 }
 0x3b0   :  { %4714 = vrcp.f32 %v515_v36 }
 0x3bd   :  { %v4715_v37 = vpop.eup %4714 }
 0x3be   :  { %v519_v40 = vmul.f32 %v4715_v37, %v414_v16 }
 0x41e   :  { %v522_v38 = vpop.permute.xlu0 %521 }
 0x41f   :  { %v524_v39 = vmul.f32 %v4715_v37, %v522_v38 }
 0x421   :  { %526 = vrot.lane.b32.xlu1 %v524_v39, %s4891_s27 }
 0x45e   :  { %v300_v11 = vpop.f32.mrf.mxu0 }
 0x45f   :  { %v301_v14 = vadd.f32 %v300_v11, %v5082_v56 }
 0x460   :  { %v302_v12 = vpop.f32.mrf.mxu0 }
 0x461   :  { %v303_v15 = vadd.f32 %v302_v12, %v5088_v59 }
 0x493   :  { %v527_v42 = vpop.permute.xlu1 %526 }
 0x494   :  { %v529_v44 = vadd.f32 %v527_v42, %v519_v40 }
 0x496   :  { %4716 = vtanh.f32 %v529_v44 }
 0x4a3   :  { %v4717_v3 = vpop.eup %4716 }
 0x4a4   :  { %532 = vrot.lane.b32.xlu0 %v4717_v3, %s4890_s26 }
 0x516   :  { %v533_v4 = vpop.permute.xlu0 %532 }
 0x517   :  { %v5133_v9 = vmul.f32 %v4715_v37, %v533_v4 }
 0x519   :  { %537 = vrot.lane.b32.xlu1 %v5133_v9, %s4891_s27 }
 0x58b   :  { %v5137_v10 = vpop.permute.xlu1 %537 }
 0x58c   :  { %4377 = vmatmul.mubr.msk.f32.vlgmr.msra.gmra.mxu0 %vm317_vm6, %v5137_v10 }
 0x58d   :  { %784 = vmatpush1.msra.mxu0 %v4985_v28  ;;  %823 = vmatprep.mubr.f32.mxu0 %v4889_v0 }
 0x58e   :  { %785 = vmatprep.subr.mxu0 %v4994_v34 }
 0x58f   :  { %786 = vmatpush1.msra.mxu0 %v5000_v35 }
 0x590   :  { %787 = vmatprep.subr.mxu0 %v5012_v41 }
 0x591   :  { %788 = vmatpush1.msra.mxu0 %v5020_v43 }
 0x592   :  { %789 = vmatprep.subr.mxu0 %v5028_v45 }
 0x593   :  { %790 = vmatpush1.msra.mxu0 %v5035_v46 }
 0x594   :  { %1001 = vmatprep.subr.mxu0 %v4956_v8 }
 0x64c   :  { %v607_v13 = vpop.f32.mrf.mxu0 }
 0x64d   :  { %v612_v17 = vadd.f32 %v607_v13, %v301_v14 }
 0x64e   :  { %v609_v16 = vpop.f32.mrf.mxu0 }
 0x64f   :  { %v613_v18 = vadd.f32 %v609_v16, %v303_v15  ;;  %v307_v16 = vadd.f32 %v5061_v49, %v5082_v56 }
 0x651   :  { %v614_v21 = vsel %vm128_vm5, %v612_v17, %v613_v18  ;;  %v309_v17 = vadd.f32 %v5066_v51, %v5088_v59 }
 0x652   :  { %4718 = vtanh.f32 %v614_v21  ;;  %v4378_v23 = vmul.f32 -1.442695, %v614_v21 }
 0x654   :  { %4720 = vpow2.f32 %v4378_v23 }
 0x65f   :  { %v4719_v22 = vpop.eup %4718 }
 0x660   :  { %624 = vrot.lane.b32.xlu0 %v4719_v22, %s4890_s26 }
 0x661   :  { %v4721_v24 = vpop.eup %4720 }
 0x662   :  { %v618_v25 = vadd.f32 1.0, %v4721_v24 }
 0x664   :  { %4722 = vrcp.f32 %v618_v25 }
 0x671   :  { %v4723_v26 = vpop.eup %4722 }
 0x672   :  { %v622_v30 = vmul.f32 %v4723_v26, %v529_v44 }
 0x6d2   :  { %v625_v27 = vpop.permute.xlu0 %624 }
 0x6d3   :  { %v627_v29 = vmul.f32 %v4723_v26, %v625_v27 }
 0x6d5   :  { %629 = vrot.lane.b32.xlu1 %v627_v29, %s4891_s27 }
 0x747   :  { %v630_v31 = vpop.permute.xlu1 %629 }
 0x748   :  { %v632_v32 = vadd.f32 %v630_v31, %v622_v30 }
 0x74a   :  { %4724 = vtanh.f32 %v632_v32 }
 0x757   :  { %v4725_v33 = vpop.eup %4724 }
 0x758   :  { %635 = vrot.lane.b32.xlu0 %v4725_v33, %s4890_s26 }
 0x7ca   :  { %v636_v36 = vpop.permute.xlu0 %635 }
 0x7cb   :  { %v5157_v37 = vmul.f32 %v4723_v26, %v636_v36 }
 0x7cd   :  { %640 = vrot.lane.b32.xlu1 %v5157_v37, %s4891_s27 }
 0x83f   :  { %v5161_v38 = vpop.permute.xlu1 %640 }
 0x840   :  { %4379 = vmatmul.mubr.msk.f32.vlgmr.msra.gmra.mxu1 %vm317_vm6, %v5161_v38 }
 0x841   :  { %887 = vmatpush1.msra.mxu1 %v4985_v28  ;;  %926 = vmatprep.mubr.f32.mxu1 %v4889_v0 }
 0x842   :  { %888 = vmatprep.subr.mxu1 %v4994_v34 }
 0x843   :  { %889 = vmatpush1.msra.mxu1 %v5000_v35 }
 0x844   :  { %890 = vmatprep.subr.mxu1 %v5012_v41 }
 0x845   :  { %891 = vmatpush1.msra.mxu1 %v5020_v43 }
 0x846   :  { %892 = vmatprep.subr.mxu1 %v5028_v45 }
 0x847   :  { %893 = vmatpush1.msra.mxu1 %v5035_v46 }
 0x848   :  { %1104 = vmatprep.subr.mxu1 %v4956_v8 }
 0x900   :  { %v710_v39 = vpop.f32.mrf.mxu1 }
 0x901   :  { %v717_v40 = vrot.slane %v710_v39, 4 }
 0x902   :  { %v712_v42 = vpop.f32.mrf.mxu1 }
 0x903   :  { %v721_v44 = vadd.f32 %v717_v40, %v301_v14  ;;  %v718_v47 = vrot.slane %v712_v42, 4 }
 0x905   :  { %v722_v53 = vadd.f32 %v718_v47, %v303_v15  ;;  %v724_v57 = vrot.slane %v721_v44, 4 }
 0x907   :  { %v727_v60 = vrot.slane %v722_v53, 4 }
 0x909   :  { %v729_v61 = vsel %vm128_vm5, %v724_v57, %v727_v60 }
 0x90a   :  { %4726 = vtanh.f32 %v729_v61  ;;  %v4380_v63 = vmul.f32 -1.442695, %v729_v61 }
 0x90c   :  { %4728 = vpow2.f32 %v4380_v63 }
 0x917   :  { %v4727_v62 = vpop.eup %4726 }
 0x918   :  { %739 = vrot.lane.b32.xlu0 %v4727_v62, %s4890_s26 }
 0x919   :  { %v4729_v1 = vpop.eup %4728 }
 0x91a   :  { %v733_v2 = vadd.f32 1.0, %v4729_v1 }
 0x91c   :  { %4730 = vrcp.f32 %v733_v2 }
 0x929   :  { %v4731_v8 = vpop.eup %4730 }
 0x92a   :  { %v737_v7 = vmul.f32 %v4731_v8, %v632_v32 }
 0x98a   :  { %v740_v5 = vpop.permute.xlu0 %739 }
 0x98b   :  { %v742_v6 = vmul.f32 %v4731_v8, %v740_v5 }
 0x98d   :  { %744 = vrot.lane.b32.xlu1 %v742_v6, %s4891_s27 }
 0x9ff   :  { %v745_v3 = vpop.permute.xlu1 %744 }
 0xa00   :  { %v747_v4 = vadd.f32 %v745_v3, %v737_v7 }
 0xa02   :  { %4732 = vtanh.f32 %v747_v4 }
 0xa0f   :  { %v4733_v11 = vpop.eup %4732 }
 0xa10   :  { %750 = vrot.lane.b32.xlu0 %v4733_v11, %s4890_s26  ;;  %v313_v11 = vadd.f32 %v5078_v55, %v5082_v56 }
 0xa82   :  { %v751_v12 = vpop.permute.xlu0 %750 }
 0xa83   :  { %v5179_v13 = vmul.f32 %v4731_v8, %v751_v12  ;;  %v315_v12 = vadd.f32 %v5084_v58, %v5088_v59 }
 0xa85   :  { %755 = vrot.lane.b32.xlu1 %v5179_v13, %s4891_s27 }
 0xaf7   :  { %v5183_v14 = vpop.permute.xlu1 %755 }
 0xaf8   :  { %4381 = vmatmul.mubr.msk.f32.vlgmr.msra.gmra.mxu0 %vm317_vm6, %v5183_v14 }
 0xaf9   :  { %1002 = vmatpush1.msra.mxu0 %v4985_v28  ;;  %1041 = vmatprep.mubr.f32.mxu0 %v4889_v0 }
 0xafa   :  { %1003 = vmatprep.subr.mxu0 %v4994_v34 }
 0xafb   :  { %1004 = vmatpush1.msra.mxu0 %v5000_v35 }
 0xafc   :  { %1005 = vmatprep.subr.mxu0 %v5012_v41 }
 0xafd   :  { %1006 = vmatpush1.msra.mxu0 %v5020_v43 }
 0xafe   :  { %1007 = vmatprep.subr.mxu0 %v5028_v45 }
 0xaff   :  { %1008 = vmatpush1.msra.mxu0 %v5035_v46 }
 0xbb8   :  { %v825_v15 = vpop.f32.mrf.mxu0 }
 0xbb9   :  { %v830_v21 = vadd.f32 %v825_v15, %v307_v16 }
 0xbba   :  { %v827_v18 = vpop.f32.mrf.mxu0 }
 0xbbb   :  { %v831_v22 = vadd.f32 %v827_v18, %v309_v17 }
 0xbbd   :  { %v832_v23 = vsel %vm128_vm5, %v830_v21, %v831_v22 }
 0xbbe   :  { %4734 = vtanh.f32 %v832_v23  ;;  %v4382_v25 = vmul.f32 -1.442695, %v832_v23 }
 0xbc0   :  { %4736 = vpow2.f32 %v4382_v25 }
 0xbcb   :  { %v4735_v24 = vpop.eup %4734 }
 0xbcc   :  { %842 = vrot.lane.b32.xlu0 %v4735_v24, %s4890_s26 }
 0xbcd   :  { %v4737_v26 = vpop.eup %4736 }
 0xbce   :  { %v836_v27 = vadd.f32 1.0, %v4737_v26 }
 0xbd0   :  { %4738 = vrcp.f32 %v836_v27 }
 0xbdd   :  { %v4739_v29 = vpop.eup %4738 }
 0xbde   :  { %v840_v51 = vmul.f32 %v4739_v29, %v747_v4 }
 0xc3e   :  { %v843_v49 = vpop.permute.xlu0 %842 }
 0xc3f   :  { %v845_v30 = vmul.f32 %v4739_v29, %v843_v49 }
 0xc41   :  { %847 = vrot.lane.b32.xlu1 %v845_v30, %s4891_s27 }
 0xcb3   :  { %v848_v31 = vpop.permute.xlu1 %847 }
 0xcb4   :  { %v850_v32 = vadd.f32 %v848_v31, %v840_v51 }
 0xcb6   :  { %4740 = vtanh.f32 %v850_v32 }
 0xcc3   :  { %v4741_v33 = vpop.eup %4740 }
 0xcc4   :  { %853 = vrot.lane.b32.xlu0 %v4741_v33, %s4890_s26 }
 0xd36   :  { %v854_v36 = vpop.permute.xlu0 %853 }
 0xd37   :  { %v5204_v39 = vmul.f32 %v4739_v29, %v854_v36 }
 0xd39   :  { %858 = vrot.lane.b32.xlu1 %v5204_v39, %s4891_s27 }
 0xdab   :  { %v5208_v40 = vpop.permute.xlu1 %858 }
 0xdac   :  { %4383 = vmatmul.mubr.msk.f32.vlgmr.msra.gmra.mxu1 %vm317_vm6, %v5208_v40 }
 0xdad   :  { %1105 = vmatpush1.msra.mxu1 %v4985_v28  ;;  %1144 = vmatprep.mubr.f32.mxu1 %v4889_v0 }
 0xdae   :  { %1106 = vmatprep.subr.mxu1 %v4994_v34 }
 0xdaf   :  { %1107 = vmatpush1.msra.mxu1 %v5000_v35 }
 0xdb0   :  { %1108 = vmatprep.subr.mxu1 %v5012_v41 }
 0xdb1   :  { %1109 = vmatpush1.msra.mxu1 %v5020_v43 }
 0xdb2   :  { %1110 = vmatprep.subr.mxu1 %v5028_v45 }
 0xdb3   :  { %1111 = vmatpush1.msra.mxu1 %v5035_v46 }
 0xe6c   :  { %v928_v42 = vpop.f32.mrf.mxu1 }
 0xe6d   :  { %v935_v44 = vrot.slane %v928_v42, 4 }
 0xe6e   :  { %v930_v47 = vpop.f32.mrf.mxu1 }
 0xe6f   :  { %v939_v53 = vadd.f32 %v935_v44, %v307_v16  ;;  %v936_v57 = vrot.slane %v930_v47, 4 }
 0xe71   :  { %v940_v28 = vadd.f32 %v936_v57, %v309_v17  ;;  %v942_v60 = vrot.slane %v939_v53, 4 }
 0xe73   :  { %v945_v61 = vrot.slane %v940_v28, 4 }
 0xe75   :  { %v947_v34 = vsel %vm128_vm5, %v942_v60, %v945_v61 }
 0xe76   :  { %4742 = vtanh.f32 %v947_v34  ;;  %v4384_v41 = vmul.f32 -1.442695, %v947_v34 }
 0xe78   :  { %4744 = vpow2.f32 %v4384_v41 }
 0xe83   :  { %v4743_v35 = vpop.eup %4742 }
 0xe84   :  { %957 = vrot.lane.b32.xlu0 %v4743_v35, %s4890_s26 }
 0xe85   :  { %v4745_v43 = vpop.eup %4744 }
 0xe86   :  { %v951_v45 = vadd.f32 1.0, %v4745_v43  ;;  %v1228_v43 = vrot.slane %v5133_v9, 2  ;;  %v56_v9 = vld [vmem:[%s5964_s1 + $0xb0] sm:$0xff] }
 0xe88   :  { %4746 = vrcp.f32 %v951_v45 }
 0xe95   :  { %v4747_v46 = vpop.eup %4746 }
 0xe96   :  { %v955_v1 = vmul.f32 %v4747_v46, %v850_v32 }
 0xef6   :  { %v958_v62 = vpop.permute.xlu0 %957 }
 0xef7   :  { %v960_v63 = vmul.f32 %v4747_v46, %v958_v62 }
 0xef9   :  { %962 = vrot.lane.b32.xlu1 %v960_v63, %s4891_s27  ;;  %v59_v63 = vld [vmem:[%s5964_s1 + $0xc8] sm:$0xff] }
 0xefa   :  { %1326 = vmatprep.subr.mxu0 %v59_v63  ;;  %v1291_v63 = vsub.s32 1, %v5059_v48 }
 0xf6b   :  { %v963_v2 = vpop.permute.xlu1 %962 }
 0xf6c   :  { %v965_v8 = vadd.f32 %v963_v2, %v955_v1  ;;  %v58_v1 = vld [vmem:[%s5964_s1 + $0xc0] sm:$0xff]  ;;  %v57_v2 = vld [vmem:[%s5964_s1 + $0xb8] sm:$0xff] }
 0xf6e   :  { %4748 = vtanh.f32 %v965_v8 }
 0xf7b   :  { %v4749_v5 = vpop.eup %4748 }
 0xf7c   :  { %968 = vrot.lane.b32.xlu0 %v4749_v5, %s4890_s26  ;;  %v54_v5 = vld [vmem:[%s5964_s1 + $0xa0] sm:$0xff] }
 0xfee   :  { %v969_v6 = vpop.permute.xlu0 %968 }
 0xfef   :  { %v5225_v7 = vmul.f32 %v4747_v46, %v969_v6  ;;  %v5280_v6 = vld [vmem:[%s5964_s1 + $0x108] sm:$0xff] }
 0xff0   :  { %1423 = vmatprep.subr.mxu1 %v5280_v6 }
 0xff1   :  { %973 = vrot.lane.b32.xlu1 %v5225_v7, %s4891_s27 }
0x1063   :  { %v5229_v3 = vpop.permute.xlu1 %973 }
0x1064   :  { %4385 = vmatmul.mubr.msk.f32.vlgmr.msra.gmra.mxu0 %vm317_vm6, %v5229_v3 }
0x1065   :  { %1374 = vmatprep.mubr.f32.mxu0 %v4889_v0  ;;  %1327 = vmatpush1.msra.mxu0 %v58_v1  ;;  %v5401_v1 = vrot.slane %v5071_v52, %v1291_v63 }
0x1066   :  { %1328 = vmatprep.subr.mxu0 %v57_v2  ;;  %v5404_v2 = vrot.slane %v5076_v54, %v1291_v63 }
0x1067   :  { %1329 = vmatpush1.msra.mxu0 %v56_v9 }
0x1124   :  { %v1043_v4 = vpop.f32.mrf.mxu0 }
0x1125   :  { %v1048_v16 = vadd.f32 %v1043_v4, %v313_v11  ;;  %v53_v4 = vld [vmem:[%s5964_s1 + $0x98] sm:$0xff] }
0x1126   :  { %v1045_v15 = vpop.f32.mrf.mxu0 }
0x1127   :  { %v1049_v17 = vadd.f32 %v1045_v15, %v315_v12  ;;  %v51_v15 = vld [vmem:[%s5964_s1 + $0x88] sm:$0xff] }
0x1129   :  { %v1050_v18 = vsel %vm128_vm5, %v1048_v16, %v1049_v17  ;;  %v1236_v17 = vrot.slane %v5098_v19, 2  ;;  %v5311_v19 = vld [vmem:[%s5964_s1 + $0xf8] sm:$0xff] }
0x112a   :  { %4750 = vtanh.f32 %v1050_v18  ;;  %v4386_v22 = vmul.f32 -1.442695, %v1050_v18  ;;  %v50_v18 = vld [vmem:[%s5964_s1 + $0x80] sm:$0xff] }
0x112c   :  { %4752 = vpow2.f32 %v4386_v22  ;;  %v49_v22 = vld [vmem:[%s5964_s1 + $0x78] sm:$0xff] }
0x1137   :  { %v4751_v21 = vpop.eup %4750 }
0x1138   :  { %1060 = vrot.lane.b32.xlu0 %v4751_v21, %s4890_s26  ;;  %v5302_v21 = vld [vmem:[%s5964_s1 + $0x100] sm:$0xff] }
0x1139   :  { %v4753_v23 = vpop.eup %4752 }
0x113a   :  { %v1054_v24 = vadd.f32 1.0, %v4753_v23  ;;  %v48_v23 = vld [vmem:[%s5964_s1 + $0x70] sm:$0xff] }
0x113c   :  { %4754 = vrcp.f32 %v1054_v24  ;;  %v5320_v24 = vld [vmem:[%s5964_s1 + $0xf0] sm:$0xff] }
0x1149   :  { %v4755_v25 = vpop.eup %4754 }
0x114a   :  { %v1058_v58 = vmul.f32 %v4755_v25, %v965_v8  ;;  %v55_v8 = vld [vmem:[%s5964_s1 + $0xa8] sm:$0xff] }
0x114b   :  { %1330 = vmatprep.subr.mxu0 %v55_v8 }
0x114c   :  { %1331 = vmatpush1.msra.mxu0 %v54_v5 }
0x114d   :  { %1332 = vmatprep.subr.mxu0 %v53_v4 }
0x11aa   :  { %v1061_v55 = vpop.permute.xlu0 %1060 }
0x11ab   :  { %v1063_v56 = vmul.f32 %v4755_v25, %v1061_v55  ;;  %v5329_v55 = vld [vmem:[%s5964_s1 + $0xe8] sm:$0xff] }
0x11ad   :  { %1065 = vrot.lane.b32.xlu1 %v1063_v56, %s4891_s27  ;;  %v46_v56 = vld [vmem:[%s5964_s1 + $0x60] sm:$0xff] }
0x121f   :  { %v1066_v59 = vpop.permute.xlu1 %1065 }
0x1220   :  { %v1068_v26 = vadd.f32 %v1066_v59, %v1058_v58  ;;  %v5338_v58 = vld [vmem:[%s5964_s1 + $0xe0] sm:$0xff]  ;;  %v45_v59 = vld [vmem:[%s5964_s1 + $0x58] sm:$0xff] }
0x1222   :  { %4756 = vtanh.f32 %v1068_v26 }
0x122f   :  { %v4757_v27 = vpop.eup %4756 }
0x1230   :  { %1071 = vrot.lane.b32.xlu0 %v4757_v27, %s4890_s26  ;;  %v44_v27 = vld [vmem:[%s5964_s1 + $0x50] sm:$0xff] }
0x12a2   :  { %v1072_v29 = vpop.permute.xlu0 %1071 }
0x12a3   :  { %v1074_v49 = vmul.f32 %v4755_v25, %v1072_v29  ;;  %v47_v25 = vld [vmem:[%s5964_s1 + $0x68] sm:$0xff]  ;;  %v5356_v29 = vld [vmem:[%s5964_s1 + $0xd0] sm:$0xff] }
0x12a5   :  { %1076 = vrot.lane.b32.xlu1 %v1074_v49, %s4891_s27  ;;  %v1198_v16 = vrot.slane %v1074_v49, 2 }
0x1317   :  { %v5244_v30 = vpop.permute.xlu1 %1076 }
0x1318   :  { %4387 = vmatmul.mubr.msk.f32.vlgmr.msra.gmra.mxu1 %vm317_vm6, %v5244_v30 }
0x1319   :  { %1463 = vmatprep.mubr.f32.mxu1 %v4889_v0  ;;  %1424 = vmatpush1.msra.mxu1 %v5302_v21 }
0x131a   :  { %1425 = vmatprep.subr.mxu1 %v5311_v19 }
0x131b   :  { %1426 = vmatpush1.msra.mxu1 %v5320_v24 }
0x131c   :  { %1427 = vmatprep.subr.mxu1 %v5329_v55 }
0x131d   :  { %1428 = vmatpush1.msra.mxu1 %v5338_v58 }
0x13d8   :  { %v1146_v51 = vpop.f32.mrf.mxu1 }
0x13d9   :  { %v1153_v31 = vrot.slane %v1146_v51, 4 }
0x13da   :  { %v1148_v32 = vpop.f32.mrf.mxu1 }
0x13db   :  { %v1157_v33 = vadd.f32 %v1153_v31, %v313_v11  ;;  %v1154_v36 = vrot.slane %v1148_v32, 4 }
0x13dd   :  { %v1158_v42 = vadd.f32 %v1154_v36, %v315_v12  ;;  %v1160_v44 = vrot.slane %v1157_v33, 4  ;;  %v52_v12 = vld [vmem:[%s5964_s1 + $0x90] sm:$0xff] }
0x13de   :  { %1333 = vmatpush1.msra.mxu0 %v52_v12 }
0x13df   :  { %v1163_v47 = vrot.slane %v1158_v42, 4  ;;  %1334 = vmatprep.subr.mxu0 %v51_v15 }
0x13e0   :  { %1335 = vmatpush1.msra.mxu0 %v50_v18 }
0x13e1   :  { %v1165_v53 = vsel %vm128_vm5, %v1160_v44, %v1163_v47  ;;  %1336 = vmatprep.subr.mxu0 %v49_v22 }
0x13e2   :  { %4758 = vtanh.f32 %v1165_v53  ;;  %v4388_v28 = vmul.f32 -1.442695, %v1165_v53  ;;  %1337 = vmatpush1.msra.mxu0 %v48_v23 }
0x13e3   :  { %1338 = vmatprep.subr.mxu0 %v47_v25 }
0x13e4   :  { %4760 = vpow2.f32 %v4388_v28  ;;  %1339 = vmatpush1.msra.mxu0 %v46_v56 }
0x13e5   :  { %1340 = vmatprep.subr.mxu0 %v45_v59 }
0x13e6   :  { %1341 = vmatpush1.msra.mxu0 %v44_v27 }
0x13e7   :  { %1744 = vmatprep.subr.mxu0 %v5280_v6 }
0x13ef   :  { %v4759_v57 = vpop.eup %4758 }
0x13f0   :  { %1175 = vrot.lane.b32.xlu0 %v4759_v57, %s4890_s26 }
0x13f1   :  { %v4761_v60 = vpop.eup %4760 }
0x13f2   :  { %v1169_v61 = vadd.f32 1.0, %v4761_v60 }
0x13f4   :  { %4762 = vrcp.f32 %v1169_v61 }
0x1401   :  { %v5252_v34 = vpop.eup %4762 }
0x1402   :  { %v1173_v45 = vmul.f32 %v5252_v34, %v1068_v26  ;;  %v5347_v26 = vld [vmem:[%s5964_s1 + $0xd8] sm:$0xff] }
0x1403   :  { %1429 = vmatprep.subr.mxu1 %v5347_v26 }
0x1404   :  { %1430 = vmatpush1.msra.mxu1 %v5356_v29 }
0x1405   :  { %1464 = vmatmul.mubr.f32.vlgmr.msra.gmra.mxu1 %v4889_v0  ;;  %1526 = vmatprep.subr.mxu1 %v5280_v6 }
0x1406   :  { %1527 = vmatpush1.msra.mxu1 %v5302_v21  ;;  %1566 = vmatprep.mubr.f32.mxu1 %v4889_v0 }
0x1407   :  { %1528 = vmatprep.subr.mxu1 %v5311_v19 }
0x1408   :  { %1529 = vmatpush1.msra.mxu1 %v5320_v24 }
0x1409   :  { %1530 = vmatprep.subr.mxu1 %v5329_v55 }
0x140a   :  { %1531 = vmatpush1.msra.mxu1 %v5338_v58 }
0x140b   :  { %1532 = vmatprep.subr.mxu1 %v5347_v26 }
0x140c   :  { %1533 = vmatpush1.msra.mxu1 %v5356_v29 }
0x140d   :  { %1641 = vmatprep.subr.mxu1 %v5280_v6 }
0x1462   :  { %v1176_v35 = vpop.permute.xlu0 %1175 }
0x1463   :  { %v1178_v41 = vmul.f32 %v5252_v34, %v1176_v35 }
0x1465   :  { %1180 = vrot.lane.b32.xlu1 %v1178_v41, %s4891_s27 }
0x1469   :  { %1229 = vrot.lane.b32.xlu1 %v1228_v43, %s4890_s26 }
0x14c5   :  { %v1465_v8 = vpop.f32.mrf.mxu1 }
0x14c7   :  { %v1467_v12 = vpop.f32.mrf.mxu1 }
0x14d7   :  { %v1181_v46 = vpop.permute.xlu1 %1180 }
0x14d8   :  { %v1183_v62 = vadd.f32 %v1181_v46, %v1173_v45 }
0x14da   :  { %4764 = vtanh.f32 %v1183_v62 }
0x14db   :  { %v1230_v32 = vpop.permute.xlu1 %1229 }
0x14dc   :  { %v1232_v36 = vsel %vm317_vm6, %v5244_v30, %v1230_v32 }
0x14dd   :  { %v1246_v44 = vrot.slane %v1232_v36, 6 }
0x14e7   :  { %v4765_v11 = vpop.eup %4764 }
0x14e8   :  { %1186 = vrot.lane.b32.xlu0 %v4765_v11, %s4890_s26 }
0x14ec   :  { %1199 = vrot.lane.b32.xlu0 %v1198_v16, %s4890_s26 }
0x14f0   :  { %1237 = vrot.lane.b32.xlu0 %v1236_v17, %s4890_s26 }
0x155a   :  { %v1187_v49 = vpop.permute.xlu0 %1186 }
0x155b   :  { %v1189_v51 = vmul.f32 %v5252_v34, %v1187_v49 }
0x155d   :  { %1233 = vrot.lane.b32.xlu1 %v1189_v51, %s4891_s27  ;;  %v1192_v31 = vrot.slane %v1189_v51, 2 }
0x155e   :  { %v1200_v33 = vpop.permute.xlu0 %1199 }
0x155f   :  { %v1202_v42 = vsel %vm317_vm6, %v5137_v10, %v1200_v33 }
0x1560   :  { %v1248_v28 = vsel %vm142_vm2, %v1202_v42, %v1246_v44  ;;  %v1266_v41 = vrot.slane %v1202_v42, 6 }
0x1561   :  { %1193 = vrot.lane.b32.xlu1 %v1192_v31, %s4890_s26  ;;  %v1274_v34 = vrot.slane %v1248_v28, 4 }
0x1562   :  { %v1238_v47 = vpop.permute.xlu0 %1237  ;;  %v1268_v62 = vsel %vm142_vm2, %v1232_v36, %v1266_v41 }
0x15cf   :  { %v1234_v53 = vpop.permute.xlu1 %1233 }
0x15d0   :  { %v1240_v57 = vsel %vm317_vm6, %v1234_v53, %v1238_v47 }
0x15d1   :  { %v1242_v60 = vrot.slane %v1240_v57, 6 }
0x15d3   :  { %v1194_v61 = vpop.permute.xlu1 %1193 }
0x15d4   :  { %v1196_v35 = vsel %vm317_vm6, %v5102_v20, %v1194_v61 }
0x15d5   :  { %v1244_v30 = vsel %vm142_vm2, %v1196_v35, %v1242_v60  ;;  %v1270_v43 = vrot.slane %v1196_v35, 6 }
0x15d6   :  { %v1285_v10 = vsel %vm202_vm3, %v1244_v30, %v1274_v34 }
0x15d7   :  { %v1272_v45 = vsel %vm142_vm2, %v1240_v57, %v1270_v43  ;;  %4389 = vmatmul.mubr.msk.f32.vlgmr.msra.gmra.mxu0 %vm1297_vm7, %v1285_v10 }
0x15d8   :  { %v1283_v46 = vrot.slane %v1272_v45, 4  ;;  %1380 = vmatprep.mubr.f32.mxu0 %v4889_v0  ;;  %1745 = vmatpush1.msra.mxu0 %v5302_v21 }
0x15d9   :  { %1746 = vmatprep.subr.mxu0 %v5311_v19 }
0x15da   :  { %v5391_v20 = vsel %vm202_vm3, %v1268_v62, %v1283_v46  ;;  %1747 = vmatpush1.msra.mxu0 %v5320_v24  ;;  %v1216_v46 = vrot.slane %v5179_v13, 2  ;;  %v1222_v62 = vrot.slane %v5157_v37, 2  ;;  %v1204_v13 = vrot.slane %v5225_v7, 2 }
0x15db   :  { %1748 = vmatprep.subr.mxu0 %v5329_v55 }
0x15dc   :  { %1749 = vmatpush1.msra.mxu0 %v5338_v58 }
0x15dd   :  { %1750 = vmatprep.subr.mxu0 %v5347_v26 }
0x15de   :  { %1751 = vmatpush1.msra.mxu0 %v5356_v29 }
0x15df   :  { %1962 = vmatprep.subr.mxu0 %v5280_v6 }
0x1697   :  { %v1376_v9 = vpop.f32.mrf.mxu0 }
0x1698   :  { %v1377_v5 = vadd.f32 %v1376_v9, %v5401_v1 }
0x1699   :  { %v1378_v4 = vpop.f32.mrf.mxu0 }
0x169a   :  { %v1379_v11 = vadd.f32 %v1378_v4, %v5404_v2  ;;  %v1470_v15 = vadd.f32 %v1465_v8, %v1377_v5  ;;  %v1210_v4 = vrot.slane %v5204_v39, 2 }
0x169c   :  { %v1471_v16 = vadd.f32 %v1467_v12, %v1379_v11 }
0x169e   :  { %v1472_v17 = vsel %vm128_vm5, %v1470_v15, %v1471_v16 }
0x169f   :  { %4766 = vtanh.f32 %v1472_v17  ;;  %v4393_v52 = vmul.f32 -1.442695, %v1472_v17 }
0x16a1   :  { %4768 = vpow2.f32 %v4393_v52 }
0x16ac   :  { %v4767_v18 = vpop.eup %4766 }
0x16ad   :  { %1482 = vrot.lane.b32.xlu0 %v4767_v18, %s4890_s26 }
0x16ae   :  { %v4769_v54 = vpop.eup %4768 }
0x16af   :  { %v1476_v22 = vadd.f32 1.0, %v4769_v54 }
0x16b1   :  { %4770 = vrcp.f32 %v1476_v22 }
0x16be   :  { %v4771_v23 = vpop.eup %4770 }
0x16bf   :  { %v1480_v59 = vmul.f32 0.0, %v4771_v23 }
0x171f   :  { %v1483_v25 = vpop.permute.xlu0 %1482 }
0x1720   :  { %v1485_v56 = vmul.f32 %v4771_v23, %v1483_v25 }
0x1722   :  { %1487 = vrot.lane.b32.xlu1 %v1485_v56, %s4891_s27 }
0x1794   :  { %v1488_v27 = vpop.permute.xlu1 %1487 }
0x1795   :  { %v1490_v49 = vadd.f32 %v1488_v27, %v1480_v59 }
0x1797   :  { %4772 = vtanh.f32 %v1490_v49 }
0x17a4   :  { %v4773_v51 = vpop.eup %4772 }
0x17a5   :  { %1493 = vrot.lane.b32.xlu0 %v4773_v51, %s4890_s26 }
0x1817   :  { %v1494_v31 = vpop.permute.xlu0 %1493 }
0x1818   :  { %v5413_v32 = vmul.f32 %v4771_v23, %v1494_v31 }
0x181a   :  { %1498 = vrot.lane.b32.xlu1 %v5413_v32, %s4891_s27 }
0x188c   :  { %v5417_v33 = vpop.permute.xlu1 %1498 }
0x188d   :  { %4394 = vmatmul.mubr.msk.f32.vlgmr.msra.gmra.mxu1 %vm317_vm6, %v5417_v33 }
0x188e   :  { %1642 = vmatpush1.msra.mxu1 %v5302_v21  ;;  %1681 = vmatprep.mubr.f32.mxu1 %v4889_v0 }
0x188f   :  { %1643 = vmatprep.subr.mxu1 %v5311_v19 }
0x1890   :  { %1644 = vmatpush1.msra.mxu1 %v5320_v24 }
0x1891   :  { %1645 = vmatprep.subr.mxu1 %v5329_v55 }
0x1892   :  { %1646 = vmatpush1.msra.mxu1 %v5338_v58 }
0x1893   :  { %1647 = vmatprep.subr.mxu1 %v5347_v26 }
0x1894   :  { %1648 = vmatpush1.msra.mxu1 %v5356_v29 }
0x1895   :  { %1859 = vmatprep.subr.mxu1 %v5280_v6 }
0x194d   :  { %v1568_v36 = vpop.f32.mrf.mxu1 }
0x194e   :  { %v1575_v42 = vrot.slane %v1568_v36, 4 }
0x194f   :  { %v1570_v44 = vpop.f32.mrf.mxu1 }
0x1950   :  { %v1579_v47 = vadd.f32 %v1575_v42, %v1377_v5  ;;  %v1576_v53 = vrot.slane %v1570_v44, 4 }
0x1952   :  { %v1580_v57 = vadd.f32 %v1576_v53, %v1379_v11  ;;  %v1582_v28 = vrot.slane %v1579_v47, 4 }
0x1954   :  { %v1585_v60 = vrot.slane %v1580_v57, 4 }
0x1956   :  { %v1587_v61 = vsel %vm128_vm5, %v1582_v28, %v1585_v60 }
0x1957   :  { %4774 = vtanh.f32 %v1587_v61  ;;  %v4395_v35 = vmul.f32 -1.442695, %v1587_v61 }
0x1959   :  { %4776 = vpow2.f32 %v4395_v35 }
0x1964   :  { %v4775_v34 = vpop.eup %4774 }
0x1965   :  { %1597 = vrot.lane.b32.xlu0 %v4775_v34, %s4890_s26 }
0x1966   :  { %v4777_v41 = vpop.eup %4776 }
0x1967   :  { %v1591_v30 = vadd.f32 1.0, %v4777_v41 }
0x1969   :  { %4778 = vrcp.f32 %v1591_v30 }
0x1976   :  { %v4779_v43 = vpop.eup %4778 }
0x1977   :  { %v1595_v63 = vmul.f32 %v4779_v43, %v1490_v49 }
0x19d7   :  { %v1598_v10 = vpop.permute.xlu0 %1597 }
0x19d8   :  { %v1600_v45 = vmul.f32 %v4779_v43, %v1598_v10 }
0x19da   :  { %1602 = vrot.lane.b32.xlu1 %v1600_v45, %s4891_s27 }
0x19de   :  { %1217 = vrot.lane.b32.xlu1 %v1216_v46, %s4890_s26 }
0x19e2   :  { %1223 = vrot.lane.b32.xlu1 %v1222_v62, %s4890_s26 }
0x1a4c   :  { %v1603_v9 = vpop.permute.xlu1 %1602 }
0x1a4d   :  { %v5438_v8 = vadd.f32 %v1603_v9, %v1595_v63 }
0x1a4f   :  { %4780 = vtanh.f32 %v5438_v8 }
0x1a50   :  { %v1218_v37 = vpop.permute.xlu1 %1217 }
0x1a51   :  { %v1220_v12 = vsel %vm317_vm6, %v5208_v40, %v1218_v37 }
0x1a52   :  { %v1254_v17 = vrot.slane %v1220_v12, 6 }
0x1a54   :  { %v1224_v16 = vpop.permute.xlu1 %1223 }
0x1a55   :  { %v1226_v39 = vsel %vm317_vm6, %v5229_v3, %v1224_v16 }
0x1a56   :  { %v1250_v54 = vrot.slane %v1226_v39, 6 }
0x1a5c   :  { %v4781_v5 = vpop.eup %4780 }
0x1a5d   :  { %1608 = vrot.lane.b32.xlu0 %v4781_v5, %s4890_s26 }
0x1a61   :  { %1211 = vrot.lane.b32.xlu0 %v1210_v4, %s4890_s26 }
0x1a65   :  { %1205 = vrot.lane.b32.xlu0 %v1204_v13, %s4890_s26 }
0x1acf   :  { %v1609_v11 = vpop.permute.xlu0 %1608 }
0x1ad0   :  { %v5448_v15 = vmul.f32 %v4779_v43, %v1609_v11 }
0x1ad2   :  { %1613 = vrot.lane.b32.xlu1 %v5448_v15, %s4891_s27 }
0x1ad3   :  { %v1212_v18 = vpop.permute.xlu0 %1211 }
0x1ad4   :  { %v1214_v7 = vsel %vm317_vm6, %v5183_v14, %v1212_v18 }
0x1ad5   :  { %v1256_v52 = vsel %vm142_vm2, %v1214_v7, %v1254_v17  ;;  %v1258_v25 = vrot.slane %v1214_v7, 6 }
0x1ad6   :  { %v1277_v23 = vrot.slane %v1256_v52, 4 }
0x1ad7   :  { %v1206_v22 = vpop.permute.xlu0 %1205  ;;  %v1260_v14 = vsel %vm142_vm2, %v1220_v12, %v1258_v25 }
0x1ad8   :  { %v1208_v40 = vsel %vm317_vm6, %v5161_v38, %v1206_v22 }
0x1ad9   :  { %v1252_v56 = vsel %vm142_vm2, %v1208_v40, %v1250_v54  ;;  %v1262_v59 = vrot.slane %v1208_v40, 6 }
0x1ada   :  { %v1286_v27 = vsel %vm202_vm3, %v1252_v56, %v1277_v23 }
0x1adb   :  { %v1264_v49 = vsel %vm142_vm2, %v1226_v39, %v1262_v59  ;;  %4390 = vmatmul.mubr.msk.f32.gmra.mxu0 %vm1297_vm7, %v1286_v27 }
0x1adc   :  { %v1280_v3 = vrot.slane %v1264_v49, 4  ;;  %1386 = vmatprep.mubr.f32.mxu0 %v4889_v0 }
0x1ade   :  { %v1287_v51 = vsel %vm202_vm3, %v1260_v14, %v1280_v3 }
0x1adf   :  { %4391 = vmatmul.mubr.msk.f32.gmra.mxu0 %vm1297_vm7, %v1287_v51 }
0x1ae0   :  { %1392 = vmatprep.mubr.f32.mxu0 %v4889_v0 }
0x1ae3   :  { %4392 = vmatmul.mubr.msk.f32.gmra.mxu0 %vm1297_vm7, %v5391_v20 }
0x1ae4   :  { %1784 = vmatprep.mubr.f32.mxu0 %v4889_v0 }
0x1b44   :  { %v5471_v38 = vpop.permute.xlu1 %1613 }
0x1b45   :  { %4396 = vmatmul.mubr.msk.f32.vlgmr.msra.gmra.mxu1 %vm317_vm6, %v5471_v38 }
0x1b46   :  { %1860 = vmatpush1.msra.mxu1 %v5302_v21  ;;  %1899 = vmatprep.mubr.f32.mxu1 %v4889_v0 }
0x1b47   :  { %1861 = vmatprep.subr.mxu1 %v5311_v19 }
0x1b48   :  { %1862 = vmatpush1.msra.mxu1 %v5320_v24 }
0x1b49   :  { %1863 = vmatprep.subr.mxu1 %v5329_v55 }
0x1b4a   :  { %1864 = vmatpush1.msra.mxu1 %v5338_v58 }
0x1b4b   :  { %1865 = vmatprep.subr.mxu1 %v5347_v26 }
0x1b4c   :  { %1866 = vmatpush1.msra.mxu1 %v5356_v29 }
0x1b4d   :  { %2077 = vmatprep.subr.mxu1 %v5280_v6 }
0x1b9b   :  { %v1382_v20 = vpop.f32.mrf.mxu0 }
0x1b9c   :  { %v1383_v42 = vadd.f32 %v1382_v20, %v5401_v1 }
0x1b9d   :  { %v1384_v31 = vpop.f32.mrf.mxu0 }
0x1b9e   :  { %v1385_v44 = vadd.f32 %v1384_v31, %v5404_v2 }
0x1c05   :  { %v1683_v36 = vpop.f32.mrf.mxu1 }
0x1c06   :  { %v1688_v53 = vadd.f32 %v1683_v36, %v1383_v42 }
0x1c07   :  { %v1685_v47 = vpop.f32.mrf.mxu1 }
0x1c08   :  { %v1689_v57 = vadd.f32 %v1685_v47, %v1385_v44 }
0x1c0a   :  { %v1690_v28 = vsel %vm128_vm5, %v1688_v53, %v1689_v57 }
0x1c0b   :  { %4782 = vtanh.f32 %v1690_v28  ;;  %v4397_v61 = vmul.f32 -1.442695, %v1690_v28 }
0x1c0d   :  { %4784 = vpow2.f32 %v4397_v61 }
0x1c18   :  { %v4783_v60 = vpop.eup %4782 }
0x1c19   :  { %1700 = vrot.lane.b32.xlu0 %v4783_v60, %s4890_s26 }
0x1c1a   :  { %v4785_v34 = vpop.eup %4784 }
0x1c1b   :  { %v1694_v35 = vadd.f32 1.0, %v4785_v34 }
0x1c1d   :  { %4786 = vrcp.f32 %v1694_v35 }
0x1c2a   :  { %v4787_v41 = vpop.eup %4786 }
0x1c2b   :  { %v1698_v10 = vmul.f32 %v4787_v41, %v5438_v8  ;;  %v1388_v8 = vpop.f32.mrf.mxu0 }
0x1c2d   :  { %v1390_v4 = vpop.f32.mrf.mxu0 }
0x1c2f   :  { %v5509_v13 = vpop.f32.mrf.mxu0 }
0x1c31   :  { %v5511_v37 = vpop.f32.mrf.mxu0 }
0x1c8b   :  { %v1701_v30 = vpop.permute.xlu0 %1700 }
0x1c8c   :  { %v1703_v43 = vmul.f32 %v4787_v41, %v1701_v30 }
0x1c8e   :  { %1705 = vrot.lane.b32.xlu1 %v1703_v43, %s4891_s27 }
0x1d00   :  { %v1706_v45 = vpop.permute.xlu1 %1705 }
0x1d01   :  { %v1708_v46 = vadd.f32 %v1706_v45, %v1698_v10 }
0x1d03   :  { %4788 = vtanh.f32 %v1708_v46 }
0x1d10   :  { %v4789_v62 = vpop.eup %4788 }
0x1d11   :  { %1711 = vrot.lane.b32.xlu0 %v4789_v62, %s4890_s26 }
0x1d83   :  { %v1712_v63 = vpop.permute.xlu0 %1711 }
0x1d84   :  { %v5492_v9 = vmul.f32 %v4787_v41, %v1712_v63 }
0x1d86   :  { %1716 = vrot.lane.b32.xlu1 %v5492_v9, %s4891_s27 }
0x1df8   :  { %v5496_v5 = vpop.permute.xlu1 %1716 }
0x1df9   :  { %4398 = vmatmul.mubr.msk.f32.vlgmr.msra.gmra.mxu0 %vm317_vm6, %v5496_v5 }
0x1dfa   :  { %1963 = vmatpush1.msra.mxu0 %v5302_v21  ;;  %2002 = vmatprep.mubr.f32.mxu0 %v4889_v0 }
0x1dfb   :  { %1964 = vmatprep.subr.mxu0 %v5311_v19 }
0x1dfc   :  { %1965 = vmatpush1.msra.mxu0 %v5320_v24 }
0x1dfd   :  { %1966 = vmatprep.subr.mxu0 %v5329_v55 }
0x1dfe   :  { %1967 = vmatpush1.msra.mxu0 %v5338_v58 }
0x1dff   :  { %1968 = vmatprep.subr.mxu0 %v5347_v26 }
0x1e00   :  { %1969 = vmatpush1.msra.mxu0 %v5356_v29 }
0x1e01   :  { %2180 = vmatprep.subr.mxu0 %v5280_v6 }
0x1eb9   :  { %v1786_v11 = vpop.f32.mrf.mxu0 }
0x1eba   :  { %v1793_v12 = vrot.slane %v1786_v11, 4 }
0x1ebb   :  { %v1788_v16 = vpop.f32.mrf.mxu0 }
0x1ebc   :  { %v1797_v17 = vadd.f32 %v1793_v12, %v1383_v42  ;;  %v1794_v18 = vrot.slane %v1788_v16, 4  ;;  %v1389_v42 = vadd.f32 %v1388_v8, %v5401_v1 }
0x1ebe   :  { %v1798_v39 = vadd.f32 %v1794_v18, %v1385_v44  ;;  %v1800_v7 = vrot.slane %v1797_v17, 4  ;;  %v1391_v44 = vadd.f32 %v1390_v4, %v5404_v2 }
0x1ec0   :  { %v1803_v52 = vrot.slane %v1798_v39, 4 }
0x1ec2   :  { %v1805_v54 = vsel %vm128_vm5, %v1800_v7, %v1803_v52 }
0x1ec3   :  { %4790 = vtanh.f32 %v1805_v54  ;;  %v4399_v6 = vmul.f32 -1.442695, %v1805_v54 }
0x1ec5   :  { %4792 = vpow2.f32 %v4399_v6 }
0x1ed0   :  { %v4791_v22 = vpop.eup %4790 }
0x1ed1   :  { %1815 = vrot.lane.b32.xlu0 %v4791_v22, %s4890_s26 }
0x1ed2   :  { %v4793_v23 = vpop.eup %4792 }
0x1ed3   :  { %v1809_v40 = vadd.f32 1.0, %v4793_v23 }
0x1ed5   :  { %4794 = vrcp.f32 %v1809_v40 }
0x1ee2   :  { %v4795_v25 = vpop.eup %4794 }
0x1ee3   :  { %v1813_v27 = vmul.f32 %v4795_v25, %v1708_v46 }
0x1f43   :  { %v1816_v56 = vpop.permute.xlu0 %1815 }
0x1f44   :  { %v1818_v59 = vmul.f32 %v4795_v25, %v1816_v56 }
0x1f46   :  { %1820 = vrot.lane.b32.xlu1 %v1818_v59, %s4891_s27 }
0x1fb8   :  { %v1821_v49 = vpop.permute.xlu1 %1820 }
0x1fb9   :  { %v1823_v3 = vadd.f32 %v1821_v49, %v1813_v27  ;;  %v1395_v49 = vadd.f32 %v5509_v13, %v5401_v1 }
0x1fbb   :  { %4796 = vtanh.f32 %v1823_v3 }
0x1fc8   :  { %v4797_v14 = vpop.eup %4796 }
0x1fc9   :  { %1826 = vrot.lane.b32.xlu0 %v4797_v14, %s4890_s26 }
0x203b   :  { %v1827_v51 = vpop.permute.xlu0 %1826 }
0x203c   :  { %v5518_v20 = vmul.f32 %v4795_v25, %v1827_v51 }
0x203e   :  { %1831 = vrot.lane.b32.xlu1 %v5518_v20, %s4891_s27 }
0x20b0   :  { %v5522_v31 = vpop.permute.xlu1 %1831 }
0x20b1   :  { %4400 = vmatmul.mubr.msk.f32.vlgmr.msra.gmra.mxu1 %vm317_vm6, %v5522_v31 }
0x20b2   :  { %2078 = vmatpush1.msra.mxu1 %v5302_v21  ;;  %2117 = vmatprep.mubr.f32.mxu1 %v4889_v0 }
0x20b3   :  { %2079 = vmatprep.subr.mxu1 %v5311_v19 }
0x20b4   :  { %2080 = vmatpush1.msra.mxu1 %v5320_v24 }
0x20b5   :  { %2081 = vmatprep.subr.mxu1 %v5329_v55 }
0x20b6   :  { %2082 = vmatpush1.msra.mxu1 %v5338_v58 }
0x20b7   :  { %2083 = vmatprep.subr.mxu1 %v5347_v26 }
0x20b8   :  { %2084 = vmatpush1.msra.mxu1 %v5356_v29 }
0x2171   :  { %v1901_v36 = vpop.f32.mrf.mxu1 }
0x2172   :  { %v1906_v53 = vadd.f32 %v1901_v36, %v1389_v42 }
0x2173   :  { %v1903_v47 = vpop.f32.mrf.mxu1 }
0x2174   :  { %v1907_v57 = vadd.f32 %v1903_v47, %v1391_v44 }
0x2176   :  { %v1908_v28 = vsel %vm128_vm5, %v1906_v53, %v1907_v57 }
0x2177   :  { %4798 = vtanh.f32 %v1908_v28  ;;  %v4401_v61 = vmul.f32 -1.442695, %v1908_v28 }
0x2179   :  { %4800 = vpow2.f32 %v4401_v61 }
0x2184   :  { %v4799_v60 = vpop.eup %4798 }
0x2185   :  { %1918 = vrot.lane.b32.xlu0 %v4799_v60, %s4890_s26 }
0x2186   :  { %v4801_v34 = vpop.eup %4800 }
0x2187   :  { %v1912_v35 = vadd.f32 1.0, %v4801_v34 }
0x2189   :  { %4802 = vrcp.f32 %v1912_v35 }
0x2196   :  { %v4803_v41 = vpop.eup %4802 }
0x2197   :  { %v1916_v10 = vmul.f32 %v4803_v41, %v1823_v3  ;;  %v1397_v3 = vadd.f32 %v5511_v37, %v5404_v2 }
0x21f7   :  { %v1919_v30 = vpop.permute.xlu0 %1918 }
0x21f8   :  { %v1921_v43 = vmul.f32 %v4803_v41, %v1919_v30 }
0x21fa   :  { %1923 = vrot.lane.b32.xlu1 %v1921_v43, %s4891_s27 }
0x226c   :  { %v1924_v45 = vpop.permute.xlu1 %1923 }
0x226d   :  { %v1926_v46 = vadd.f32 %v1924_v45, %v1916_v10 }
0x226f   :  { %4804 = vtanh.f32 %v1926_v46 }
0x227c   :  { %v4805_v62 = vpop.eup %4804 }
0x227d   :  { %1929 = vrot.lane.b32.xlu0 %v4805_v62, %s4890_s26 }
0x22ef   :  { %v1930_v63 = vpop.permute.xlu0 %1929 }
0x22f0   :  { %v5541_v8 = vmul.f32 %v4803_v41, %v1930_v63 }
0x22f2   :  { %1934 = vrot.lane.b32.xlu1 %v5541_v8, %s4891_s27 }
0x2364   :  { %v5545_v4 = vpop.permute.xlu1 %1934 }
0x2365   :  { %4402 = vmatmul.mubr.msk.f32.vlgmr.msra.gmra.mxu0 %vm317_vm6, %v5545_v4 }
0x2366   :  { %2181 = vmatpush1.msra.mxu0 %v5302_v21  ;;  %2220 = vmatprep.mubr.f32.mxu0 %v4889_v0 }
0x2367   :  { %2182 = vmatprep.subr.mxu0 %v5311_v19 }
0x2368   :  { %2183 = vmatpush1.msra.mxu0 %v5320_v24 }
0x2369   :  { %2184 = vmatprep.subr.mxu0 %v5329_v55 }
0x236a   :  { %2185 = vmatpush1.msra.mxu0 %v5338_v58 }
0x236b   :  { %2186 = vmatprep.subr.mxu0 %v5347_v26 }
0x236c   :  { %2187 = vmatpush1.msra.mxu0 %v5356_v29 }
0x236d   :  { %4515 = vmatprep.subr.mxu0 %v4889_v0 }
0x2425   :  { %v2004_v11 = vpop.f32.mrf.mxu0 }
0x2426   :  { %v2011_v12 = vrot.slane %v2004_v11, 4 }
0x2427   :  { %v2006_v16 = vpop.f32.mrf.mxu0 }
0x2428   :  { %v2015_v21 = vadd.f32 %v2011_v12, %v1389_v42  ;;  %v2012_v17 = vrot.slane %v2006_v16, 4 }
0x242a   :  { %v2016_v18 = vadd.f32 %v2012_v17, %v1391_v44  ;;  %v2018_v39 = vrot.slane %v2015_v21, 4 }
0x242c   :  { %v2021_v19 = vrot.slane %v2016_v18, 4 }
0x242e   :  { %v2023_v24 = vsel %vm128_vm5, %v2018_v39, %v2021_v19 }
0x242f   :  { %4806 = vtanh.f32 %v2023_v24  ;;  %v4403_v58 = vmul.f32 -1.442695, %v2023_v24 }
0x2431   :  { %4808 = vpow2.f32 %v4403_v58  ;;  %v2292_v58 = vrot.slane %v5518_v20, 2  ;;  %v83_v20 = vld [vmem:[%s5965_s2 + $0x78] sm:$0xff] }
0x2432   :  { %2622 = vmatprep.subr.mxu1 %v83_v20 }
0x243c   :  { %v4807_v55 = vpop.eup %4806 }
0x243d   :  { %2033 = vrot.lane.b32.xlu0 %v4807_v55, %s4890_s26 }
0x243e   :  { %v4809_v26 = vpop.eup %4808 }
0x243f   :  { %v2027_v29 = vadd.f32 1.0, %v4809_v26  ;;  %v2304_v26 = vrot.slane %v5448_v15, 2  ;;  %v82_v15 = vld [vmem:[%s5965_s2 + $0x70] sm:$0xff] }
0x2441   :  { %4810 = vrcp.f32 %v2027_v29 }
0x244e   :  { %v4811_v7 = vpop.eup %4810 }
0x244f   :  { %v2031_v22 = vmul.f32 %v4811_v7, %v1926_v46 }
0x24af   :  { %v2034_v52 = vpop.permute.xlu0 %2033 }
0x24b0   :  { %v2036_v54 = vmul.f32 %v4811_v7, %v2034_v52 }
0x24b2   :  { %2038 = vrot.lane.b32.xlu1 %v2036_v54, %s4891_s27 }
0x2524   :  { %v2039_v6 = vpop.permute.xlu1 %2038 }
0x2525   :  { %v2041_v23 = vadd.f32 %v2039_v6, %v2031_v22  ;;  %v2286_v6 = vrot.slane %v5541_v8, 2  ;;  %v81_v8 = vld [vmem:[%s5965_s2 + $0x68] sm:$0xff] }
0x2527   :  { %4812 = vtanh.f32 %v2041_v23 }
0x2534   :  { %v4813_v40 = vpop.eup %4812 }
0x2535   :  { %2044 = vrot.lane.b32.xlu0 %v4813_v40, %s4890_s26  ;;  %v80_v40 = vld [vmem:[%s5965_s2 + $0x60] sm:$0xff] }
0x25a7   :  { %v2045_v25 = vpop.permute.xlu0 %2044 }
0x25a8   :  { %v5563_v56 = vmul.f32 %v4811_v7, %v2045_v25  ;;  %v79_v25 = vld [vmem:[%s5965_s2 + $0x58] sm:$0xff] }
0x25aa   :  { %2049 = vrot.lane.b32.xlu1 %v5563_v56, %s4891_s27  ;;  %v2280_v22 = vrot.slane %v5563_v56, 2  ;;  %v77_v56 = vld [vmem:[%s5965_s2 + $0x48] sm:$0xff] }
0x261c   :  { %v5567_v59 = vpop.permute.xlu1 %2049 }
0x261d   :  { %4404 = vmatmul.mubr.msk.f32.vlgmr.msra.gmra.mxu1 %vm317_vm6, %v5567_v59 }
0x261e   :  { %2670 = vmatprep.mubr.f32.mxu1 %v4889_v0  ;;  %2623 = vmatpush1.msra.mxu1 %v82_v15 }
0x261f   :  { %2624 = vmatprep.subr.mxu1 %v81_v8 }
0x2620   :  { %2625 = vmatpush1.msra.mxu1 %v80_v40 }
0x2621   :  { %2626 = vmatprep.subr.mxu1 %v79_v25 }
0x26dd   :  { %v2119_v27 = vpop.f32.mrf.mxu1 }
0x26de   :  { %v2124_v51 = vadd.f32 %v2119_v27, %v1395_v49  ;;  %v76_v27 = vld [vmem:[%s5965_s2 + $0x40] sm:$0xff] }
0x26df   :  { %v2121_v14 = vpop.f32.mrf.mxu1 }
0x26e0   :  { %v2125_v36 = vadd.f32 %v2121_v14, %v1397_v3  ;;  %v73_v14 = vld [vmem:[%s5965_s2 + $0x28] sm:$0xff] }
0x26e2   :  { %v2126_v42 = vsel %vm128_vm5, %v2124_v51, %v2125_v36  ;;  %v72_v51 = vld [vmem:[%s5965_s2 + $0x20] sm:$0xff]  ;;  %v71_v36 = vld [vmem:[%s5965_s2 + $0x18] sm:$0xff] }
0x26e3   :  { %4814 = vtanh.f32 %v2126_v42  ;;  %v4405_v47 = vmul.f32 -1.442695, %v2126_v42 }
0x26e5   :  { %4816 = vpow2.f32 %v4405_v47 }
0x26f0   :  { %v4815_v44 = vpop.eup %4814 }
0x26f1   :  { %2136 = vrot.lane.b32.xlu0 %v4815_v44, %s4890_s26  ;;  %v70_v44 = vld [vmem:[%s5965_s2 + $0x10] sm:$0xff] }
0x26f2   :  { %v4817_v53 = vpop.eup %4816 }
0x26f3   :  { %v2130_v57 = vadd.f32 1.0, %v4817_v53  ;;  %v69_v53 = vld [vmem:[%s5965_s2 + $0x8] sm:$0xff] }
0x26f5   :  { %4818 = vrcp.f32 %v2130_v57  ;;  %v68_v57 = vld [vmem:[%s5965_s2] sm:$0xff] }
0x2702   :  { %v4819_v28 = vpop.eup %4818 }
0x2703   :  { %v2134_v2 = vmul.f32 %v4819_v28, %v2041_v23  ;;  %v2298_v23 = vrot.slane %v5492_v9, 2  ;;  %v78_v9 = vld [vmem:[%s5965_s2 + $0x50] sm:$0xff] }
0x2704   :  { %2627 = vmatpush1.msra.mxu1 %v78_v9 }
0x2705   :  { %2628 = vmatprep.subr.mxu1 %v77_v56 }
0x2706   :  { %2629 = vmatpush1.msra.mxu1 %v76_v27 }
0x2763   :  { %v2137_v1 = vpop.permute.xlu0 %2136 }
0x2764   :  { %v2139_v13 = vmul.f32 %v4819_v28, %v2137_v1  ;;  %v2312_v1 = vrot.slane %v5413_v32, 2 }
0x2766   :  { %2141 = vrot.lane.b32.xlu1 %v2139_v13, %s4891_s27  ;;  %v4892_v13 = vmov 1966171168  }
0x27d8   :  { %v2142_v37 = vpop.permute.xlu1 %2141 }
0x27d9   :  { %v2144_v60 = vadd.f32 %v2142_v37, %v2134_v2  ;;  %v2319_v2 = vunpack.c.l.s4 %v4892_v13 }
0x27db   :  { %4820 = vtanh.f32 %v2144_v60 }
0x27e8   :  { %v4821_v61 = vpop.eup %4820 }
0x27e9   :  { %2147 = vrot.lane.b32.xlu0 %v4821_v61, %s4890_s26  ;;  %v2320_v61 = vunpack.c.0.s8 %v2319_v2 }
0x285b   :  { %v2148_v34 = vpop.permute.xlu0 %2147 }
0x285c   :  { %v2150_v35 = vmul.f32 %v4819_v28, %v2148_v34 }
0x285e   :  { %2152 = vrot.lane.b32.xlu1 %v2150_v35, %s4891_s27  ;;  %v2274_v55 = vrot.slane %v2150_v35, 2  ;;  %v5656_v35 = vsub.s32 %v2320_v61, %v5059_v48 }
0x28d0   :  { %v5582_v41 = vpop.permute.xlu1 %2152 }
0x28d1   :  { %4406 = vmatmul.mubr.msk.f32.vlgmr.msra.gmra.mxu0 %vm317_vm6, %v5582_v41 }
0x28d2   :  { %4517 = vmatprep.mubr.msk.f32.mxu0 %vm4893_vm13, %v4889_v0 }
0x2991   :  { %v2222_v30 = vpop.f32.mrf.mxu0 }
0x2992   :  { %v2229_v43 = vrot.slane %v2222_v30, 4 }
0x2993   :  { %v2224_v10 = vpop.f32.mrf.mxu0 }
0x2994   :  { %v2233_v45 = vadd.f32 %v2229_v43, %v1395_v49  ;;  %v2230_v46 = vrot.slane %v2224_v10, 4  ;;  %v75_v49 = vld [vmem:[%s5965_s2 + $0x38] sm:$0xff] }
0x2995   :  { %2630 = vmatprep.subr.mxu1 %v75_v49 }
0x2996   :  { %v2234_v62 = vadd.f32 %v2230_v46, %v1397_v3  ;;  %v2236_v63 = vrot.slane %v2233_v45, 4  ;;  %v74_v3 = vld [vmem:[%s5965_s2 + $0x30] sm:$0xff] }
0x2997   :  { %2631 = vmatpush1.msra.mxu1 %v74_v3 }
0x2998   :  { %v2239_v11 = vrot.slane %v2234_v62, 4  ;;  %2632 = vmatprep.subr.mxu1 %v73_v14 }
0x2999   :  { %2633 = vmatpush1.msra.mxu1 %v72_v51 }
0x299a   :  { %v2241_v12 = vsel %vm128_vm5, %v2236_v63, %v2239_v11  ;;  %2634 = vmatprep.subr.mxu1 %v71_v36 }
0x299b   :  { %4822 = vtanh.f32 %v2241_v12  ;;  %v4407_v21 = vmul.f32 -1.442695, %v2241_v12  ;;  %2635 = vmatpush1.msra.mxu1 %v70_v44 }
0x299c   :  { %2636 = vmatprep.subr.mxu1 %v69_v53 }
0x299d   :  { %4824 = vpow2.f32 %v4407_v21  ;;  %2637 = vmatpush1.msra.mxu1 %v68_v57 }
0x299e   :  { %4540 = vmatprep.subr.mxu1 %v4889_v0 }
0x29a8   :  { %v4823_v16 = vpop.eup %4822 }
0x29a9   :  { %2251 = vrot.lane.b32.xlu0 %v4823_v16, %s4890_s26 }
0x29aa   :  { %v4825_v17 = vpop.eup %4824 }
0x29ab   :  { %v2245_v18 = vadd.f32 1.0, %v4825_v17 }
0x29ad   :  { %4826 = vrcp.f32 %v2245_v18 }
0x29ba   :  { %v4827_v39 = vpop.eup %4826 }
0x29bb   :  { %v2249_v29 = vmul.f32 %v4827_v39, %v2144_v60 }
0x2a1b   :  { %v2252_v19 = vpop.permute.xlu0 %2251 }
0x2a1c   :  { %v2254_v24 = vmul.f32 %v4827_v39, %v2252_v19 }
0x2a1e   :  { %2256 = vrot.lane.b32.xlu1 %v2254_v24, %s4891_s27 }
0x2a22   :  { %2275 = vrot.lane.b32.xlu1 %v2274_v55, %s4890_s26 }
0x2a26   :  { %2293 = vrot.lane.b32.xlu1 %v2292_v58, %s4890_s26 }
0x2a2a   :  { %2305 = vrot.lane.b32.xlu1 %v2304_v26, %s4890_s26 }
0x2a90   :  { %v2257_v7 = vpop.permute.xlu1 %2256 }
0x2a91   :  { %v2259_v52 = vadd.f32 %v2257_v7, %v2249_v29 }
0x2a93   :  { %4828 = vtanh.f32 %v2259_v52 }
0x2a94   :  { %v2276_v37 = vpop.permute.xlu1 %2275 }
0x2a95   :  { %v2278_v30 = vsel %vm317_vm6, %v5471_v38, %v2276_v37 }
0x2a96   :  { %v2349_v32 = vrot.slane %v2278_v30, %v5656_v35 }
0x2a98   :  { %v2294_v34 = vpop.permute.xlu1 %2293  ;;  %v2350_v11 = vcombine.high %v2349_v32, %v2349_v32 }
0x2a99   :  { %v2296_v10 = vsel %vm317_vm6, %v5545_v4, %v2294_v34 }
0x2a9a   :  { %v2418_v46 = vrot.slane %v2296_v10, %v5656_v35 }
0x2a9c   :  { %v2306_v45 = vpop.permute.xlu1 %2305  ;;  %v2419_v16 = vcombine.high %v2418_v46, %v2418_v46  ;;  %v2426_v19 = vrot.slane %v2418_v46, %v5656_v35 }
0x2a9d   :  { %v2308_v62 = vsel %vm317_vm6, %v5582_v41, %v2306_v45  ;;  %v2357_v41 = vrot.slane %v2349_v32, %v5656_v35 }
0x2a9e   :  { %v2464_v21 = vrot.slane %v2308_v62, %v5656_v35  ;;  %v2536_v7 = vrot.slane %v2426_v19, %v5064_v50 }
0x2aa0   :  { %v4829_v54 = vpop.eup %4828  ;;  %v2465_v24 = vcombine.high %v2464_v21, %v2464_v21  ;;  %v2472_v55 = vrot.slane %v2464_v21, %v5656_v35 }
0x2aa1   :  { %2262 = vrot.lane.b32.xlu0 %v4829_v54, %s4890_s26 }
0x2aa2   :  { %v2479_v15 = vrot.slane %v2465_v24, %v5656_v35 }
0x2aa4   :  { %v2560_v62 = vrot.slane %v2479_v15, %v5064_v50 }
0x2aa5   :  { %2281 = vrot.lane.b32.xlu0 %v2280_v22, %s4890_s26 }
0x2aa9   :  { %2287 = vrot.lane.b32.xlu0 %v2286_v6, %s4890_s26 }
0x2aad   :  { %2299 = vrot.lane.b32.xlu0 %v2298_v23, %s4890_s26  ;;  %v2556_v23 = vrot.slane %v2472_v55, %v5064_v50 }
0x2b13   :  { %v2263_v42 = vpop.permute.xlu0 %2262 }
0x2b14   :  { %v2265_v47 = vmul.f32 %v4827_v39, %v2263_v42  ;;  %v2364_v39 = vrot.slane %v2350_v11, %v5656_v35 }
0x2b16   :  { %v2268_v28 = vrot.slane %v2265_v47, 2  ;;  %2309 = vrot.lane.b32.xlu0 %v2265_v47, %s4891_s27  ;;  %v2510_v29 = vrot.slane %v2364_v39, %v5064_v50 }
0x2b17   :  { %v2282_v60 = vpop.permute.xlu0 %2281 }
0x2b18   :  { %2269 = vrot.lane.b32.xlu1 %v2268_v28, %s4890_s26  ;;  %v2284_v12 = vsel %vm317_vm6, %v5496_v5, %v2282_v60  ;;  %v2433_v5 = vrot.slane %v2419_v16, %v5656_v35 }
0x2b19   :  { %v2372_v17 = vrot.slane %v2284_v12, %v5656_v35 }
0x2b1a   :  { %v2540_v54 = vrot.slane %v2433_v5, %v5064_v50 }
0x2b1b   :  { %v2288_v43 = vpop.permute.xlu0 %2287  ;;  %v2373_v58 = vcombine.high %v2372_v17, %v2372_v17  ;;  %v2380_v22 = vrot.slane %v2372_v17, %v5656_v35 }
0x2b1c   :  { %2313 = vrot.lane.b32.xlu1 %v2312_v1, %s4890_s26  ;;  %v2290_v38 = vsel %vm317_vm6, %v5522_v31, %v2288_v43 }
0x2b1d   :  { %v2395_v18 = vrot.slane %v2290_v38, %v5656_v35  ;;  %v2387_v25 = vrot.slane %v2373_v58, %v5656_v35  ;;  %v2516_v14 = vrot.slane %v2380_v22, %v5064_v50  ;;  %v4863_v22 = vld [vmem:[%s5967_s4 + $0x8] sm:$0xff] }
0x2b1f   :  { %v2300_v63 = vpop.permute.xlu0 %2299  ;;  %v2396_v26 = vcombine.high %v2395_v18, %v2395_v18  ;;  %v2403_v8 = vrot.slane %v2395_v18, %v5656_v35  ;;  %v2520_v57 = vrot.slane %v2387_v25, %v5064_v50 }
0x2b20   :  { %v2302_v4 = vsel %vm317_vm6, %v5567_v59, %v2300_v63  ;;  %v2506_v59 = vrot.slane %v2357_v41, %v5064_v50 }
0x2b21   :  { %v2441_v31 = vrot.slane %v2302_v4, %v5656_v35  ;;  %v2410_v9 = vrot.slane %v2396_v26, %v5656_v35  ;;  %v2526_v42 = vrot.slane %v2403_v8, %v5064_v50  ;;  %v5734_v4 = vld [vmem:[%s5967_s4] sm:$0xff] }
0x2b23   :  { %v2442_v6 = vcombine.high %v2441_v31, %v2441_v31  ;;  %v2449_v56 = vrot.slane %v2441_v31, %v5656_v35  ;;  %v2530_v28 = vrot.slane %v2410_v9, %v5064_v50 }
0x2b25   :  { %v2456_v51 = vrot.slane %v2442_v6, %v5656_v35  ;;  %v2546_v1 = vrot.slane %v2449_v56, %v5064_v50 }
0x2b27   :  { %v2550_v34 = vrot.slane %v2456_v51, %v5064_v50 }
0x2b88   :  { %v2310_v27 = vpop.permute.xlu0 %2309 }
0x2b8a   :  { %v2270_v52 = vpop.permute.xlu1 %2269 }
0x2b8b   :  { %v2272_v20 = vsel %vm317_vm6, %v5417_v33, %v2270_v52 }
0x2b8c   :  { %v2324_v40 = vrot.slane %v2272_v20, %v5656_v35 }
0x2b8e   :  { %v2325_v49 = vcombine.high %v2324_v40, %v2324_v40  ;;  %v2332_v33 = vrot.slane %v2324_v40, %v5656_v35  ;;  %v2314_v3 = vpop.permute.xlu1 %2313 }
0x2b8f   :  { %v2316_v36 = vsel %vm317_vm6, %v2310_v27, %v2314_v3 }
0x2b90   :  { %v2339_v44 = vrot.slane %v2325_v49, %v5656_v35  ;;  %v2574_v47 = vsel %vm2573_vm8, %v2332_v33, %v2506_v59  ;;  %v2487_v53 = vrot.slane %v2316_v36, %v5656_v35 }
0x2b91   :  { %v2576_v13 = vsel %vm142_vm2, %v2574_v47, %v2516_v14 }
0x2b92   :  { %v2575_v2 = vsel %vm2573_vm8, %v2339_v44, %v2510_v29  ;;  %v2579_v37 = vsel %vm2578_vm9, %v2576_v13, %v2526_v42  ;;  %v2488_v60 = vcombine.high %v2487_v53, %v2487_v53  ;;  %v2495_v61 = vrot.slane %v2487_v53, %v5656_v35 }
0x2b93   :  { %v2577_v30 = vsel %vm142_vm2, %v2575_v2, %v2520_v57  ;;  %v2581_v43 = vsel %vm202_vm3, %v2579_v37, %v2536_v7 }
0x2b94   :  { %v2502_v10 = vrot.slane %v2488_v60, %v5656_v35  ;;  %v2566_v32 = vrot.slane %v2495_v61, %v5064_v50  ;;  %v2584_v45 = vsel %vm2583_vm10, %v2581_v43, %v2546_v1  ;;  %v2580_v46 = vsel %vm2578_vm9, %v2577_v30, %v2530_v28 }
0x2b95   :  { %v2587_v63 = vsel %vm2586_vm11, %v2584_v45, %v2556_v23  ;;  %v2582_v11 = vsel %vm202_vm3, %v2580_v46, %v2540_v54 }
0x2b96   :  { %v2590_v12 = vsel %vm2589_vm12, %v2587_v63, %v2566_v32  ;;  %v2570_v38 = vrot.slane %v2502_v10, %v5064_v50  ;;  %v2585_v16 = vsel %vm2583_vm10, %v2582_v11, %v2550_v34  ;;  %v2594_v50 = vsub.s32 2, %v5059_v48 }
0x2b97   :  { %4408 = vmatmul.mubr.msk.f32.vlgmr.msra.gmra.mxu1 %vm1297_vm7, %v2590_v12  ;;  %v2588_v35 = vsel %vm2586_vm11, %v2585_v16, %v2560_v62 }
0x2b98   :  { %2676 = vmatprep.mubr.f32.mxu1 %v4889_v0  ;;  %v2591_v21 = vsel %vm2589_vm12, %v2588_v35, %v2570_v38  ;;  %v2595_v17 = vrot.slane %v5734_v4, %v2594_v50  ;;  %v2599_v6 = vrot.slane %v4863_v22, %v2594_v50 }
0x2b9b   :  { %4409 = vmatmul.mubr.msk.f32.gmra.mxu1 %vm1297_vm7, %v2591_v21 }
0x2b9c   :  { %4542 = vmatprep.mubr.msk.f32.mxu1 %vm4893_vm13, %v4889_v0 }
0x2c57   :  { %v2672_v18 = vpop.f32.mrf.mxu1 }
0x2c58   :  { %v2673_v41 = vadd.f32 %v2672_v18, %v2595_v17 }
0x2c59   :  { %v5737_v39 = vpop.f32.mrf.mxu1 }
0x2c5a   :  { %2838 = vrot.lane.b32.xlu1 %v2673_v41, %s4894_s7  ;;  %2684 = vrot.lane.b32.xlu0 %v2673_v41, %s4890_s26  ;;  %v5791_v8 = vadd.f32 %v5737_v39, %v2599_v6 }
0x2c5b   :  { %v2678_v19 = vpop.f32.mrf.mxu1 }
0x2c5c   :  { %v2679_v5 = vadd.f32 %v2678_v19, %v2595_v17 }
0x2c5d   :  { %v2680_v23 = vpop.f32.mrf.mxu1 }
0x2c5e   :  { %2840 = vrot.lane.b32.xlu0 %v2673_v41, %s4895_s8  ;;  %2762 = vrot.lane.b32.xlu1 %v2679_v5, %s4890_s26  ;;  %v5793_v40 = vadd.f32 %v2680_v23, %v2599_v6 }
0x2c62   :  { %2996 = vrot.lane.b32.xlu0 %v2673_v41, %s4891_s27  ;;  %2916 = vrot.lane.b32.xlu1 %v2679_v5, %s4894_s7 }
0x2c66   :  { %2918 = vrot.lane.b32.xlu0 %v2679_v5, %s4895_s8  ;;  %3074 = vrot.lane.b32.xlu1 %v2679_v5, %s4891_s27 }
0x2c6a   :  { %2994 = vrot.lane.b32.xlu0 %v2673_v41, %s4896_s0  ;;  %3072 = vrot.lane.b32.xlu1 %v2679_v5, %s4896_s0 }
0x2c6e   :  { %3152 = vrot.lane.b32.xlu0 %v2673_v41, %s4897_s9  ;;  %3230 = vrot.lane.b32.xlu1 %v2679_v5, %s4897_s9 }
0x2c72   :  { %3150 = vrot.lane.b32.xlu0 %v2673_v41, %s4898_s10  ;;  %3228 = vrot.lane.b32.xlu1 %v2679_v5, %s4898_s10 }
0x2ccc   :  { %v2839_v31 = vpop.permute.xlu1 %2838  ;;  %v2685_v24 = vpop.permute.xlu0 %2684 }
0x2ccd   :  { %4516 = vmatpush3.xpose.msk.msra.mxu0 %vm2686_vm14, %v2685_v24 }
0x2cce   :  { %4520 = vmatprep.subr.mxu0 %v4889_v0 }
0x2cd0   :  { %4518 = vmatmul.mubr.msk.f32.vlgmr.msra.gmra.mxu0 %vm2686_vm14, %v2673_v41  ;;  %v2841_v55 = vpop.permute.xlu0 %2840  ;;  %v2763_v58 = vpop.permute.xlu1 %2762 }
0x2cd1   :  { %4521 = vmatpush3.xpose.msk.msra.mxu0 %vm2686_vm14, %v2763_v58  ;;  %4522 = vmatprep.mubr.msk.f32.mxu0 %vm4893_vm13, %v4889_v0 }
0x2cd2   :  { %4525 = vmatprep.subr.mxu0 %v4889_v0 }
0x2cd4   :  { %v2997_v26 = vpop.permute.xlu0 %2996  ;;  %4523 = vmatmul.mubr.msk.f32.vlgmr.msra.gmra.mxu0 %vm2686_vm14, %v2679_v5  ;;  %v2917_v59 = vpop.permute.xlu1 %2916 }
0x2cd5   :  { %4526 = vmatpush3.xpose.msk.msra.mxu0 %vm2686_vm14, %v2841_v55  ;;  %4527 = vmatprep.mubr.msk.f32.mxu0 %vm4893_vm13, %v4889_v0 }
0x2cd6   :  { %4530 = vmatprep.subr.mxu0 %v4889_v0 }
0x2cd8   :  { %v2919_v29 = vpop.permute.xlu0 %2918  ;;  %4528 = vmatmul.mubr.msk.f32.vlgmr.msra.gmra.mxu0 %vm2686_vm14, %v2839_v31  ;;  %v3075_v7 = vpop.permute.xlu1 %3074 }
0x2cd9   :  { %4531 = vmatpush3.xpose.msk.msra.mxu0 %vm2686_vm14, %v2919_v29  ;;  %4541 = vmatpush3.xpose.msk.msra.mxu1 %vm2686_vm14, %v3075_v7 }
0x2cda   :  { %4532 = vmatprep.mubr.msk.f32.mxu0 %vm4893_vm13, %v4889_v0  ;;  %4535 = vmatprep.subr.mxu0 %v4889_v0 }
0x2cdb   :  { %4550 = vmatprep.subr.mxu1 %v4889_v0 }
0x2cdc   :  { %v2995_v52 = vpop.permute.xlu0 %2994  ;;  %4533 = vmatmul.mubr.msk.f32.vlgmr.msra.gmra.mxu0 %vm2686_vm14, %v2917_v59  ;;  %v3073_v54 = vpop.permute.xlu1 %3072 }
0x2cdd   :  { %4536 = vmatpush3.xpose.msk.msra.mxu0 %vm2686_vm14, %v2997_v26  ;;  %4543 = vmatmul.mubr.msk.f32.vlgmr.msra.gmra.mxu1 %vm2686_vm14, %v3073_v54 }
0x2cde   :  { %4537 = vmatprep.mubr.msk.f32.mxu0 %vm4893_vm13, %v4889_v0  ;;  %4545 = vmatprep.subr.mxu0 %v4889_v0 }
0x2cdf   :  { %4552 = vmatprep.mubr.msk.f32.mxu1 %vm4893_vm13, %v4889_v0 }
0x2ce0   :  { %v3153_v20 = vpop.permute.xlu0 %3152  ;;  %4538 = vmatmul.mubr.msk.f32.vlgmr.msra.gmra.mxu0 %vm2686_vm14, %v2995_v52  ;;  %v3231_v15 = vpop.permute.xlu1 %3230 }
0x2ce1   :  { %4546 = vmatpush3.xpose.msk.msra.mxu0 %vm2686_vm14, %v3153_v20  ;;  %4551 = vmatpush3.xpose.msk.msra.mxu1 %vm2686_vm14, %v3231_v15 }
0x2ce2   :  { %4547 = vmatprep.mubr.msk.f32.mxu0 %vm4893_vm13, %v4889_v0  ;;  %4555 = vmatprep.subr.mxu0 %v4889_v0 }
0x2ce3   :  { %4560 = vmatprep.subr.mxu1 %v4889_v0 }
0x2ce4   :  { %v3151_v25 = vpop.permute.xlu0 %3150  ;;  %v3229_v9 = vpop.permute.xlu1 %3228 }
0x2ce5   :  { %4548 = vmatmul.mubr.msk.f32.vlgmr.msra.gmra.mxu0 %vm2686_vm14, %v3151_v25  ;;  %4553 = vmatmul.mubr.msk.f32.vlgmr.msra.gmra.mxu1 %vm2686_vm14, %v3229_v9 }
0x2ce6   :  { %4556 = vmatpush3.msra.mxu0 %v5791_v8  ;;  %4561 = vmatpush3.msra.mxu1 %v5793_v40 }
0x2ce7   :  { %4557 = vmatprep.mubr.msk.f32.mxu0 %vm4893_vm13, %v4889_v0  ;;  %4565 = vmatprep.subr.mxu0 %v4889_v0 }
0x2ce8   :  { %4562 = vmatprep.mubr.msk.f32.mxu1 %vm4893_vm13, %v4889_v0  ;;  %4570 = vmatprep.subr.mxu1 %v4889_v0 }
0x2d90   :  { %v2757_v56 = vpop.f32.mrf.mxu0 }
0x2d91   :  { %v3306_v27 = vsel %vm215_vm4, %v2757_v56, -inf }
0x2d92   :  { %v4519_v49 = vpop.f32.mrf.mxu0  ;;  %3307 = vmax.xlane.f32.xlu0 %v3306_v27 }
0x2d94   :  { %v2834_v33 = vpop.f32.mrf.mxu0 }
0x2d95   :  { %v3318_v3 = vsel %vm215_vm4, %v2834_v33, -inf }
0x2d96   :  { %3319 = vmax.xlane.f32.xlu1 %v3318_v3  ;;  %v4524_v14 = vpop.f32.mrf.mxu0 }
0x2d98   :  { %v2912_v51 = vpop.f32.mrf.mxu0 }
0x2d99   :  { %v3309_v36 = vsel %vm215_vm4, %v2912_v51, -inf }
0x2d9a   :  { %3310 = vmax.xlane.f32.xlu0 %v3309_v36  ;;  %v4529_v42 = vpop.f32.mrf.mxu0 }
0x2d9c   :  { %v2990_v44 = vpop.f32.mrf.mxu0 }
0x2d9d   :  { %v3146_v47 = vpop.f32.mrf.mxu1  ;;  %v3321_v53 = vsel %vm215_vm4, %v2990_v44, -inf }
0x2d9e   :  { %3322 = vmax.xlane.f32.xlu0 %v3321_v53  ;;  %v4534_v57 = vpop.f32.mrf.mxu0  ;;  %v3324_v2 = vsel %vm215_vm4, %v3146_v47, -inf }
0x2d9f   :  { %v4544_v28 = vpop.f32.mrf.mxu1 }
0x2da0   :  { %v3068_v1 = vpop.f32.mrf.mxu0 }
0x2da1   :  { %v3312_v13 = vsel %vm215_vm4, %v3068_v1, -inf }
0x2da2   :  { %3313 = vmax.xlane.f32.xlu1 %v3312_v13  ;;  %v4539_v37 = vpop.f32.mrf.mxu0  ;;  %3325 = vmax.xlane.f32.xlu0 %v3324_v2 }
0x2da5   :  { %v3224_v60 = vpop.f32.mrf.mxu0  ;;  %v3302_v61 = vpop.f32.mrf.mxu1 }
0x2da6   :  { %v3315_v34 = vsel %vm215_vm4, %v3224_v60, -inf  ;;  %v3327_v30 = vsel %vm215_vm4, %v3302_v61, -inf }
0x2da7   :  { %3316 = vmax.xlane.f32.xlu1 %v3315_v34  ;;  %v4549_v43 = vpop.f32.mrf.mxu0  ;;  %3328 = vmax.xlane.f32.xlu0 %v3327_v30  ;;  %v4554_v10 = vpop.f32.mrf.mxu1 }
0x2db8   :  { %3541 = vrot.lane.b32.xlu1 %v5791_v8, %s4894_s7 }
0x2e1b   :  { %v3308_v32 = vpop.xlane.xlu0 %3307 }
0x2e1c   :  { %v3330_v45 = vsub.f32 %v2757_v56, %v3308_v32 }
0x2e1e   :  { %v3338_v46 = vmul.f32 1.442695, %v3330_v45 }
0x2e1f   :  { %v3320_v62 = vpop.xlane.xlu1 %3319 }
0x2e20   :  { %4830 = vpow2.f32 %v3338_v46  ;;  %v3334_v63 = vsub.f32 %v2834_v33, %v3320_v62 }
0x2e22   :  { %v3346_v11 = vmul.f32 1.442695, %v3334_v63 }
0x2e23   :  { %v3311_v12 = vpop.xlane.xlu0 %3310 }
0x2e24   :  { %4832 = vpow2.f32 %v3346_v11  ;;  %v3331_v38 = vsub.f32 %v2912_v51, %v3311_v12 }
0x2e26   :  { %v3340_v16 = vmul.f32 1.442695, %v3331_v38 }
0x2e27   :  { %v3323_v35 = vpop.xlane.xlu0 %3322 }
0x2e28   :  { %4834 = vpow2.f32 %v3340_v16  ;;  %v3335_v39 = vsub.f32 %v2990_v44, %v3323_v35 }
0x2e2a   :  { %v3348_v55 = vmul.f32 1.442695, %v3335_v39  ;;  %v91_v39 = vld [vmem:[%s5965_s2 + $0xf0] sm:$0xff] }
0x2e2b   :  { %v3326_v21 = vpop.xlane.xlu0 %3325  ;;  %v3314_v20 = vpop.xlane.xlu1 %3313 }
0x2e2c   :  { %v3336_v50 = vsub.f32 %v3146_v47, %v3326_v21  ;;  %v3332_v15 = vsub.f32 %v3068_v1, %v3314_v20 }
0x2e2d   :  { %v4831_v17 = vpop.eup %4830 }
0x2e2e   :  { %v3350_v18 = vmul.f32 1.442695, %v3336_v50  ;;  %v3354_v41 = vsel %vm215_vm4, %v4831_v17, 0.0  ;;  %v3342_v25 = vmul.f32 1.442695, %v3332_v15 }
0x2e2f   :  { %3355 = vadd.xlane.f32.xlu1 %v3354_v41 }
0x2e30   :  { %4836 = vpow2.f32 %v3350_v18  ;;  %v3329_v19 = vpop.xlane.xlu0 %3328  ;;  %v3317_v23 = vpop.xlane.xlu1 %3316 }
0x2e31   :  { %v4833_v5 = vpop.eup %4832  ;;  %v3337_v31 = vsub.f32 %v3302_v61, %v3329_v19  ;;  %v3333_v9 = vsub.f32 %v3224_v60, %v3317_v23  ;;  %v90_v19 = vld [vmem:[%s5965_s2 + $0xe0] sm:$0xff] }
0x2e32   :  { %v3366_v24 = vsel %vm215_vm4, %v4833_v5, 0.0 }
0x2e33   :  { %v3352_v58 = vmul.f32 1.442695, %v3337_v31  ;;  %3367 = vadd.xlane.f32.xlu0 %v3366_v24  ;;  %v3344_v56 = vmul.f32 1.442695, %v3333_v9 }
0x2e34   :  { %v3542_v14 = vpop.permute.xlu1 %3541 }
0x2e35   :  { %v4835_v26 = vpop.eup %4834  ;;  %4838 = vpow2.f32 %v3352_v58  ;;  %v89_v58 = vld [vmem:[%s5965_s2 + $0xd0] sm:$0xff] }
0x2e36   :  { %v3357_v59 = vsel %vm215_vm4, %v4835_v26, 0.0  ;;  %4840 = vpow2.f32 %v3348_v55 }
0x2e37   :  { %3358 = vadd.xlane.f32.xlu1 %v3357_v59  ;;  %4842 = vpow2.f32 %v3342_v25  ;;  %v87_v59 = vld [vmem:[%s5965_s2 + $0xb0] sm:$0xff] }
0x2e38   :  { %4844 = vpow2.f32 %v3344_v56 }
0x2e3d   :  { %v5818_v29 = vpop.eup %4836 }
0x2e3e   :  { %v3372_v7 = vsel %vm215_vm4, %v5818_v29, 0.0 }
0x2e3f   :  { %3373 = vadd.xlane.f32.xlu0 %v3372_v7  ;;  %v85_v7 = vld [vmem:[%s5965_s2 + $0x90] sm:$0xff] }
0x2e42   :  { %v5822_v52 = vpop.eup %4838 }
0x2e43   :  { %v3375_v54 = vsel %vm215_vm4, %v5822_v52, 0.0  ;;  %v4841_v22 = vpop.eup %4840 }
0x2e44   :  { %3376 = vadd.xlane.f32.xlu0 %v3375_v54  ;;  %v3369_v6 = vsel %vm215_vm4, %v4841_v22, 0.0  ;;  %v5835_v27 = vpop.eup %4842 }
0x2e45   :  { %v3360_v49 = vsel %vm215_vm4, %v5835_v27, 0.0  ;;  %v5839_v33 = vpop.eup %4844 }
0x2e46   :  { %v3363_v3 = vsel %vm215_vm4, %v5839_v33, 0.0 }
0x2e48   :  { %3694 = vrot.lane.b32.xlu1 %v5791_v8, %s4896_s0  ;;  %3370 = vadd.xlane.f32.xlu0 %v3369_v6 }
0x2e4c   :  { %3770 = vrot.lane.b32.xlu1 %v5793_v40, %s4896_s0 }
0x2e5e   :  { %3618 = vrot.lane.b32.xlu0 %v5793_v40, %s4894_s7 }
0x2e62   :  { %3846 = vrot.lane.b32.xlu0 %v5791_v8, %s4898_s10 }
0x2e70   :  { %3361 = vadd.xlane.f32.xlu1 %v3360_v49 }
0x2e74   :  { %3364 = vadd.xlane.f32.xlu1 %v3363_v3 }
0x2e85   :  { %3922 = vrot.lane.b32.xlu1 %v5793_v40, %s4898_s10 }
0x2eb8   :  { %v3356_v51 = vpop.xlane.xlu1 %3355 }
0x2eb9   :  { %4846 = vrcp.f32 %v3356_v51 }
0x2ebc   :  { %v3368_v8 = vpop.xlane.xlu0 %3367 }
0x2ebd   :  { %4848 = vrcp.f32 %v3368_v8 }
0x2ec0   :  { %v3359_v36 = vpop.xlane.xlu1 %3358 }
0x2ec1   :  { %4850 = vrcp.f32 %v3359_v36 }
0x2ec4   :  { %v3695_v13 = vpop.permute.xlu1 %3694 }
0x2ec6   :  { %v4847_v42 = vpop.eup %4846 }
0x2ec7   :  { %v3379_v44 = vmul.f32 %v4847_v42, %v4831_v17 }
0x2ec8   :  { %v3374_v47 = vpop.xlane.xlu0 %3373  ;;  %v3771_v30 = vpop.permute.xlu1 %3770 }
0x2ec9   :  { %4558 = vmatmul.mubr.msk.f32.vlgmr.msra.gmra.mxu0 %vm215_vm4, %v3379_v44  ;;  %v99_v44 = vld [vmem:[#allocation2 + $0x38] sm:$0xff] }
0x2eca   :  { %v4849_v53 = vpop.eup %4848  ;;  %4566 = vmatpush3.msra.mxu0 %v3542_v14  ;;  %4567 = vmatprep.mubr.msk.f32.mxu0 %vm4893_vm13, %v4889_v0 }
0x2ecb   :  { %v3387_v57 = vmul.f32 %v4849_v53, %v4833_v5  ;;  %4575 = vmatprep.subr.mxu0 %v4889_v0  ;;  %v97_v53 = vld [vmem:[#allocation2 + $0x28] sm:$0xff] }
0x2ecd   :  { %4563 = vmatmul.mubr.msk.f32.vlgmr.msra.gmra.mxu1 %vm215_vm4, %v3387_v57  ;;  %v3377_v40 = vpop.xlane.xlu0 %3376  ;;  %v96_v57 = vld [vmem:[#allocation2 + $0x20] sm:$0xff] }
0x2ece   :  { %v4851_v28 = vpop.eup %4850  ;;  %4572 = vmatprep.mubr.msk.f32.mxu1 %vm4893_vm13, %v4889_v0 }
0x2ecf   :  { %v3381_v1 = vmul.f32 %v4851_v28, %v4835_v26  ;;  %v88_v26 = vld [vmem:[%s5965_s2 + $0xc0] sm:$0xff]  ;;  %v94_v28 = vld [vmem:[#allocation2 + $0x10] sm:$0xff] }
0x2ed1   :  { %v3371_v2 = vpop.xlane.xlu0 %3370  ;;  %4568 = vmatmul.mubr.msk.f32.vlgmr.msra.gmra.mxu0 %vm215_vm4, %v3381_v1  ;;  %v93_v1 = vld [vmem:[#allocation2 + $0x8] sm:$0xff] }
0x2ed2   :  { %4852 = vrcp.f32 %v3371_v2  ;;  %4576 = vmatpush3.msra.mxu0 %v3695_v13  ;;  %4577 = vmatprep.mubr.msk.f32.mxu0 %vm4893_vm13, %v4889_v0  ;;  %v92_v13 = vld [vmem:[#allocation2] sm:$0xff]  ;;  %v115_v2 = vld [vmem:[#allocation2 + $0xb8] sm:$0xff] }
0x2ed3   :  { %4585 = vmatprep.subr.mxu0 %v4889_v0  ;;  %4854 = vrcp.f32 %v3374_v47  ;;  %v98_v47 = vld [vmem:[#allocation2 + $0x30] sm:$0xff] }
0x2ed4   :  { %4856 = vrcp.f32 %v3377_v40  ;;  %v95_v40 = vld [vmem:[#allocation2 + $0x18] sm:$0xff] }
0x2ed5   :  { %v3619_v37 = vpop.permute.xlu0 %3618 }
0x2ed6   :  { %4571 = vmatpush3.msra.mxu1 %v3619_v37  ;;  %v114_v37 = vld [vmem:[#allocation2 + $0xb0] sm:$0xff] }
0x2ed7   :  { %4580 = vmatprep.subr.mxu1 %v4889_v0 }
0x2ed9   :  { %v3847_v12 = vpop.permute.xlu0 %3846 }
0x2edf   :  { %v4853_v60 = vpop.eup %4852 }
0x2ee0   :  { %v3389_v61 = vmul.f32 %v4853_v60, %v4841_v22  ;;  %v4855_v34 = vpop.eup %4854  ;;  %v113_v60 = vld [vmem:[#allocation2 + $0xa8] sm:$0xff] }
0x2ee1   :  { %v3391_v43 = vmul.f32 %v4855_v34, %v5818_v29  ;;  %v4857_v45 = vpop.eup %4856  ;;  %v86_v29 = vld [vmem:[%s5965_s2 + $0xa0] sm:$0xff]  ;;  %v111_v34 = vld [vmem:[#allocation2 + $0x98] sm:$0xff] }
0x2ee2   :  { %4573 = vmatmul.mubr.msk.f32.vlgmr.msra.gmra.mxu1 %vm215_vm4, %v3389_v61  ;;  %v3393_v62 = vmul.f32 %v4857_v45, %v5822_v52  ;;  %v84_v52 = vld [vmem:[%s5965_s2 + $0x80] sm:$0xff]  ;;  %v106_v45 = vld [vmem:[#allocation2 + $0x70] sm:$0xff] }
0x2ee3   :  { %4581 = vmatpush3.msra.mxu1 %v3771_v30  ;;  %4582 = vmatprep.mubr.msk.f32.mxu1 %vm4893_vm13, %v4889_v0  ;;  %v112_v61 = vld [vmem:[#allocation2 + $0xa0] sm:$0xff]  ;;  %v110_v30 = vld [vmem:[#allocation2 + $0x90] sm:$0xff] }
0x2ee4   :  { %4590 = vmatprep.subr.mxu1 %v4889_v0 }
0x2ee6   :  { %4583 = vmatmul.mubr.msk.f32.vlgmr.msra.gmra.mxu1 %vm215_vm4, %v3391_v43  ;;  %v109_v43 = vld [vmem:[#allocation2 + $0x88] sm:$0xff] }
0x2ee7   :  { %4592 = vmatprep.mubr.msk.f32.mxu1 %vm4893_vm13, %v4889_v0 }
0x2ef9   :  { %v3362_v10 = vpop.xlane.xlu1 %3361 }
0x2efa   :  { %4858 = vrcp.f32 %v3362_v10  ;;  %v108_v10 = vld [vmem:[#allocation2 + $0x80] sm:$0xff] }
0x2efd   :  { %v3365_v32 = vpop.xlane.xlu1 %3364 }
0x2efe   :  { %4860 = vrcp.f32 %v3365_v32  ;;  %v107_v32 = vld [vmem:[#allocation2 + $0x78] sm:$0xff] }
0x2f01   :  { %v3923_v46 = vpop.permute.xlu1 %3922 }
0x2f02   :  { %4591 = vmatpush3.msra.mxu1 %v3923_v46  ;;  %v105_v46 = vld [vmem:[#allocation2 + $0x68] sm:$0xff] }
0x2f03   :  { %4593 = vmatmul.mubr.msk.f32.vlgmr.msra.gmra.mxu1 %vm215_vm4, %v3393_v62  ;;  %4614 = vmatprep.subr.mxu1 %v4889_v0  ;;  %v104_v62 = vld [vmem:[#allocation2 + $0x60] sm:$0xff] }
0x2f04   :  { %4630 = vmatprep.mubr.msk.f32.mxu1 %vm4893_vm13, %v4889_v0  ;;  %4615 = vmatpush3.msra.mxu1 %v99_v44  ;;  %v4213_v44 = vsub.s32 5, %v5059_v48 }
0x2f05   :  { %4616 = vmatprep.subr.mxu1 %v4889_v0 }
0x2f06   :  { %4617 = vmatpush3.msra.mxu1 %v98_v47  ;;  %v4214_v47 = vrot.slane %v5734_v4, %v4213_v44 }
0x2f07   :  { %v4859_v63 = vpop.eup %4858  ;;  %4618 = vmatprep.subr.mxu1 %v4889_v0 }
0x2f08   :  { %v3383_v11 = vmul.f32 %v4859_v63, %v5835_v27  ;;  %4619 = vmatpush3.msra.mxu1 %v97_v53  ;;  %v103_v63 = vld [vmem:[#allocation2 + $0x58] sm:$0xff] }
0x2f09   :  { %4620 = vmatprep.subr.mxu1 %v4889_v0 }
0x2f0a   :  { %4578 = vmatmul.mubr.msk.f32.vlgmr.msra.gmra.mxu0 %vm215_vm4, %v3383_v11  ;;  %4621 = vmatpush3.msra.mxu1 %v96_v57  ;;  %v4031_v11 = vsub.s32 3, %v5059_v48 }
0x2f0b   :  { %v4861_v38 = vpop.eup %4860  ;;  %4586 = vmatpush3.msra.mxu0 %v3847_v12  ;;  %4587 = vmatprep.mubr.msk.f32.mxu0 %vm4893_vm13, %v4889_v0 }
0x2f0c   :  { %v3385_v16 = vmul.f32 %v4861_v38, %v5839_v33  ;;  %4595 = vmatprep.subr.mxu0 %v91_v39  ;;  %4622 = vmatprep.subr.mxu1 %v4889_v0  ;;  %v4032_v12 = vrot.slane %v5734_v4, %v4031_v11 }
0x2f0d   :  { %4623 = vmatpush3.msra.mxu1 %v95_v40 }
0x2f0e   :  { %4588 = vmatmul.mubr.msk.f32.vlgmr.msra.gmra.mxu0 %vm215_vm4, %v3385_v16  ;;  %4624 = vmatprep.subr.mxu1 %v4889_v0 }
0x2f0f   :  { %4596 = vmatpush3.msra.mxu0 %v91_v39  ;;  %4625 = vmatpush3.msra.mxu1 %v94_v28 }
0x2f10   :  { %4597 = vmatprep.subr.mxu0 %v90_v19  ;;  %4626 = vmatprep.subr.mxu1 %v4889_v0 }
0x2f11   :  { %4598 = vmatpush3.msra.mxu0 %v90_v19  ;;  %4627 = vmatpush3.msra.mxu1 %v93_v1  ;;  %v4288_v1 = vsub.s32 6, %v5059_v48 }
0x2f12   :  { %4599 = vmatprep.subr.mxu0 %v89_v58  ;;  %4628 = vmatprep.subr.mxu1 %v4889_v0 }
0x2f13   :  { %4600 = vmatpush3.msra.mxu0 %v89_v58  ;;  %4629 = vmatpush3.msra.mxu1 %v92_v13  ;;  %v4289_v13 = vrot.slane %v5734_v4, %v4288_v1 }
0x2f14   :  { %4601 = vmatprep.subr.mxu0 %v88_v26  ;;  %4668 = vmatprep.subr.mxu1 %v4889_v0 }
0x2f15   :  { %4602 = vmatpush3.msra.mxu0 %v88_v26 }
0x2f16   :  { %4603 = vmatprep.subr.mxu0 %v87_v59 }
0x2f17   :  { %4604 = vmatpush3.msra.mxu0 %v87_v59 }
0x2f18   :  { %4605 = vmatprep.subr.mxu0 %v86_v29 }
0x2f19   :  { %4606 = vmatpush3.msra.mxu0 %v86_v29 }
0x2f1a   :  { %4607 = vmatprep.subr.mxu0 %v85_v7 }
0x2f1b   :  { %4608 = vmatpush3.msra.mxu0 %v85_v7 }
0x2f1c   :  { %4609 = vmatprep.subr.mxu0 %v84_v52 }
0x2f1d   :  { %4610 = vmatpush3.msra.mxu0 %v84_v52 }
0x2f1e   :  { %4633 = vmatprep.subr.mxu0 %v4889_v0 }
0x2f89   :  { %v3463_v35 = vpop.f32.mrf.mxu0 }
0x2f8b   :  { %v4559_v21 = vpop.f32.mrf.mxu0 }
0x2f8d   :  { %v3536_v50 = vpop.f32.mrf.mxu1 }
0x2f8f   :  { %v4564_v17 = vpop.f32.mrf.mxu1 }
0x2f91   :  { %v3613_v18 = vpop.f32.mrf.mxu0 }
0x2f92   :  { %4000 = vrot.lane.b32.xlu0 %v3613_v18, %s4897_s9 }
0x2f93   :  { %v4569_v41 = vpop.f32.mrf.mxu0 }
0x2fa2   :  { %v3690_v5 = vpop.f32.mrf.mxu1 }
0x2fa3   :  { %4002 = vrot.lane.b32.xlu1 %v3690_v5, %s4897_s9 }
0x2fa4   :  { %v4574_v31 = vpop.f32.mrf.mxu1 }
0x2fa6   :  { %v3842_v24 = vpop.f32.mrf.mxu1 }
0x2fa7   :  { %4010 = vrot.lane.b32.xlu1 %v3842_v24, %s4891_s27 }
0x2fa8   :  { %v4584_v55 = vpop.f32.mrf.mxu1 }
0x2fc3   :  { %v3994_v54 = vpop.f32.mrf.mxu1 }
0x2fc4   :  { %4018 = vrot.lane.b32.xlu1 %v3994_v54, %s4895_s8 }
0x2fc5   :  { %v4594_v22 = vpop.f32.mrf.mxu1 }
0x2fc6   :  { %v102_v22 = vld [vmem:[#allocation2 + $0x50] sm:$0xff] }
0x2fca   :  { %v3766_v6 = vpop.f32.mrf.mxu0 }
0x2fcb   :  { %4008 = vrot.lane.b32.xlu0 %v3766_v6, %s4891_s27  ;;  %v101_v6 = vld [vmem:[#allocation2 + $0x48] sm:$0xff] }
0x2fcc   :  { %v4579_v20 = vpop.f32.mrf.mxu0 }
0x2fcd   :  { %v100_v20 = vld [vmem:[#allocation2 + $0x40] sm:$0xff] }
0x2fce   :  { %v3918_v15 = vpop.f32.mrf.mxu0 }
0x2fcf   :  { %4016 = vrot.lane.b32.xlu0 %v3918_v15, %s4895_s8  ;;  %v123_v15 = vld [vmem:[#allocation2 + $0xf8] sm:$0xff] }
0x2fd0   :  { %v4589_v23 = vpop.f32.mrf.mxu0 }
0x2fd1   :  { %v122_v23 = vld [vmem:[#allocation2 + $0xf0] sm:$0xff] }
0x3004   :  { %v4001_v9 = vpop.permute.xlu0 %4000 }
0x3005   :  { %v4022_v49 = vsel %vm2686_vm14, %v3463_v35, %v4001_v9  ;;  %v120_v9 = vld [vmem:[#allocation2 + $0xe0] sm:$0xff] }
0x3015   :  { %v4003_v25 = vpop.permute.xlu1 %4002 }
0x3016   :  { %v4023_v3 = vsel %vm2686_vm14, %v3536_v50, %v4003_v25  ;;  %v121_v25 = vld [vmem:[#allocation2 + $0xe8] sm:$0xff] }
0x3019   :  { %v4011_v56 = vpop.permute.xlu1 %4010 }
0x301a   :  { %v4025_v8 = vsel %vm317_vm6, %v4023_v3, %v4011_v56  ;;  %v119_v56 = vld [vmem:[#allocation2 + $0xd8] sm:$0xff] }
0x3036   :  { %v4019_v33 = vpop.permute.xlu1 %4018 }
0x3037   :  { %v4028_v42 = vsel %vm4026_vm15, %v4025_v8, %v4019_v33  ;;  %v118_v8 = vld [vmem:[#allocation2 + $0xd0] sm:$0xff] }
0x303d   :  { %v4009_v27 = vpop.permute.xlu0 %4008 }
0x303e   :  { %v4024_v14 = vsel %vm317_vm6, %v4022_v49, %v4009_v27  ;;  %v4133_v27 = vsub.s32 4, %v5059_v48 }
0x3040   :  { %v4134_v49 = vrot.slane %v5734_v4, %v4133_v27 }
0x3041   :  { %v4017_v51 = vpop.permute.xlu0 %4016 }
0x3042   :  { %v4027_v36 = vsel %vm4026_vm15, %v4024_v14, %v4017_v51 }
0x3043   :  { %4611 = vmatprep.mubr.msk.f32.mxu0 %vm1297_vm7, %v4027_v36  ;;  %v117_v36 = vld [vmem:[#allocation2 + $0xc8] sm:$0xff] }
0x3044   :  { %4612 = vmatmul.mubr.msk.f32.vlgmr.msra.gmra.mxu0 %vm1297_vm7, %v4028_v42  ;;  %v116_v42 = vld [vmem:[#allocation2 + $0xc0] sm:$0xff] }
0x3045   :  { %4665 = vmatprep.mubr.msk.f32.mxu0 %vm4893_vm13, %v4889_v0  ;;  %4634 = vmatpush3.msra.mxu0 %v115_v2 }
0x3046   :  { %4635 = vmatprep.subr.mxu0 %v4889_v0 }
0x3047   :  { %4636 = vmatpush3.msra.mxu0 %v114_v37 }
0x3048   :  { %4637 = vmatprep.subr.mxu0 %v4889_v0 }
0x3049   :  { %4638 = vmatpush3.msra.mxu0 %v113_v60 }
0x304a   :  { %4639 = vmatprep.subr.mxu0 %v4889_v0 }
0x304b   :  { %4640 = vmatpush3.msra.mxu0 %v112_v61 }
0x304c   :  { %4641 = vmatprep.subr.mxu0 %v4889_v0 }
0x304d   :  { %4642 = vmatpush3.msra.mxu0 %v111_v34 }
0x304e   :  { %4643 = vmatprep.subr.mxu0 %v4889_v0 }
0x304f   :  { %4644 = vmatpush3.msra.mxu0 %v110_v30 }
0x3050   :  { %4645 = vmatprep.subr.mxu0 %v4889_v0 }
0x3051   :  { %4646 = vmatpush3.msra.mxu0 %v109_v43 }
0x3052   :  { %4647 = vmatprep.subr.mxu0 %v4889_v0 }
0x3053   :  { %4648 = vmatpush3.msra.mxu0 %v108_v10 }
0x3054   :  { %4649 = vmatprep.subr.mxu0 %v4889_v0 }
0x3055   :  { %4650 = vmatpush3.msra.mxu0 %v107_v32 }
0x3056   :  { %4651 = vmatprep.subr.mxu0 %v4889_v0 }
0x3057   :  { %4652 = vmatpush3.msra.mxu0 %v106_v45 }
0x3058   :  { %4653 = vmatprep.subr.mxu0 %v4889_v0 }
0x3059   :  { %4654 = vmatpush3.msra.mxu0 %v105_v46 }
0x305a   :  { %4655 = vmatprep.subr.mxu0 %v4889_v0 }
0x305b   :  { %4656 = vmatpush3.msra.mxu0 %v104_v62 }
0x305c   :  { %4657 = vmatprep.subr.mxu0 %v4889_v0 }
0x305d   :  { %4658 = vmatpush3.msra.mxu0 %v103_v63 }
0x305e   :  { %4659 = vmatprep.subr.mxu0 %v4889_v0 }
0x305f   :  { %4660 = vmatpush3.msra.mxu0 %v102_v22 }
0x3060   :  { %4661 = vmatprep.subr.mxu0 %v4889_v0 }
0x3061   :  { %4662 = vmatpush3.msra.mxu0 %v101_v6 }
0x3062   :  { %4663 = vmatprep.subr.mxu0 %v4889_v0 }
0x3063   :  { %4664 = vmatpush3.msra.mxu0 %v100_v20 }
0x3104   :  { %v4613_v38 = vpop.f32.mrf.mxu0 }
0x3105   :  { %v4111_v16 = vadd.f32 %v4613_v38, %v4032_v12 }
0x3106   :  { %v4105_v35 = vpop.f32.mrf.mxu0 }
0x3107   :  { %v4121_v21 = vsel %vm1297_vm7, %v4111_v16, 0.0  ;;  %v4106_v50 = vadd.f32 %v4105_v35, %v4032_v12 }
0x3108   :  { %v4122_v17 = vrot.slane %v4121_v21, 4 }
0x3109   :  { %v4114_v18 = vsel %vm1297_vm7, %v4106_v50, 0.0 }
0x310a   :  { %v4123_v41 = vadd.f32 %v4122_v17, %v4121_v21  ;;  %v4115_v39 = vrot.slane %v4114_v18, 4 }
0x310c   :  { %v4124_v19 = vrot.slane %v4123_v41, 2  ;;  %v4116_v5 = vadd.f32 %v4115_v39, %v4114_v18 }
0x310e   :  { %v4125_v31 = vadd.f32 %v4124_v19, %v4123_v41  ;;  %v4117_v24 = vrot.slane %v4116_v5, 2 }
0x3110   :  { %v4126_v55 = vrot.slane %v4125_v31, 1  ;;  %v4118_v58 = vadd.f32 %v4117_v24, %v4116_v5 }
0x3112   :  { %v4127_v26 = vadd.f32 %v4126_v55, %v4125_v31  ;;  %v4119_v59 = vrot.slane %v4118_v58, 1 }
0x3114   :  { %v4120_v29 = vadd.f32 %v4119_v59, %v4118_v58  ;;  %v4130_v7 = vmul.f32 0.125, %v4127_v26 }
0x3116   :  { %v4129_v52 = vmul.f32 0.125, %v4120_v29 }
0x3118   :  { %v4137_v54 = vsel %vm134_vm0, %v4130_v7, %v4129_v52  ;;  %vm4363_vm0 = vcmask 1024  }
0x3119   :  { %4631 = vmatmul.mubr.msk.f32.vlgmr.msra.gmra.mxu1 %vm1297_vm7, %v4137_v54 }
0x311a   :  { %4684 = vmatprep.mubr.msk.f32.mxu1 %vm4893_vm13, %v4889_v0  ;;  %4669 = vmatpush3.msra.mxu1 %v123_v15 }
0x311b   :  { %4670 = vmatprep.subr.mxu1 %v4889_v0 }
0x311c   :  { %4671 = vmatpush3.msra.mxu1 %v122_v23 }
0x311d   :  { %4672 = vmatprep.subr.mxu1 %v4889_v0 }
0x311e   :  { %4673 = vmatpush3.msra.mxu1 %v121_v25 }
0x311f   :  { %4674 = vmatprep.subr.mxu1 %v4889_v0 }
0x3120   :  { %4675 = vmatpush3.msra.mxu1 %v120_v9 }
0x3121   :  { %4676 = vmatprep.subr.mxu1 %v4889_v0 }
0x3122   :  { %4677 = vmatpush3.msra.mxu1 %v119_v56 }
0x3123   :  { %4678 = vmatprep.subr.mxu1 %v4889_v0 }
0x3124   :  { %4679 = vmatpush3.msra.mxu1 %v118_v8 }
0x3125   :  { %4680 = vmatprep.subr.mxu1 %v4889_v0 }
0x3126   :  { %4681 = vmatpush3.msra.mxu1 %v117_v36 }
0x3127   :  { %4682 = vmatprep.subr.mxu1 %v4889_v0 }
0x3128   :  { %4683 = vmatpush3.msra.mxu1 %v116_v42 }
0x31d9   :  { %v4206_v33 = vpop.f32.mrf.mxu1 }
0x31da   :  { %v4207_v3 = vadd.f32 %v4206_v33, %v4134_v49 }
0x31db   :  { %v4632_v14 = vpop.f32.mrf.mxu1 }
0x31dc   :  { %v4210_v51 = vmax.f32 %v4207_v3, 0.0 }
0x31de   :  { %4666 = vmatmul.mubr.f32.vlgmr.msra.gmra.mxu0 %v4210_v51 }
0x329e   :  { %v4281_v53 = vpop.f32.mrf.mxu0 }
0x329f   :  { %v4282_v57 = vadd.f32 %v4281_v53, %v4214_v47 }
0x32a0   :  { %v4667_v40 = vpop.f32.mrf.mxu0 }
0x32a1   :  { %v4285_v28 = vmax.f32 %v4282_v57, 0.0 }
0x32a3   :  { %4685 = vmatmul.mubr.msk.f32.vlgmr.msra.gmra.mxu1 %vm1297_vm7, %v4285_v28 }
0x3363   :  { %v4359_v2 = vpop.f32.mrf.mxu1 }
0x3364   :  { %v4360_v37 = vadd.f32 %v4359_v2, %v4289_v13 }
0x3365   :  { %v4686_v60 = vpop.f32.mrf.mxu1 }
0x3366   :  { %4364 = vst.msk [vmem:[%s5968_s5] sm:$0x3] %vm4363_vm0, %v4360_v37 }
0x3367   :  { %4369 = vsyncpa [#allocation3], 1 }

</bundles_post_ra>
